<compile_context>
chip_gen: v6e
topology: v6e:2x2x1
jax: 0.10.0
libtpu: 0.0.40
codegen_flags: <defaults>
</compile_context>

<pallas_src>
import jax
import jax.numpy as jnp
from jax.experimental import pallas as pl
from jax.experimental.pallas import tpu as pltpu


def _gcn_fused_kernel(x_ref, a_ref, w1_ref, b1_ref, w2_ref, b2_ref, o_ref):
    """Both GCN layers fused; everything VMEM-resident, H1 never leaves the kernel.

    Layer l:  H_l = act( (A_hat @ H_{l-1}) @ W_l^T + b_l )   (reassociated order)
    """
    compute_dtype = x_ref.dtype  # bf16

    # ---- Layer 1 ----
    # Aggregate first: Z1 = A_hat @ X   (N,N)@(N,F) -> f32 acc
    z1 = jnp.dot(a_ref[...], x_ref[...], preferred_element_type=jnp.float32)
    # Feature transform: H1 = relu(Z1 @ W1_t + b1)   (N,F)@(F,F) -> f32 acc
    h1 = jnp.dot(z1.astype(compute_dtype), w1_ref[...],
                 preferred_element_type=jnp.float32)
    h1 = jnp.maximum(h1 + b1_ref[...], 0.0)          # f32 epilogue (v5e-safe)

    # ---- Layer 2 ----
    z2 = jnp.dot(a_ref[...], h1.astype(compute_dtype),
                 preferred_element_type=jnp.float32)
    h2 = jnp.dot(z2.astype(compute_dtype), w2_ref[...],
                 preferred_element_type=jnp.float32)
    o_ref[...] = (h2 + b2_ref[...]).astype(o_ref.dtype)


def gcn_forward(x, a_hat, params, out_dtype=jnp.float32):
    """Fused two-layer GCN forward in a single pallas_call.

    x:      (N, F)   node features (cast to bf16 once here; tiny)
    a_hat:  (N, N)   normalized adjacency, pre-built & pre-cast to bf16
    params: dict with bf16 w1_t/w2_t (F_in, F_out, already transposed) and f32 b1/b2
    """
    N, F_in = x.shape
    F1 = params["w1_t"].shape[1]
    F2 = params["w2_t"].shape[1]
    assert params["w1_t"].shape[0] == F_in and params["w2_t"].shape[0] == F1

    xb = x.astype(jnp.bfloat16)
    b1 = params["b1"].reshape(1, F1).astype(jnp.float32)
    b2 = params["b2"].reshape(1, F2).astype(jnp.float32)

    flops = 2 * (2 * N * N * F_in + 2 * N * F_in * F1)  # rough, per both layers
    bytes_accessed = (
        xb.size * 2 + a_hat.size * a_hat.dtype.itemsize
        + params["w1_t"].size * 2 + params["w2_t"].size * 2
        + b1.size * 4 + b2.size * 4
        + N * F2 * jnp.dtype(out_dtype).itemsize
    )

    vmem_spec = pl.BlockSpec(memory_space=pltpu.MemorySpace.VMEM)
    return pl.pallas_call(
        _gcn_fused_kernel,
        out_shape=jax.ShapeDtypeStruct((N, F2), out_dtype),
        in_specs=[vmem_spec] * 6,
        out_specs=vmem_spec,
        compiler_params=pltpu.CompilerParams(
            vmem_limit_bytes=32 * 1024 * 1024,
        ),
        cost_estimate=pl.CostEstimate(
            flops=flops, transcendentals=0, bytes_accessed=bytes_accessed),
    )(xb, a_hat, params["w1_t"], b1, params["w2_t"], b2)


def build_norm_adj(edge_index, num_nodes):
    """Dense normalized adjacency D^{-1/2}(A + I_remaining)D^{-1/2} (plain JAX glue).

    Built ONCE outside the jit'd hot path (edge_index static across calls).
    Matches torch_geometric gcn_norm: self-loops only added where missing.
    """
    # TODO(synk): dense N x N adjacency is O(N^2); a true sparse gather/scatter
    # aggregation kernel would be needed for large graphs.
    src = edge_index[0]
    dst = edge_index[1]
    is_loop = (src == dst).astype(jnp.float32)
    has_loop = jnp.zeros((num_nodes,), jnp.float32).at[src].max(is_loop)
    loop_w = 1.0 - has_loop                              # add_remaining_self_loops

    loop_idx = jnp.arange(num_nodes, dtype=src.dtype)
    src_all = jnp.concatenate([src, loop_idx])
    dst_all = jnp.concatenate([dst, loop_idx])
    w_all = jnp.concatenate([jnp.ones_like(src, dtype=jnp.float32), loop_w])

    deg = jnp.zeros((num_nodes,), jnp.float32).at[dst_all].add(w_all)
    dinv = jnp.where(deg > 0.0, jax.lax.rsqrt(deg), 0.0)
    norm = dinv[src_all] * dinv[dst_all] * w_all
    # out_i = sum_{edges j->i} norm_ij * x_j   =>   A_hat[i, j] += norm_ij
    A = jnp.zeros((num_nodes, num_nodes), jnp.float32).at[dst_all, src_all].add(norm)
    return A


def init_params(key, f_in=768, f_out=768):
    """Params stored pre-transposed AND pre-cast to bf16 (casts hoisted out of forward)."""
    k1, k2 = jax.random.split(key)
    scale1 = 1.0 / jnp.sqrt(jnp.float32(f_in))
    scale2 = 1.0 / jnp.sqrt(jnp.float32(f_out))
    return {
        "w1_t": (jax.random.normal(k1, (f_in, f_out), jnp.float32) * scale1
                 ).astype(jnp.bfloat16),
        "b1": jnp.zeros((f_out,), jnp.float32),
        "w2_t": (jax.random.normal(k2, (f_out, f_out), jnp.float32) * scale2
                 ).astype(jnp.bfloat16),
        "b2": jnp.zeros((f_out,), jnp.float32),
    }


if __name__ == "__main__":
    N_NODES = 128          # small node count; feature dim 768 per the module
    N_EDGES = 512
    F = 768

    key = jax.random.PRNGKey(0)
    kx, ke, kp = jax.random.split(key, 3)

    x = jax.random.normal(kx, (N_NODES, F), jnp.float32)
    edge_index = jax.random.randint(ke, (2, N_EDGES), 0, N_NODES, jnp.int32)
    params = init_params(kp, F, F)

    # Build the normalized adjacency once, outside the jit'd per-call path.
    a_hat = build_norm_adj(edge_index, N_NODES).astype(jnp.bfloat16)
    a_hat = jax.block_until_ready(a_hat)

    fwd = jax.jit(gcn_forward)
    out = fwd(x, a_hat, params)
    jax.block_until_ready(out)

    assert out.shape == (N_NODES, F) and out.dtype == jnp.float32
    print("KERNEL_OK")
</pallas_src>

<mosaic_0001>
module attributes {stable_mosaic.version = 11 : i64} {
  func.func @_gcn_fused_kernel(%arg0: memref<128x768xbf16, #tpu.memory_space<vmem>>, %arg1: memref<128x128xbf16, #tpu.memory_space<vmem>>, %arg2: memref<768x768xbf16, #tpu.memory_space<vmem>>, %arg3: memref<1x768xf32, #tpu.memory_space<vmem>>, %arg4: memref<768x768xbf16, #tpu.memory_space<vmem>>, %arg5: memref<1x768xf32, #tpu.memory_space<vmem>>, %arg6: memref<128x768xf32, #tpu.memory_space<vmem>>) attributes {dimension_semantics = [], scalar_prefetch = 0 : i64, scratch_operands = 0 : i64, tpu.core_type = #tpu.core_type<tc>} {
    %c0 = arith.constant 0 : index
    %c0_0 = arith.constant 0 : index
    %0 = vector.load %arg1[%c0, %c0_0] : memref<128x128xbf16, #tpu.memory_space<vmem>>, vector<128x128xbf16>
    %c0_1 = arith.constant 0 : index
    %c0_2 = arith.constant 0 : index
    %1 = vector.load %arg0[%c0_1, %c0_2] : memref<128x768xbf16, #tpu.memory_space<vmem>>, vector<128x768xbf16>
    %cst = arith.constant dense<0.000000e+00> : vector<128x768xf32>
    %2 = tpu.matmul %0, %1, %cst {dimension_numbers = #tpu.dot_dimension_numbers<[1], [0], [0], [1], [0, 0, 1, 1], [], []>} : vector<128x128xbf16>, vector<128x768xbf16>, vector<128x768xf32> -> vector<128x768xf32>
    %3 = arith.truncf %2 : vector<128x768xf32> to vector<128x768xbf16>
    %c0_3 = arith.constant 0 : index
    %c0_4 = arith.constant 0 : index
    %4 = vector.load %arg2[%c0_3, %c0_4] : memref<768x768xbf16, #tpu.memory_space<vmem>>, vector<768x768xbf16>
    %cst_5 = arith.constant dense<0.000000e+00> : vector<128x768xf32>
    %5 = tpu.matmul %3, %4, %cst_5 {dimension_numbers = #tpu.dot_dimension_numbers<[1], [0], [0], [1], [0, 0, 1, 1], [], []>} : vector<128x768xbf16>, vector<768x768xbf16>, vector<128x768xf32> -> vector<128x768xf32>
    %c0_6 = arith.constant 0 : index
    %c0_7 = arith.constant 0 : index
    %6 = vector.load %arg3[%c0_6, %c0_7] : memref<1x768xf32, #tpu.memory_space<vmem>>, vector<1x768xf32>
    %7 = vector.broadcast %6 : vector<1x768xf32> to vector<128x768xf32>
    %8 = arith.addf %5, %7 : vector<128x768xf32>
    %cst_8 = arith.constant 0.000000e+00 : f32
    %9 = vector.broadcast %cst_8 : f32 to vector<128x768xf32>
    %10 = arith.maximumf %8, %9 : vector<128x768xf32>
    %c0_9 = arith.constant 0 : index
    %c0_10 = arith.constant 0 : index
    %11 = vector.load %arg1[%c0_9, %c0_10] : memref<128x128xbf16, #tpu.memory_space<vmem>>, vector<128x128xbf16>
    %12 = arith.truncf %10 : vector<128x768xf32> to vector<128x768xbf16>
    %cst_11 = arith.constant dense<0.000000e+00> : vector<128x768xf32>
    %13 = tpu.matmul %11, %12, %cst_11 {dimension_numbers = #tpu.dot_dimension_numbers<[1], [0], [0], [1], [0, 0, 1, 1], [], []>} : vector<128x128xbf16>, vector<128x768xbf16>, vector<128x768xf32> -> vector<128x768xf32>
    %14 = arith.truncf %13 : vector<128x768xf32> to vector<128x768xbf16>
    %c0_12 = arith.constant 0 : index
    %c0_13 = arith.constant 0 : index
    %15 = vector.load %arg4[%c0_12, %c0_13] : memref<768x768xbf16, #tpu.memory_space<vmem>>, vector<768x768xbf16>
    %cst_14 = arith.constant dense<0.000000e+00> : vector<128x768xf32>
    %16 = tpu.matmul %14, %15, %cst_14 {dimension_numbers = #tpu.dot_dimension_numbers<[1], [0], [0], [1], [0, 0, 1, 1], [], []>} : vector<128x768xbf16>, vector<768x768xbf16>, vector<128x768xf32> -> vector<128x768xf32>
    %c0_15 = arith.constant 0 : index
    %c0_16 = arith.constant 0 : index
    %17 = vector.load %arg5[%c0_15, %c0_16] : memref<1x768xf32, #tpu.memory_space<vmem>>, vector<1x768xf32>
    %18 = vector.broadcast %17 : vector<1x768xf32> to vector<128x768xf32>
    %19 = arith.addf %16, %18 : vector<128x768xf32>
    %c0_17 = arith.constant 0 : index
    %c0_18 = arith.constant 0 : index
    %20 = vector.load %arg6[%c0_17, %c0_18] : memref<128x768xf32, #tpu.memory_space<vmem>>, vector<128x768xf32>
    tpu.vector_store %arg6[%c0_17, %c0_18], %19 {strides = array<i32>} : memref<128x768xf32, #tpu.memory_space<vmem>>, vector<128x768xf32>,
    return
  }
}

</mosaic_0001>

<bundles_post_ra>
// kernel: gcn_forward.1
= control target key start
LH: loop header
LB: loop body
LE: loop exit
PB: predicated region body
PF: predicated region fallthrough
CT: control target
= control target key end

     0   :  { %11 = vsyncpa [#allocation3], 0  ;;  %s10763_s0 = inlined_call_operand.vmem [shape: bf16[128,768], index: 0, kind: input, shape index: {}]   ;;  %s10764_s1 = inlined_call_operand.hbm [shape: bf16[128,128], index: 1, kind: input, shape index: {}]   ;;  %s10765_s2 = inlined_call_operand.hbm [shape: bf16[768,768], index: 2, kind: input, shape index: {}]   ;;  %s10766_s3 = inlined_call_operand.vmem [shape: f32[1,768], index: 3, kind: input, shape index: {}]   ;;  %s10767_s4 = inlined_call_operand.hbm [shape: bf16[768,768], index: 4, kind: input, shape index: {}]   ;;  %s10768_s5 = inlined_call_operand.vmem [shape: f32[1,768], index: 5, kind: input, shape index: {}]   ;;  %s10769_s6 = inlined_call_operand.hbm [shape: f32[128,768], index: 6, kind: output, shape index: {}]  }
   0x1   :  { %12 = vsyncpa [#allocation6], 0 }
   0x2   :  { %13 = vsyncpa [#allocation4], 0  ;;  %s8686_s21 = smov [#allocation5]  }
   0x3   :  { %s33_s22 = sshll.u32 %s8686_s21, 4  ;;  %s34_s22 = int_to_ptr.vmem [resolvable:$true] %s33_s22 }
   0x4   :  { %s8608_s23 = scalar_lea.vmem %s34_s22, 36864  ;;  %p8613_p1 = scmp.lt.s32.totalorder %s34_s22, %s34_s22 }
   0x5   :  { %p8609_p0 = scmp.ne.s32.totalorder %s34_s22, %s8608_s23  ;;  %p8614_p2 = scmp.lt.s32.totalorder %s8608_s23, %s8608_s23 }
   0x7   :  { %p8615_p3 = por %p8614_p2, %p8613_p1 }
   0x9   :  { %p8616_p4 = pnand %p8615_p3, %p8609_p0 }
   0xb   :  { %8619 = shalt.err (!%p8616_p4)
}
   0xc   :  { %s8687_s24 = smov 384   ;;  %s8688_s25 = smov 24  }
   0xd   :  { %39 = dma.hbm_to_vmem [thread:$0]  %s10765_s2, 36864, %s34_s22, [#allocation6], %s8687_s24, %s8687_s24, %s8688_s25  }
   0xe   :  { %s8689_s28 = smov [#allocation2]  }
   0xf   :  { %s21_s29 = sshll.u32 %s8689_s28, 4  ;;  %s22_s29 = int_to_ptr.vmem [resolvable:$true] %s21_s29 }
  0x10   :  { %s8628_s30 = scalar_lea.vmem %s22_s29, 1024  ;;  %p8633_p6 = scmp.lt.s32.totalorder %s22_s29, %s22_s29 }
  0x11   :  { %p8629_p5 = scmp.ne.s32.totalorder %s22_s29, %s8628_s30  ;;  %p8634_p7 = scmp.lt.s32.totalorder %s8628_s30, %s8628_s30 }
  0x13   :  { %p8635_p8 = por %p8634_p7, %p8633_p6 }
  0x15   :  { %p8636_p9 = pnand %p8635_p8, %p8629_p5 }
  0x17   :  { %8639 = shalt.err (!%p8636_p9)
}
  0x18   :  { %s8690_s7 = smov 64   ;;  %s8691_s8 = smov 4  }
  0x19   :  { %27 = dma.hbm_to_vmem [thread:$0]  %s10764_s1, 1024, %s22_s29, [#allocation3], %s8690_s7, %s8690_s7, %s8691_s8  }
  0x1a   :  { %s8692_s11 = smov [#allocation7]  }
  0x1b   :  { %s47_s12 = sshll.u32 %s8692_s11, 4  ;;  %s48_s12 = int_to_ptr.vmem [resolvable:$true] %s47_s12 }
  0x1c   :  { %s8648_s2 = scalar_lea.vmem %s48_s12, 36864  ;;  %p8653_p11 = scmp.lt.s32.totalorder %s48_s12, %s48_s12 }
  0x1d   :  { %p8649_p10 = scmp.ne.s32.totalorder %s48_s12, %s8648_s2  ;;  %p8654_p12 = scmp.lt.s32.totalorder %s8648_s2, %s8648_s2 }
  0x1f   :  { %p8655_p13 = por %p8654_p12, %p8653_p11 }
  0x21   :  { %p8656_p0 = pnand %p8655_p13, %p8649_p10 }
  0x23   :  { %8659 = shalt.err (!%p8656_p0)
}
  0x24   :  { %53 = dma.hbm_to_vmem [thread:$0]  %s10767_s4, 36864, %s48_s12, [#allocation6], %s8687_s24, %s8687_s24, %s8688_s25  }
  0x25   :  { %8680 = dma.done.wait [#allocation3], 1024  }
  0x26   :  { %8681 = vsyncadd [#allocation3], 4294966272 }
  0x27   :  { %8682 = dma.done.wait [#allocation6], 73728  }
  0x28   :  { %8683 = vsyncadd [#allocation6], 4294893568  ;;  %v10772_v0 = vmov 0   ;;  %v7647_v1 = vld [vmem:[%s10763_s0 + $0x154] ss:$24 sps:$4 sm:$0xff]   ;;  %v8842_v34 = vld [vmem:[#allocation2] sm:$0xff]  }
  0x29   :  { %450 = vmatprep.mubr.bf16.mxu0 %v10772_v0  ;;  %563 = vmatprep.mubr.bf16.mxu1 %v10772_v0  ;;  %v7649_v2 = vld [vmem:[%s10763_s0 + $0x15c] ss:$24 sps:$4 sm:$0xff]   ;;  %v7651_v3 = vld [vmem:[%s10763_s0 + $0x150] ss:$24 sps:$4 sm:$0xff]   ;;  %v7655_v6 = vld [vmem:[%s10763_s0 + $0x12c] ss:$24 sps:$4 sm:$0xff]  }
  0x2a   :  { %418 = vmatprep.subr.bf16.mxu0 %v7647_v1  ;;  %v7652_v4 = vld [vmem:[%s10763_s0 + $0x158] ss:$24 sps:$4 sm:$0xff]   ;;  %531 = vmatprep.subr.bf16.mxu1 %v7649_v2  ;;  %v7653_v5 = vld [vmem:[%s10763_s0 + $0x124] ss:$24 sps:$4 sm:$0xff]   ;;  %v7658_v8 = vld [vmem:[%s10763_s0 + $0x128] ss:$24 sps:$4 sm:$0xff]  }
  0x2b   :  { %419 = vmatpush1.bf16.msra.mxu0 %v7651_v3  ;;  %532 = vmatpush1.bf16.msra.mxu1 %v7652_v4  ;;  %v7657_v7 = vld [vmem:[%s10763_s0 + $0x120] ss:$24 sps:$4 sm:$0xff]   ;;  %v7659_v9 = vld [vmem:[%s10763_s0 + $0xf4] ss:$24 sps:$4 sm:$0xff]   ;;  %v7663_v11 = vld [vmem:[%s10763_s0 + $0xf0] ss:$24 sps:$4 sm:$0xff]  }
  0x2c   :  { %420 = vmatprep.subr.bf16.mxu0 %v7653_v5  ;;  %533 = vmatprep.subr.bf16.mxu1 %v7655_v6  ;;  %v7661_v10 = vld [vmem:[%s10763_s0 + $0xfc] ss:$24 sps:$4 sm:$0xff]   ;;  %v7664_v12 = vld [vmem:[%s10763_s0 + $0xf8] ss:$24 sps:$4 sm:$0xff]   ;;  %v7667_v14 = vld [vmem:[%s10763_s0 + $0xcc] ss:$24 sps:$4 sm:$0xff]  }
  0x2d   :  { %v7665_v13 = vld [vmem:[%s10763_s0 + $0xc4] ss:$24 sps:$4 sm:$0xff]   ;;  %v7669_v15 = vld [vmem:[%s10763_s0 + $0xc0] ss:$24 sps:$4 sm:$0xff]   ;;  %v7671_v17 = vld [vmem:[%s10763_s0 + $0x94] ss:$24 sps:$4 sm:$0xff]  }
  0x2e   :  { %v7670_v16 = vld [vmem:[%s10763_s0 + $0xc8] ss:$24 sps:$4 sm:$0xff]   ;;  %v7673_v18 = vld [vmem:[%s10763_s0 + $0x9c] ss:$24 sps:$4 sm:$0xff]   ;;  %v7676_v20 = vld [vmem:[%s10763_s0 + $0x98] ss:$24 sps:$4 sm:$0xff]  }
  0x2f   :  { %421 = vmatpush1.bf16.msra.mxu0 %v7657_v7  ;;  %534 = vmatpush1.bf16.msra.mxu1 %v7658_v8  ;;  %v7675_v19 = vld [vmem:[%s10763_s0 + $0x90] ss:$24 sps:$4 sm:$0xff]   ;;  %v7677_v21 = vld [vmem:[%s10763_s0 + $0x64] ss:$24 sps:$4 sm:$0xff]   ;;  %v7681_v23 = vld [vmem:[%s10763_s0 + $0x60] ss:$24 sps:$4 sm:$0xff]  }
  0x30   :  { %422 = vmatprep.subr.bf16.mxu0 %v7659_v9  ;;  %535 = vmatprep.subr.bf16.mxu1 %v7661_v10  ;;  %v7679_v22 = vld [vmem:[%s10763_s0 + $0x6c] ss:$24 sps:$4 sm:$0xff]   ;;  %v7682_v24 = vld [vmem:[%s10763_s0 + $0x68] ss:$24 sps:$4 sm:$0xff]   ;;  %v7685_v26 = vld [vmem:[%s10763_s0 + $0x3c] ss:$24 sps:$4 sm:$0xff]  }
  0x31   :  { %v7683_v25 = vld [vmem:[%s10763_s0 + $0x34] ss:$24 sps:$4 sm:$0xff]   ;;  %v7687_v27 = vld [vmem:[%s10763_s0 + $0x30] ss:$24 sps:$4 sm:$0xff]   ;;  %v7689_v29 = vld [vmem:[%s10763_s0 + $0x4] ss:$24 sps:$4 sm:$0xff]  }
  0x32   :  { %v7688_v28 = vld [vmem:[%s10763_s0 + $0x38] ss:$24 sps:$4 sm:$0xff]   ;;  %v7691_v30 = vld [vmem:[%s10763_s0 + $0xc] ss:$24 sps:$4 sm:$0xff]   ;;  %v7694_v32 = vld [vmem:[%s10763_s0 + $0x8] ss:$24 sps:$4 sm:$0xff]  }
  0x33   :  { %423 = vmatpush1.bf16.msra.mxu0 %v7663_v11  ;;  %536 = vmatpush1.bf16.msra.mxu1 %v7664_v12  ;;  %v7693_v31 = vld [vmem:[%s10763_s0] ss:$24 sps:$4 sm:$0xff]   ;;  %v7702_v33 = vld [vmem:[%s10763_s0 + $0x164] ss:$24 sps:$4 sm:$0xff]   ;;  %v7705_v36 = vld [vmem:[%s10763_s0 + $0x134] ss:$24 sps:$4 sm:$0xff]  }
  0x34   :  { %424 = vmatprep.subr.bf16.mxu0 %v7665_v13  ;;  %537 = vmatprep.subr.bf16.mxu1 %v7667_v14  ;;  %v7700_v35 = vld [vmem:[%s10763_s0 + $0x160] ss:$24 sps:$4 sm:$0xff]   ;;  %v7703_v37 = vld [vmem:[%s10763_s0 + $0x130] ss:$24 sps:$4 sm:$0xff]   ;;  %v7709_v38 = vld [vmem:[%s10763_s0 + $0x104] ss:$24 sps:$4 sm:$0xff]  }
  0x35   :  { %v8860_v39 = vld [vmem:[#allocation2 + $0x8] sm:$0xff]   ;;  %v7707_v40 = vld [vmem:[%s10763_s0 + $0x100] ss:$24 sps:$4 sm:$0xff]   ;;  %v7735_v44 = vld [vmem:[#allocation5 + $0x124] ss:$24 sps:$4 sm:$0xff]  }
  0x36   :  { %v7729_v41 = vld [vmem:[#allocation5 + $0x154] ss:$24 sps:$4 sm:$0xff]   ;;  %v7727_v43 = vld [vmem:[#allocation5 + $0x150] ss:$24 sps:$4 sm:$0xff]   ;;  %v7716_v46 = vld [vmem:[%s10763_s0 + $0xa4] ss:$24 sps:$4 sm:$0xff]  }
  0x37   :  { %425 = vmatpush1.bf16.msra.mxu0 %v7669_v15  ;;  %538 = vmatpush1.bf16.msra.mxu1 %v7670_v16  ;;  %v7712_v42 = vld [vmem:[%s10763_s0 + $0xd4] ss:$24 sps:$4 sm:$0xff]   ;;  %v7710_v45 = vld [vmem:[%s10763_s0 + $0xd0] ss:$24 sps:$4 sm:$0xff]   ;;  %v7733_v47 = vld [vmem:[#allocation5 + $0x120] ss:$24 sps:$4 sm:$0xff]  }
  0x38   :  { %426 = vmatprep.subr.bf16.mxu0 %v7671_v17  ;;  %539 = vmatprep.subr.bf16.mxu1 %v7673_v18  ;;  %v8878_v48 = vld [vmem:[#allocation2 + $0x10] sm:$0xff]   ;;  %v7714_v49 = vld [vmem:[%s10763_s0 + $0xa0] ss:$24 sps:$4 sm:$0xff]   ;;  %v7747_v53 = vld [vmem:[#allocation5 + $0xc4] ss:$24 sps:$4 sm:$0xff]  }
  0x39   :  { %v7741_v50 = vld [vmem:[#allocation5 + $0xf4] ss:$24 sps:$4 sm:$0xff]   ;;  %v7739_v52 = vld [vmem:[#allocation5 + $0xf0] ss:$24 sps:$4 sm:$0xff]   ;;  %v7723_v55 = vld [vmem:[%s10763_s0 + $0x44] ss:$24 sps:$4 sm:$0xff]  }
  0x3a   :  { %v7719_v51 = vld [vmem:[%s10763_s0 + $0x74] ss:$24 sps:$4 sm:$0xff]   ;;  %v7717_v54 = vld [vmem:[%s10763_s0 + $0x70] ss:$24 sps:$4 sm:$0xff]   ;;  %v7745_v56 = vld [vmem:[#allocation5 + $0xc0] ss:$24 sps:$4 sm:$0xff]  }
  0x3b   :  { %427 = vmatpush1.bf16.msra.mxu0 %v7675_v19  ;;  %540 = vmatpush1.bf16.msra.mxu1 %v7676_v20  ;;  %v8896_v57 = vld [vmem:[#allocation2 + $0x18] sm:$0xff]   ;;  %v7753_v59 = vld [vmem:[#allocation5 + $0x94] ss:$24 sps:$4 sm:$0xff]   ;;  %v7751_v61 = vld [vmem:[#allocation5 + $0x90] ss:$24 sps:$4 sm:$0xff]  }
  0x3c   :  { %428 = vmatprep.subr.bf16.mxu0 %v7677_v21  ;;  %541 = vmatprep.subr.bf16.mxu1 %v7679_v22  ;;  %v7721_v58 = vld [vmem:[%s10763_s0 + $0x40] ss:$24 sps:$4 sm:$0xff]   ;;  %v7726_v60 = vld [vmem:[%s10763_s0 + $0x14] ss:$24 sps:$4 sm:$0xff]   ;;  %v7759_v62 = vld [vmem:[#allocation5 + $0x64] ss:$24 sps:$4 sm:$0xff]  }
  0x3d   :  { %v7724_v63 = vld [vmem:[%s10763_s0 + $0x10] ss:$24 sps:$4 sm:$0xff]   ;;  %v7732_v1 = vld [vmem:[#allocation5 + $0x454] ss:$24 sps:$4 sm:$0xff]   ;;  %v7757_v2 = vld [vmem:[#allocation5 + $0x60] ss:$24 sps:$4 sm:$0xff]  }
  0x3e   :  { %v8911_v3 = vld [vmem:[#allocation2 + $0x20] sm:$0xff]   ;;  %v7765_v4 = vld [vmem:[#allocation5 + $0x34] ss:$24 sps:$4 sm:$0xff]   ;;  %v7763_v5 = vld [vmem:[#allocation5 + $0x30] ss:$24 sps:$4 sm:$0xff]  }
  0x3f   :  { %429 = vmatpush1.bf16.msra.mxu0 %v7681_v23  ;;  %542 = vmatpush1.bf16.msra.mxu1 %v7682_v24  ;;  %v7771_v6 = vld [vmem:[#allocation5 + $0x4] ss:$24 sps:$4 sm:$0xff]   ;;  %v7769_v7 = vld [vmem:[#allocation5] ss:$24 sps:$4 sm:$0xff]   ;;  %v8917_v8 = vld [vmem:[#allocation2 + $0x28] sm:$0xff]  }
  0x40   :  { %430 = vmatprep.subr.bf16.mxu0 %v7683_v25  ;;  %543 = vmatprep.subr.bf16.mxu1 %v7685_v26  ;;  %v7777_v9 = vld [vmem:[#allocation5 + $0x2d4] ss:$24 sps:$4 sm:$0xff]   ;;  %v7775_v10 = vld [vmem:[#allocation5 + $0x2d0] ss:$24 sps:$4 sm:$0xff]   ;;  %v7783_v11 = vld [vmem:[#allocation5 + $0x2a4] ss:$24 sps:$4 sm:$0xff]  }
  0x41   :  { %v8923_v12 = vld [vmem:[#allocation2 + $0x30] sm:$0xff]   ;;  %v7781_v13 = vld [vmem:[#allocation5 + $0x2a0] ss:$24 sps:$4 sm:$0xff]   ;;  %v7795_v16 = vld [vmem:[#allocation5 + $0x244] ss:$24 sps:$4 sm:$0xff]  }
  0x42   :  { %v7789_v14 = vld [vmem:[#allocation5 + $0x274] ss:$24 sps:$4 sm:$0xff]   ;;  %v7787_v15 = vld [vmem:[#allocation5 + $0x270] ss:$24 sps:$4 sm:$0xff]   ;;  %v7793_v17 = vld [vmem:[#allocation5 + $0x240] ss:$24 sps:$4 sm:$0xff]  }
  0x43   :  { %431 = vmatpush1.bf16.msra.mxu0 %v7687_v27  ;;  %544 = vmatpush1.bf16.msra.mxu1 %v7688_v28  ;;  %v8929_v18 = vld [vmem:[#allocation2 + $0x38] sm:$0xff]   ;;  %v7801_v19 = vld [vmem:[#allocation5 + $0x214] ss:$24 sps:$4 sm:$0xff]   ;;  %v7799_v20 = vld [vmem:[#allocation5 + $0x210] ss:$24 sps:$4 sm:$0xff]  }
  0x44   :  { %432 = vmatprep.subr.bf16.mxu0 %v7689_v29  ;;  %545 = vmatprep.subr.bf16.mxu1 %v7691_v30  ;;  %v7807_v21 = vld [vmem:[#allocation5 + $0x1e4] ss:$24 sps:$4 sm:$0xff]   ;;  %v7805_v22 = vld [vmem:[#allocation5 + $0x1e0] ss:$24 sps:$4 sm:$0xff]   ;;  %v7730_v23 = vld [vmem:[#allocation5 + $0x450] ss:$24 sps:$4 sm:$0xff]  }
  0x45   :  { %v7738_v24 = vld [vmem:[#allocation5 + $0x424] ss:$24 sps:$4 sm:$0xff]   ;;  %v7736_v25 = vld [vmem:[#allocation5 + $0x420] ss:$24 sps:$4 sm:$0xff]   ;;  %v7813_v26 = vld [vmem:[#allocation5 + $0x1b4] ss:$24 sps:$4 sm:$0xff]  }
  0x46   :  { %v7744_v27 = vld [vmem:[#allocation5 + $0x3f4] ss:$24 sps:$4 sm:$0xff]   ;;  %v7811_v28 = vld [vmem:[#allocation5 + $0x1b0] ss:$24 sps:$4 sm:$0xff]   ;;  %v7819_v30 = vld [vmem:[#allocation5 + $0x184] ss:$24 sps:$4 sm:$0xff]  }
  0x47   :  { %433 = vmatpush1.bf16.msra.mxu0 %v7693_v31  ;;  %546 = vmatpush1.bf16.msra.mxu1 %v7694_v32  ;;  %v7742_v29 = vld [vmem:[#allocation5 + $0x3f0] ss:$24 sps:$4 sm:$0xff]   ;;  %v7750_v31 = vld [vmem:[#allocation5 + $0x3c4] ss:$24 sps:$4 sm:$0xff]   ;;  %v7817_v32 = vld [vmem:[#allocation5 + $0x180] ss:$24 sps:$4 sm:$0xff]  }
  0x48   :  { %644 = vmatprep.subr.bf16.mxu0 %v7702_v33  ;;  %2565 = vmatprep.subr.bf16.mxu1 %v7729_v41  ;;  %v7825_v33 = vld [vmem:[#allocation5 + $0x754] ss:$24 sps:$4 sm:$0xff]   ;;  %v7774_v41 = vld [vmem:[#allocation5 + $0x304] ss:$24 sps:$4 sm:$0xff]  }
  0x4a   :  { %451 = vmatmul.mubr.bf16.vlgmr.msra.gmra.mxu0 %v8842_v34  ;;  %564 = vmatmul.mubr.bf16.vlgmr.msra.gmra.mxu1 %v8842_v34 }
  0x4b   :  { %460 = vmatprep.mubr.bf16.mxu0 %v10772_v0  ;;  %573 = vmatprep.mubr.bf16.mxu1 %v10772_v0 }
  0x4c   :  { %645 = vmatpush1.bf16.msra.mxu0 %v7700_v35  ;;  %2566 = vmatpush1.bf16.msra.mxu1 %v7727_v43  ;;  %v7756_v35 = vld [vmem:[#allocation5 + $0x394] ss:$24 sps:$4 sm:$0xff]  }
  0x4d   :  { %646 = vmatprep.subr.bf16.mxu0 %v7705_v36  ;;  %2567 = vmatprep.subr.bf16.mxu1 %v7735_v44  ;;  %v7754_v36 = vld [vmem:[#allocation5 + $0x390] ss:$24 sps:$4 sm:$0xff]   ;;  %v7780_v43 = vld [vmem:[#allocation5 + $0x5d4] ss:$24 sps:$4 sm:$0xff]  }
  0x4e   :  { %v7778_v44 = vld [vmem:[#allocation5 + $0x5d0] ss:$24 sps:$4 sm:$0xff]  }
  0x50   :  { %647 = vmatpush1.bf16.msra.mxu0 %v7703_v37  ;;  %2568 = vmatpush1.bf16.msra.mxu1 %v7733_v47  ;;  %v7762_v37 = vld [vmem:[#allocation5 + $0x364] ss:$24 sps:$4 sm:$0xff]   ;;  %v7792_v47 = vld [vmem:[#allocation5 + $0x574] ss:$24 sps:$4 sm:$0xff]  }
  0x51   :  { %648 = vmatprep.subr.bf16.mxu0 %v7709_v38  ;;  %2569 = vmatprep.subr.bf16.mxu1 %v7741_v50  ;;  %v7760_v38 = vld [vmem:[#allocation5 + $0x360] ss:$24 sps:$4 sm:$0xff]  }
  0x52   :  { %461 = vmatmul.mubr.bf16.gmra.mxu0 %v8860_v39  ;;  %574 = vmatmul.mubr.bf16.gmra.mxu1 %v8860_v39  ;;  %v7796_v50 = vld [vmem:[#allocation5 + $0x540] ss:$24 sps:$4 sm:$0xff]  }
  0x53   :  { %470 = vmatprep.mubr.bf16.mxu0 %v10772_v0  ;;  %583 = vmatprep.mubr.bf16.mxu1 %v10772_v0 }
  0x54   :  { %649 = vmatpush1.bf16.msra.mxu0 %v7707_v40  ;;  %2570 = vmatpush1.bf16.msra.mxu1 %v7739_v52  ;;  %v7768_v40 = vld [vmem:[#allocation5 + $0x334] ss:$24 sps:$4 sm:$0xff]   ;;  %v7802_v52 = vld [vmem:[#allocation5 + $0x510] ss:$24 sps:$4 sm:$0xff]  }
  0x55   :  { %650 = vmatprep.subr.bf16.mxu0 %v7712_v42  ;;  %2571 = vmatprep.subr.bf16.mxu1 %v7747_v53  ;;  %v7772_v42 = vld [vmem:[#allocation5 + $0x300] ss:$24 sps:$4 sm:$0xff]   ;;  %v7810_v53 = vld [vmem:[#allocation5 + $0x4e4] ss:$24 sps:$4 sm:$0xff]  }
  0x58   :  { %651 = vmatpush1.bf16.msra.mxu0 %v7710_v45  ;;  %2572 = vmatpush1.bf16.msra.mxu1 %v7745_v56  ;;  %v7786_v45 = vld [vmem:[#allocation5 + $0x5a4] ss:$24 sps:$4 sm:$0xff]   ;;  %v7814_v56 = vld [vmem:[#allocation5 + $0x4b0] ss:$24 sps:$4 sm:$0xff]  }
  0x59   :  { %652 = vmatprep.subr.bf16.mxu0 %v7716_v46  ;;  %2573 = vmatprep.subr.bf16.mxu1 %v7753_v59  ;;  %v7784_v46 = vld [vmem:[#allocation5 + $0x5a0] ss:$24 sps:$4 sm:$0xff]   ;;  %v7828_v59 = vld [vmem:[#allocation5 + $0x15c] ss:$24 sps:$4 sm:$0xff]  }
  0x5a   :  { %471 = vmatmul.mubr.bf16.gmra.mxu0 %v8878_v48  ;;  %584 = vmatmul.mubr.bf16.gmra.mxu1 %v8878_v48 }
  0x5b   :  { %480 = vmatprep.mubr.bf16.mxu0 %v10772_v0  ;;  %593 = vmatprep.mubr.bf16.mxu1 %v10772_v0 }
  0x5c   :  { %653 = vmatpush1.bf16.msra.mxu0 %v7714_v49  ;;  %2574 = vmatpush1.bf16.msra.mxu1 %v7751_v61  ;;  %v7798_v49 = vld [vmem:[#allocation5 + $0x544] ss:$24 sps:$4 sm:$0xff]  }
  0x5d   :  { %654 = vmatprep.subr.bf16.mxu0 %v7719_v51  ;;  %2575 = vmatprep.subr.bf16.mxu1 %v7759_v62  ;;  %v7804_v51 = vld [vmem:[#allocation5 + $0x514] ss:$24 sps:$4 sm:$0xff]  }
  0x60   :  { %655 = vmatpush1.bf16.msra.mxu0 %v7717_v54  ;;  %2576 = vmatpush1.bf16.msra.mxu1 %v7757_v2  ;;  %v7808_v54 = vld [vmem:[#allocation5 + $0x4e0] ss:$24 sps:$4 sm:$0xff]  }
  0x61   :  { %656 = vmatprep.subr.bf16.mxu0 %v7723_v55  ;;  %2577 = vmatprep.subr.bf16.mxu1 %v7765_v4  ;;  %v7816_v55 = vld [vmem:[#allocation5 + $0x4b4] ss:$24 sps:$4 sm:$0xff]   ;;  %v7826_v4 = vld [vmem:[#allocation5 + $0x158] ss:$24 sps:$4 sm:$0xff]  }
  0x62   :  { %481 = vmatmul.mubr.bf16.gmra.mxu0 %v8896_v57  ;;  %594 = vmatmul.mubr.bf16.gmra.mxu1 %v8896_v57 }
  0x63   :  { %490 = vmatprep.mubr.bf16.mxu0 %v10772_v0  ;;  %603 = vmatprep.mubr.bf16.mxu1 %v10772_v0 }
  0x64   :  { %657 = vmatpush1.bf16.msra.mxu0 %v7721_v58  ;;  %2578 = vmatpush1.bf16.msra.mxu1 %v7763_v5  ;;  %v7820_v58 = vld [vmem:[#allocation5 + $0x480] ss:$24 sps:$4 sm:$0xff]  }
  0x65   :  { %658 = vmatprep.subr.bf16.mxu0 %v7726_v60  ;;  %2579 = vmatprep.subr.bf16.mxu1 %v7771_v6 }
  0x68   :  { %659 = vmatpush1.bf16.msra.mxu0 %v7724_v63  ;;  %2580 = vmatpush1.bf16.msra.mxu1 %v7769_v7 }
  0x69   :  { %2678 = vmatprep.subr.bf16.mxu0 %v7732_v1  ;;  %2581 = vmatprep.subr.bf16.mxu1 %v7777_v9  ;;  %v7834_v9 = vld [vmem:[#allocation5 + $0x12c] ss:$24 sps:$4 sm:$0xff]  }
  0x6a   :  { %491 = vmatmul.mubr.bf16.gmra.mxu0 %v8911_v3  ;;  %604 = vmatmul.mubr.bf16.gmra.mxu1 %v8911_v3 }
  0x6b   :  { %500 = vmatprep.mubr.bf16.mxu0 %v10772_v0  ;;  %613 = vmatprep.mubr.bf16.mxu1 %v10772_v0 }
  0x6c   :  { %2582 = vmatpush2.bf16.msra.mxu1 %v7775_v10 }
  0x6d   :  { %2583 = vmatprep.subr.bf16.mxu1 %v7783_v11 }
  0x70   :  { %2584 = vmatpush2.bf16.msra.mxu1 %v7781_v13 }
  0x71   :  { %2585 = vmatprep.subr.bf16.mxu1 %v7789_v14 }
  0x72   :  { %501 = vmatmul.mubr.bf16.gmra.mxu0 %v8917_v8  ;;  %614 = vmatmul.mubr.bf16.gmra.mxu1 %v8917_v8 }
  0x73   :  { %510 = vmatprep.mubr.bf16.mxu0 %v10772_v0  ;;  %623 = vmatprep.mubr.bf16.mxu1 %v10772_v0 }
  0x74   :  { %2586 = vmatpush2.bf16.msra.mxu1 %v7787_v15  ;;  %v7829_v15 = vld [vmem:[#allocation5 + $0x720] ss:$24 sps:$4 sm:$0xff]  }
  0x75   :  { %2587 = vmatprep.subr.bf16.mxu1 %v7795_v16  ;;  %v7832_v16 = vld [vmem:[#allocation5 + $0x128] ss:$24 sps:$4 sm:$0xff]  }
  0x78   :  { %2588 = vmatpush2.bf16.msra.mxu1 %v7793_v17 }
  0x79   :  { %2589 = vmatprep.subr.bf16.mxu1 %v7801_v19  ;;  %v7837_v19 = vld [vmem:[#allocation5 + $0x6f4] ss:$24 sps:$4 sm:$0xff]  }
  0x7a   :  { %511 = vmatmul.mubr.bf16.gmra.mxu0 %v8923_v12  ;;  %624 = vmatmul.mubr.bf16.gmra.mxu1 %v8923_v12 }
  0x7b   :  { %520 = vmatprep.mubr.bf16.mxu0 %v10772_v0  ;;  %633 = vmatprep.mubr.bf16.mxu1 %v10772_v0 }
  0x7c   :  { %2590 = vmatpush2.bf16.msra.mxu1 %v7799_v20  ;;  %v7840_v20 = vld [vmem:[#allocation5 + $0xfc] ss:$24 sps:$4 sm:$0xff]  }
  0x7d   :  { %2591 = vmatprep.subr.bf16.mxu1 %v7807_v21 }
  0x80   :  { %2592 = vmatpush2.bf16.msra.mxu1 %v7805_v22 }
  0x81   :  { %2593 = vmatprep.subr.bf16.mxu1 %v7813_v26 }
  0x82   :  { %521 = vmatmul.mubr.bf16.gmra.mxu0 %v8929_v18  ;;  %634 = vmatmul.mubr.bf16.gmra.mxu1 %v8929_v18 }
  0x83   :  { %676 = vmatprep.mubr.bf16.mxu0 %v10772_v0 }
  0x84   :  { %2594 = vmatpush2.bf16.msra.mxu1 %v7811_v28  ;;  %v7843_v28 = vld [vmem:[#allocation5 + $0x6c4] ss:$24 sps:$4 sm:$0xff]  }
  0x85   :  { %2595 = vmatprep.subr.bf16.mxu1 %v7819_v30 }
  0x88   :  { %2596 = vmatpush2.bf16.msra.mxu1 %v7817_v32 }
  0x89   :  { %2791 = vmatprep.subr.bf16.mxu1 %v7825_v33 }
  0x8a   :  { %677 = vmatmul.mubr.bf16.vlgmr.msra.gmra.mxu0 %v8842_v34  ;;  %v7748_v34 = vld [vmem:[#allocation5 + $0x3c0] ss:$24 sps:$4 sm:$0xff]  }
  0x8b   :  { %686 = vmatprep.mubr.bf16.mxu0 %v10772_v0  ;;  %2679 = vmatpush1.bf16.msra.mxu0 %v7730_v23  ;;  %v7835_v23 = vld [vmem:[#allocation5 + $0x6f0] ss:$24 sps:$4 sm:$0xff]  }
  0x8c   :  { %2680 = vmatprep.subr.bf16.mxu0 %v7738_v24  ;;  %v7838_v24 = vld [vmem:[#allocation5 + $0xf8] ss:$24 sps:$4 sm:$0xff]  }
  0x8f   :  { %2681 = vmatpush1.bf16.msra.mxu0 %v7736_v25 }
  0x90   :  { %2682 = vmatprep.subr.bf16.mxu0 %v7744_v27 }
  0x92   :  { %687 = vmatmul.mubr.bf16.gmra.mxu0 %v8860_v39  ;;  %v7766_v39 = vld [vmem:[#allocation5 + $0x330] ss:$24 sps:$4 sm:$0xff]  }
  0x93   :  { %696 = vmatprep.mubr.bf16.mxu0 %v10772_v0  ;;  %2683 = vmatpush1.bf16.msra.mxu0 %v7742_v29  ;;  %v7846_v29 = vld [vmem:[#allocation5 + $0xcc] ss:$24 sps:$4 sm:$0xff]  }
  0x94   :  { %2684 = vmatprep.subr.bf16.mxu0 %v7750_v31 }
  0x97   :  { %2685 = vmatpush1.bf16.msra.mxu0 %v7748_v34 }
  0x98   :  { %2686 = vmatprep.subr.bf16.mxu0 %v7756_v35 }
  0x9a   :  { %697 = vmatmul.mubr.bf16.gmra.mxu0 %v8878_v48  ;;  %v7790_v48 = vld [vmem:[#allocation5 + $0x570] ss:$24 sps:$4 sm:$0xff]  }
  0x9b   :  { %706 = vmatprep.mubr.bf16.mxu0 %v10772_v0  ;;  %2687 = vmatpush1.bf16.msra.mxu0 %v7754_v36 }
  0x9c   :  { %2688 = vmatprep.subr.bf16.mxu0 %v7762_v37  ;;  %v7841_v37 = vld [vmem:[#allocation5 + $0x6c0] ss:$24 sps:$4 sm:$0xff]  }
  0x9f   :  { %2689 = vmatpush1.bf16.msra.mxu0 %v7760_v38  ;;  %v7844_v38 = vld [vmem:[#allocation5 + $0xc8] ss:$24 sps:$4 sm:$0xff]  }
  0xa0   :  { %2690 = vmatprep.subr.bf16.mxu0 %v7768_v40  ;;  %v7849_v40 = vld [vmem:[#allocation5 + $0x694] ss:$24 sps:$4 sm:$0xff]  }
  0xa2   :  { %707 = vmatmul.mubr.bf16.gmra.mxu0 %v8896_v57  ;;  %v7822_v57 = vld [vmem:[#allocation5 + $0x484] ss:$24 sps:$4 sm:$0xff]  }
  0xa3   :  { %716 = vmatprep.mubr.bf16.mxu0 %v10772_v0  ;;  %2691 = vmatpush1.bf16.msra.mxu0 %v7766_v39  ;;  %v7852_v39 = vld [vmem:[#allocation5 + $0x9c] ss:$24 sps:$4 sm:$0xff]  }
  0xa4   :  { %2692 = vmatprep.subr.bf16.mxu0 %v7774_v41 }
  0xa7   :  { %2693 = vmatpush1.bf16.msra.mxu0 %v7772_v42 }
  0xa8   :  { %2694 = vmatprep.subr.bf16.mxu0 %v7780_v43  ;;  %v7847_v43 = vld [vmem:[#allocation5 + $0x690] ss:$24 sps:$4 sm:$0xff]  }
  0xaa   :  { %717 = vmatmul.mubr.bf16.gmra.mxu0 %v8911_v3  ;;  %v7823_v3 = vld [vmem:[#allocation5 + $0x750] ss:$24 sps:$4 sm:$0xff]  }
  0xab   :  { %726 = vmatprep.mubr.bf16.mxu0 %v10772_v0  ;;  %2695 = vmatpush2.bf16.msra.mxu0 %v7778_v44  ;;  %v7850_v44 = vld [vmem:[#allocation5 + $0x98] ss:$24 sps:$4 sm:$0xff]  }
  0xac   :  { %2696 = vmatprep.subr.bf16.mxu0 %v7786_v45 }
  0xaf   :  { %2697 = vmatpush2.bf16.msra.mxu0 %v7784_v46 }
  0xb0   :  { %2698 = vmatprep.subr.bf16.mxu0 %v7792_v47 }
  0xb2   :  { %727 = vmatmul.mubr.bf16.gmra.mxu0 %v8917_v8  ;;  %v7831_v8 = vld [vmem:[#allocation5 + $0x724] ss:$24 sps:$4 sm:$0xff]  }
  0xb3   :  { %736 = vmatprep.mubr.bf16.mxu0 %v10772_v0  ;;  %2699 = vmatpush2.bf16.msra.mxu0 %v7790_v48  ;;  %v7855_v48 = vld [vmem:[#allocation5 + $0x664] ss:$24 sps:$4 sm:$0xff]  }
  0xb4   :  { %2700 = vmatprep.subr.bf16.mxu0 %v7798_v49  ;;  %v7858_v49 = vld [vmem:[#allocation5 + $0x6c] ss:$24 sps:$4 sm:$0xff]  }
  0xb7   :  { %2701 = vmatpush2.bf16.msra.mxu0 %v7796_v50 }
  0xb8   :  { %2702 = vmatprep.subr.bf16.mxu0 %v7804_v51 }
  0xba   :  { %737 = vmatmul.mubr.bf16.gmra.mxu0 %v8923_v12 }
  0xbb   :  { %746 = vmatprep.mubr.bf16.mxu0 %v10772_v0  ;;  %2703 = vmatpush2.bf16.msra.mxu0 %v7802_v52 }
  0xbc   :  { %2704 = vmatprep.subr.bf16.mxu0 %v7810_v53 }
  0xbf   :  { %2705 = vmatpush2.bf16.msra.mxu0 %v7808_v54 }
  0xc0   :  { %2706 = vmatprep.subr.bf16.mxu0 %v7816_v55 }
  0xc2   :  { %747 = vmatmul.mubr.bf16.gmra.mxu0 %v8929_v18 }
  0xc3   :  { %2707 = vmatpush2.bf16.msra.mxu0 %v7814_v56 }
  0xc4   :  { %2708 = vmatprep.subr.bf16.mxu0 %v7822_v57  ;;  %v7853_v57 = vld [vmem:[#allocation5 + $0x660] ss:$24 sps:$4 sm:$0xff]  }
  0xc7   :  { %2709 = vmatpush2.bf16.msra.mxu0 %v7820_v58  ;;  %v7856_v58 = vld [vmem:[#allocation5 + $0x68] ss:$24 sps:$4 sm:$0xff]  }
  0xc8   :  { %2904 = vmatprep.subr.bf16.mxu0 %v7828_v59  ;;  %v7861_v59 = vld [vmem:[#allocation5 + $0x634] ss:$24 sps:$4 sm:$0xff]  }
 0x10a   :  { %v452_v60 = vpop.f32.mrf.mxu0  ;;  %v565_v61 = vpop.f32.mrf.mxu1 }
 0x10c   :  { %v454_v62 = vpop.f32.mrf.mxu0  ;;  %v567_v63 = vpop.f32.mrf.mxu1 }
 0x10e   :  { %v456_v1 = vpop.f32.mrf.mxu0  ;;  %v569_v2 = vpop.f32.mrf.mxu1 }
 0x10f   :  { %v8949_v5 = vpack.c.bf16 %v569_v2, %v565_v61  ;;  %v8955_v12 = vpack.c.bf16 %v456_v1, %v452_v60  ;;  %v7864_v60 = vld [vmem:[#allocation5 + $0x3c] ss:$24 sps:$4 sm:$0xff]   ;;  %v7862_v1 = vld [vmem:[#allocation5 + $0x38] ss:$24 sps:$4 sm:$0xff]  }
 0x110   :  { %v458_v6 = vpop.f32.mrf.mxu0  ;;  %v571_v7 = vpop.f32.mrf.mxu1 }
 0x111   :  { %v8951_v10 = vpack.c.bf16 %v458_v6, %v454_v62  ;;  %v8953_v11 = vpack.c.bf16 %v571_v7, %v567_v63  ;;  %v7859_v63 = vld [vmem:[#allocation5 + $0x630] ss:$24 sps:$4 sm:$0xff]   ;;  %v7867_v6 = vld [vmem:[#allocation5 + $0x604] ss:$24 sps:$4 sm:$0xff]  }
 0x112   :  { %v462_v13 = vpop.f32.mrf.mxu0  ;;  %v575_v14 = vpop.f32.mrf.mxu1  ;;  %v7870_v7 = vld [vmem:[#allocation5 + $0xc] ss:$24 sps:$4 sm:$0xff]  }
 0x113   :  { %2597 = vmatprep.mubr.bf16.mxu1 %v8951_v10  ;;  %2710 = vmatprep.mubr.bf16.mxu0 %v8953_v11 }
 0x114   :  { %v464_v17 = vpop.f32.mrf.mxu0  ;;  %v577_v18 = vpop.f32.mrf.mxu1  ;;  %2598 = vmatmul.mubr.bf16.vlgmr.msra.gmra.mxu1 %v8955_v12  ;;  %2711 = vmatmul.mubr.bf16.vlgmr.msra.gmra.mxu0 %v8949_v5 }
 0x115   :  { %2792 = vmatpush1.bf16.msra.mxu1 %v7823_v3  ;;  %2905 = vmatpush1.bf16.msra.mxu0 %v7826_v4 }
 0x116   :  { %v466_v21 = vpop.f32.mrf.mxu0  ;;  %v579_v22 = vpop.f32.mrf.mxu1  ;;  %2793 = vmatprep.subr.bf16.mxu1 %v7831_v8  ;;  %2906 = vmatprep.subr.bf16.mxu0 %v7834_v9 }
 0x117   :  { %v8961_v25 = vpack.c.bf16 %v579_v22, %v575_v14  ;;  %v8967_v32 = vpack.c.bf16 %v466_v21, %v462_v13  ;;  %v7876_v21 = vld [vmem:[#allocation5 + $0x2dc] ss:$24 sps:$4 sm:$0xff]  }
 0x118   :  { %v468_v26 = vpop.f32.mrf.mxu0  ;;  %v581_v27 = vpop.f32.mrf.mxu1 }
 0x119   :  { %v8963_v30 = vpack.c.bf16 %v468_v26, %v464_v17  ;;  %v8965_v31 = vpack.c.bf16 %v581_v27, %v577_v18  ;;  %2794 = vmatpush1.bf16.msra.mxu1 %v7829_v15  ;;  %2907 = vmatpush1.bf16.msra.mxu0 %v7832_v16  ;;  %v7865_v18 = vld [vmem:[#allocation5 + $0x600] ss:$24 sps:$4 sm:$0xff]  }
 0x11a   :  { %v472_v33 = vpop.f32.mrf.mxu0  ;;  %v585_v34 = vpop.f32.mrf.mxu1  ;;  %2795 = vmatprep.subr.bf16.mxu1 %v7837_v19  ;;  %2908 = vmatprep.subr.bf16.mxu0 %v7840_v20  ;;  %v7868_v19 = vld [vmem:[#allocation5 + $0x8] ss:$24 sps:$4 sm:$0xff]   ;;  %v7873_v20 = vld [vmem:[#allocation5 + $0x8d4] ss:$24 sps:$4 sm:$0xff]   ;;  %v7874_v26 = vld [vmem:[#allocation5 + $0x2d8] ss:$24 sps:$4 sm:$0xff]  }
 0x11b   :  { %2607 = vmatprep.mubr.bf16.mxu1 %v8963_v30  ;;  %2720 = vmatprep.mubr.bf16.mxu0 %v8965_v31 }
 0x11c   :  { %v474_v35 = vpop.f32.mrf.mxu0  ;;  %v587_v36 = vpop.f32.mrf.mxu1  ;;  %2608 = vmatmul.mubr.bf16.gmra.mxu1 %v8967_v32  ;;  %2721 = vmatmul.mubr.bf16.gmra.mxu0 %v8961_v25 }
 0x11d   :  { %2796 = vmatpush1.bf16.msra.mxu1 %v7835_v23  ;;  %2909 = vmatpush1.bf16.msra.mxu0 %v7838_v24  ;;  %v7871_v24 = vld [vmem:[#allocation5 + $0x8d0] ss:$24 sps:$4 sm:$0xff]  }
 0x11e   :  { %v476_v41 = vpop.f32.mrf.mxu0  ;;  %v589_v42 = vpop.f32.mrf.mxu1  ;;  %2797 = vmatprep.subr.bf16.mxu1 %v7843_v28  ;;  %2910 = vmatprep.subr.bf16.mxu0 %v7846_v29 }
 0x11f   :  { %v8973_v45 = vpack.c.bf16 %v589_v42, %v585_v34  ;;  %v8979_v52 = vpack.c.bf16 %v476_v41, %v472_v33  ;;  %v7879_v33 = vld [vmem:[#allocation5 + $0x8a4] ss:$24 sps:$4 sm:$0xff]   ;;  %v7877_v42 = vld [vmem:[#allocation5 + $0x8a0] ss:$24 sps:$4 sm:$0xff]  }
 0x120   :  { %v478_v46 = vpop.f32.mrf.mxu0  ;;  %v591_v47 = vpop.f32.mrf.mxu1  ;;  %v7882_v34 = vld [vmem:[#allocation5 + $0x2ac] ss:$24 sps:$4 sm:$0xff]  }
 0x121   :  { %v8975_v50 = vpack.c.bf16 %v478_v46, %v474_v35  ;;  %v8977_v51 = vpack.c.bf16 %v591_v47, %v587_v36  ;;  %2798 = vmatpush1.bf16.msra.mxu1 %v7841_v37  ;;  %2911 = vmatpush1.bf16.msra.mxu0 %v7844_v38  ;;  %v7888_v46 = vld [vmem:[#allocation5 + $0x27c] ss:$24 sps:$4 sm:$0xff]  }
 0x122   :  { %v482_v53 = vpop.f32.mrf.mxu0  ;;  %v595_v54 = vpop.f32.mrf.mxu1  ;;  %2799 = vmatprep.subr.bf16.mxu1 %v7849_v40  ;;  %2912 = vmatprep.subr.bf16.mxu0 %v7852_v39 }
 0x123   :  { %2617 = vmatprep.mubr.bf16.mxu1 %v8975_v50  ;;  %2730 = vmatprep.mubr.bf16.mxu0 %v8977_v51 }
 0x124   :  { %v484_v55 = vpop.f32.mrf.mxu0  ;;  %v597_v56 = vpop.f32.mrf.mxu1  ;;  %2618 = vmatmul.mubr.bf16.gmra.mxu1 %v8979_v52  ;;  %2731 = vmatmul.mubr.bf16.gmra.mxu0 %v8973_v45 }
 0x125   :  { %2800 = vmatpush1.bf16.msra.mxu1 %v7847_v43  ;;  %2913 = vmatpush1.bf16.msra.mxu0 %v7850_v44  ;;  %v7880_v43 = vld [vmem:[#allocation5 + $0x2a8] ss:$24 sps:$4 sm:$0xff]   ;;  %v7885_v44 = vld [vmem:[#allocation5 + $0x874] ss:$24 sps:$4 sm:$0xff]  }
 0x126   :  { %v486_v61 = vpop.f32.mrf.mxu0  ;;  %v599_v62 = vpop.f32.mrf.mxu1  ;;  %2801 = vmatprep.subr.bf16.mxu1 %v7855_v48  ;;  %2914 = vmatprep.subr.bf16.mxu0 %v7858_v49  ;;  %v7883_v49 = vld [vmem:[#allocation5 + $0x870] ss:$24 sps:$4 sm:$0xff]  }
 0x127   :  { %v8985_v2 = vpack.c.bf16 %v599_v62, %v595_v54  ;;  %v8991_v13 = vpack.c.bf16 %v486_v61, %v482_v53  ;;  %v7886_v53 = vld [vmem:[#allocation5 + $0x278] ss:$24 sps:$4 sm:$0xff]  }
 0x128   :  { %v488_v3 = vpop.f32.mrf.mxu0  ;;  %v601_v4 = vpop.f32.mrf.mxu1 }
 0x129   :  { %v8987_v8 = vpack.c.bf16 %v488_v3, %v484_v55  ;;  %v8989_v9 = vpack.c.bf16 %v601_v4, %v597_v56  ;;  %2802 = vmatpush1.bf16.msra.mxu1 %v7853_v57  ;;  %2915 = vmatpush1.bf16.msra.mxu0 %v7856_v58  ;;  %v7891_v57 = vld [vmem:[#allocation5 + $0x844] ss:$24 sps:$4 sm:$0xff]   ;;  %v7889_v4 = vld [vmem:[#allocation5 + $0x840] ss:$24 sps:$4 sm:$0xff]  }
 0x12a   :  { %v492_v14 = vpop.f32.mrf.mxu0  ;;  %v605_v15 = vpop.f32.mrf.mxu1  ;;  %2803 = vmatprep.subr.bf16.mxu1 %v7861_v59  ;;  %2916 = vmatprep.subr.bf16.mxu0 %v7864_v60  ;;  %v7894_v58 = vld [vmem:[#allocation5 + $0x24c] ss:$24 sps:$4 sm:$0xff]  }
 0x12b   :  { %2627 = vmatprep.mubr.bf16.mxu1 %v8987_v8  ;;  %2740 = vmatprep.mubr.bf16.mxu0 %v8989_v9 }
 0x12c   :  { %v494_v16 = vpop.f32.mrf.mxu0  ;;  %v607_v17 = vpop.f32.mrf.mxu1  ;;  %2628 = vmatmul.mubr.bf16.gmra.mxu1 %v8991_v13  ;;  %2741 = vmatmul.mubr.bf16.gmra.mxu0 %v8985_v2 }
 0x12d   :  { %2804 = vmatpush1.bf16.msra.mxu1 %v7859_v63  ;;  %2917 = vmatpush1.bf16.msra.mxu0 %v7862_v1 }
 0x12e   :  { %v496_v22 = vpop.f32.mrf.mxu0  ;;  %v609_v23 = vpop.f32.mrf.mxu1  ;;  %2805 = vmatprep.subr.bf16.mxu1 %v7867_v6  ;;  %2918 = vmatprep.subr.bf16.mxu0 %v7870_v7  ;;  %v7892_v6 = vld [vmem:[#allocation5 + $0x248] ss:$24 sps:$4 sm:$0xff]   ;;  %v7897_v7 = vld [vmem:[#allocation5 + $0x814] ss:$24 sps:$4 sm:$0xff]  }
 0x12f   :  { %v8997_v27 = vpack.c.bf16 %v609_v23, %v605_v15  ;;  %v9003_v37 = vpack.c.bf16 %v496_v22, %v492_v14  ;;  %v7900_v14 = vld [vmem:[#allocation5 + $0x21c] ss:$24 sps:$4 sm:$0xff]   ;;  %v7906_v23 = vld [vmem:[#allocation5 + $0x1ec] ss:$24 sps:$4 sm:$0xff]  }
 0x130   :  { %v498_v28 = vpop.f32.mrf.mxu0  ;;  %v611_v29 = vpop.f32.mrf.mxu1  ;;  %v7903_v22 = vld [vmem:[#allocation5 + $0x7e4] ss:$24 sps:$4 sm:$0xff]  }
 0x131   :  { %v8999_v35 = vpack.c.bf16 %v498_v28, %v494_v16  ;;  %v9001_v36 = vpack.c.bf16 %v611_v29, %v607_v17  ;;  %2806 = vmatpush1.bf16.msra.mxu1 %v7865_v18  ;;  %2919 = vmatpush1.bf16.msra.mxu0 %v7868_v19  ;;  %v7895_v17 = vld [vmem:[#allocation5 + $0x810] ss:$24 sps:$4 sm:$0xff]  }
 0x132   :  { %v502_v38 = vpop.f32.mrf.mxu0  ;;  %v615_v40 = vpop.f32.mrf.mxu1  ;;  %2807 = vmatprep.subr.bf16.mxu1 %v7873_v20  ;;  %2920 = vmatprep.subr.bf16.mxu0 %v7876_v21  ;;  %v7898_v18 = vld [vmem:[#allocation5 + $0x218] ss:$24 sps:$4 sm:$0xff]  }
 0x133   :  { %2637 = vmatprep.mubr.bf16.mxu1 %v8999_v35  ;;  %2750 = vmatprep.mubr.bf16.mxu0 %v9001_v36 }
 0x134   :  { %v504_v39 = vpop.f32.mrf.mxu0  ;;  %v617_v41 = vpop.f32.mrf.mxu1  ;;  %2638 = vmatmul.mubr.bf16.gmra.mxu1 %v9003_v37  ;;  %2751 = vmatmul.mubr.bf16.gmra.mxu0 %v8997_v27 }
 0x135   :  { %2808 = vmatpush2.bf16.msra.mxu1 %v7871_v24  ;;  %2921 = vmatpush2.bf16.msra.mxu0 %v7874_v26 }
 0x136   :  { %v506_v47 = vpop.f32.mrf.mxu0  ;;  %v619_v48 = vpop.f32.mrf.mxu1  ;;  %2809 = vmatprep.subr.bf16.mxu1 %v7879_v33  ;;  %2922 = vmatprep.subr.bf16.mxu0 %v7882_v34 }
 0x137   :  { %v9009_v54 = vpack.c.bf16 %v619_v48, %v615_v40  ;;  %v9015_v61 = vpack.c.bf16 %v506_v47, %v502_v38  ;;  %v7901_v40 = vld [vmem:[#allocation5 + $0x7e0] ss:$24 sps:$4 sm:$0xff]  }
 0x138   :  { %v508_v55 = vpop.f32.mrf.mxu0  ;;  %v621_v56 = vpop.f32.mrf.mxu1  ;;  %v7910_v47 = vld [vmem:[#allocation5 + $0x1b8] ss:$24 sps:$4 sm:$0xff]  }
 0x139   :  { %v9011_v59 = vpack.c.bf16 %v508_v55, %v504_v39  ;;  %v9013_v60 = vpack.c.bf16 %v621_v56, %v617_v41  ;;  %2810 = vmatpush2.bf16.msra.mxu1 %v7877_v42  ;;  %2923 = vmatpush2.bf16.msra.mxu0 %v7880_v43  ;;  %v7904_v39 = vld [vmem:[#allocation5 + $0x1e8] ss:$24 sps:$4 sm:$0xff]   ;;  %v7909_v41 = vld [vmem:[#allocation5 + $0x7b4] ss:$24 sps:$4 sm:$0xff]   ;;  %v7915_v55 = vld [vmem:[#allocation5 + $0x784] ss:$24 sps:$4 sm:$0xff]  }
 0x13a   :  { %v512_v62 = vpop.f32.mrf.mxu0  ;;  %v625_v63 = vpop.f32.mrf.mxu1  ;;  %2811 = vmatprep.subr.bf16.mxu1 %v7885_v44  ;;  %2924 = vmatprep.subr.bf16.mxu0 %v7888_v46  ;;  %v7912_v42 = vld [vmem:[#allocation5 + $0x1bc] ss:$24 sps:$4 sm:$0xff]   ;;  %v7907_v46 = vld [vmem:[#allocation5 + $0x7b0] ss:$24 sps:$4 sm:$0xff]  }
 0x13b   :  { %2647 = vmatprep.mubr.bf16.mxu1 %v9011_v59  ;;  %2760 = vmatprep.mubr.bf16.mxu0 %v9013_v60 }
 0x13c   :  { %v514_v1 = vpop.f32.mrf.mxu0  ;;  %v627_v3 = vpop.f32.mrf.mxu1  ;;  %2648 = vmatmul.mubr.bf16.gmra.mxu1 %v9015_v61  ;;  %2761 = vmatmul.mubr.bf16.gmra.mxu0 %v9009_v54 }
 0x13d   :  { %2812 = vmatpush2.bf16.msra.mxu1 %v7883_v49  ;;  %2925 = vmatpush2.bf16.msra.mxu0 %v7886_v53 }
 0x13e   :  { %v516_v15 = vpop.f32.mrf.mxu0  ;;  %v629_v16 = vpop.f32.mrf.mxu1  ;;  %2813 = vmatprep.subr.bf16.mxu1 %v7891_v57  ;;  %2926 = vmatprep.subr.bf16.mxu0 %v7894_v58  ;;  %v7918_v58 = vld [vmem:[#allocation5 + $0x18c] ss:$24 sps:$4 sm:$0xff]  }
 0x13f   :  { %v9021_v19 = vpack.c.bf16 %v629_v16, %v625_v63  ;;  %v9027_v28 = vpack.c.bf16 %v516_v15, %v512_v62  ;;  %v7919_v15 = vld [vmem:[#allocation5 + $0x458] ss:$24 sps:$4 sm:$0xff]  }
 0x140   :  { %v518_v20 = vpop.f32.mrf.mxu0  ;;  %v631_v21 = vpop.f32.mrf.mxu1 }
 0x141   :  { %v9023_v24 = vpack.c.bf16 %v518_v20, %v514_v1  ;;  %v9025_v26 = vpack.c.bf16 %v631_v21, %v627_v3  ;;  %2814 = vmatpush2.bf16.msra.mxu1 %v7889_v4  ;;  %2927 = vmatpush2.bf16.msra.mxu0 %v7892_v6  ;;  %v7913_v3 = vld [vmem:[#allocation5 + $0x780] ss:$24 sps:$4 sm:$0xff]   ;;  %v7921_v6 = vld [vmem:[#allocation5 + $0x45c] ss:$24 sps:$4 sm:$0xff]   ;;  %v7930_v21 = vld [vmem:[#allocation5 + $0x72c] ss:$24 sps:$4 sm:$0xff]  }
 0x142   :  { %v522_v29 = vpop.f32.mrf.mxu0  ;;  %v635_v33 = vpop.f32.mrf.mxu1  ;;  %2815 = vmatprep.subr.bf16.mxu1 %v7897_v7  ;;  %2928 = vmatprep.subr.bf16.mxu0 %v7900_v14  ;;  %v7916_v4 = vld [vmem:[#allocation5 + $0x188] ss:$24 sps:$4 sm:$0xff]   ;;  %v7924_v7 = vld [vmem:[#allocation5 + $0x75c] ss:$24 sps:$4 sm:$0xff]  }
 0x143   :  { %2657 = vmatprep.mubr.bf16.mxu1 %v9023_v24  ;;  %2770 = vmatprep.mubr.bf16.mxu0 %v9025_v26 }
 0x144   :  { %v524_v34 = vpop.f32.mrf.mxu0  ;;  %v637_v38 = vpop.f32.mrf.mxu1  ;;  %2658 = vmatmul.mubr.bf16.gmra.mxu1 %v9027_v28  ;;  %2771 = vmatmul.mubr.bf16.gmra.mxu0 %v9021_v19 }
 0x145   :  { %2816 = vmatpush2.bf16.msra.mxu1 %v7895_v17  ;;  %2929 = vmatpush2.bf16.msra.mxu0 %v7898_v18  ;;  %v7922_v17 = vld [vmem:[#allocation5 + $0x758] ss:$24 sps:$4 sm:$0xff]   ;;  %v7927_v18 = vld [vmem:[#allocation5 + $0x42c] ss:$24 sps:$4 sm:$0xff]  }
 0x146   :  { %v526_v43 = vpop.f32.mrf.mxu0  ;;  %v639_v44 = vpop.f32.mrf.mxu1  ;;  %2817 = vmatprep.subr.bf16.mxu1 %v7903_v22  ;;  %2930 = vmatprep.subr.bf16.mxu0 %v7906_v23 }
 0x147   :  { %v9033_v48 = vpack.c.bf16 %v639_v44, %v635_v33  ;;  %v9039_v62 = vpack.c.bf16 %v526_v43, %v522_v29  ;;  %v7925_v29 = vld [vmem:[#allocation5 + $0x428] ss:$24 sps:$4 sm:$0xff]   ;;  %v7934_v43 = vld [vmem:[#allocation5 + $0x6f8] ss:$24 sps:$4 sm:$0xff]   ;;  %v7939_v44 = vld [vmem:[#allocation5 + $0x3cc] ss:$24 sps:$4 sm:$0xff]  }
 0x148   :  { %v528_v49 = vpop.f32.mrf.mxu0  ;;  %v641_v53 = vpop.f32.mrf.mxu1 }
 0x149   :  { %v9035_v56 = vpack.c.bf16 %v528_v49, %v524_v34  ;;  %v9037_v57 = vpack.c.bf16 %v641_v53, %v637_v38  ;;  %2818 = vmatpush2.bf16.msra.mxu1 %v7901_v40  ;;  %2931 = vmatpush2.bf16.msra.mxu0 %v7904_v39  ;;  %v7928_v34 = vld [vmem:[#allocation5 + $0x728] ss:$24 sps:$4 sm:$0xff]   ;;  %v7933_v38 = vld [vmem:[#allocation5 + $0x3fc] ss:$24 sps:$4 sm:$0xff]  }
 0x14a   :  { %v678_v63 = vpop.f32.mrf.mxu0  ;;  %2819 = vmatprep.subr.bf16.mxu1 %v7909_v41  ;;  %2932 = vmatprep.subr.bf16.mxu0 %v7912_v42  ;;  %v7936_v40 = vld [vmem:[#allocation5 + $0x6fc] ss:$24 sps:$4 sm:$0xff]   ;;  %v7931_v41 = vld [vmem:[#allocation5 + $0x3f8] ss:$24 sps:$4 sm:$0xff]  }
 0x14b   :  { %2667 = vmatprep.mubr.bf16.mxu1 %v9035_v56  ;;  %2780 = vmatprep.mubr.bf16.mxu0 %v9037_v57 }
 0x14c   :  { %v680_v1 = vpop.f32.mrf.mxu0  ;;  %2668 = vmatmul.mubr.bf16.gmra.mxu1 %v9039_v62  ;;  %2781 = vmatmul.mubr.bf16.gmra.mxu0 %v9033_v48 }
 0x14d   :  { %2820 = vmatpush2.bf16.msra.mxu1 %v7907_v46  ;;  %2933 = vmatpush2.bf16.msra.mxu0 %v7910_v47  ;;  %v7942_v47 = vld [vmem:[#allocation5 + $0x6cc] ss:$24 sps:$4 sm:$0xff]  }
 0x14e   :  { %2936 = vmatprep.mubr.bf16.mxu0 %v8951_v10  ;;  %v682_v14 = vpop.f32.mrf.mxu0  ;;  %2821 = vmatprep.subr.bf16.mxu1 %v7915_v55  ;;  %v7937_v55 = vld [vmem:[#allocation5 + $0x3c8] ss:$24 sps:$4 sm:$0xff]  }
 0x14f   :  { %2934 = vmatprep.subr.bf16.mxu0 %v7918_v58  ;;  %v9048_v22 = vpack.c.bf16 %v682_v14, %v678_v63  ;;  %v7940_v63 = vld [vmem:[#allocation5 + $0x6c8] ss:$24 sps:$4 sm:$0xff]   ;;  %v7946_v14 = vld [vmem:[#allocation5 + $0x698] ss:$24 sps:$4 sm:$0xff]  }
 0x150   :  { %v684_v16 = vpop.f32.mrf.mxu0 }
 0x151   :  { %v9046_v20 = vpack.c.bf16 %v684_v16, %v680_v1  ;;  %2822 = vmatpush2.bf16.msra.mxu1 %v7913_v3  ;;  %2935 = vmatpush2.bf16.msra.mxu0 %v7916_v4  ;;  %v7945_v1 = vld [vmem:[#allocation5 + $0x39c] ss:$24 sps:$4 sm:$0xff]  }
 0x152   :  { %v688_v23 = vpop.f32.mrf.mxu0  ;;  %3017 = vmatprep.subr.bf16.mxu1 %v7921_v6  ;;  %3130 = vmatprep.subr.bf16.mxu0 %v7924_v7  ;;  %v7948_v3 = vld [vmem:[#allocation5 + $0x69c] ss:$24 sps:$4 sm:$0xff]   ;;  %v7943_v6 = vld [vmem:[#allocation5 + $0x398] ss:$24 sps:$4 sm:$0xff]  }
 0x153   :  { %2823 = vmatprep.mubr.bf16.mxu1 %v9046_v20 }
 0x154   :  { %v690_v33 = vpop.f32.mrf.mxu0  ;;  %2824 = vmatmul.mubr.bf16.vlgmr.msra.gmra.mxu1 %v9048_v22  ;;  %2937 = vmatmul.mubr.bf16.vlgmr.msra.gmra.mxu0 %v8955_v12 }
 0x155   :  { %2946 = vmatprep.mubr.bf16.mxu0 %v8963_v30  ;;  %3018 = vmatpush1.bf16.msra.mxu1 %v7919_v15  ;;  %v7951_v15 = vld [vmem:[#allocation5 + $0x36c] ss:$24 sps:$4 sm:$0xff]  }
 0x156   :  { %3131 = vmatpush1.bf16.msra.mxu0 %v7922_v17  ;;  %v692_v39 = vpop.f32.mrf.mxu0  ;;  %3019 = vmatprep.subr.bf16.mxu1 %v7927_v18  ;;  %v7954_v17 = vld [vmem:[#allocation5 + $0x66c] ss:$24 sps:$4 sm:$0xff]  }
 0x157   :  { %3132 = vmatprep.subr.bf16.mxu0 %v7930_v21  ;;  %v9056_v49 = vpack.c.bf16 %v692_v39, %v688_v23  ;;  %v7949_v23 = vld [vmem:[#allocation5 + $0x368] ss:$24 sps:$4 sm:$0xff]  }
 0x158   :  { %v694_v42 = vpop.f32.mrf.mxu0 }
 0x159   :  { %v9054_v46 = vpack.c.bf16 %v694_v42, %v690_v33  ;;  %3020 = vmatpush1.bf16.msra.mxu1 %v7925_v29  ;;  %v7952_v33 = vld [vmem:[#allocation5 + $0x668] ss:$24 sps:$4 sm:$0xff]   ;;  %v7955_v42 = vld [vmem:[#allocation5 + $0x338] ss:$24 sps:$4 sm:$0xff]  }
 0x15a   :  { %3133 = vmatpush1.bf16.msra.mxu0 %v7928_v34  ;;  %v698_v53 = vpop.f32.mrf.mxu0  ;;  %3021 = vmatprep.subr.bf16.mxu1 %v7933_v38  ;;  %v7957_v34 = vld [vmem:[#allocation5 + $0x33c] ss:$24 sps:$4 sm:$0xff]  }
 0x15b   :  { %2833 = vmatprep.mubr.bf16.mxu1 %v9054_v46  ;;  %3134 = vmatprep.subr.bf16.mxu0 %v7936_v40  ;;  %v7960_v38 = vld [vmem:[#allocation5 + $0x63c] ss:$24 sps:$4 sm:$0xff]  }
 0x15c   :  { %v700_v58 = vpop.f32.mrf.mxu0  ;;  %2834 = vmatmul.mubr.bf16.gmra.mxu1 %v9056_v49  ;;  %2947 = vmatmul.mubr.bf16.gmra.mxu0 %v8967_v32 }
 0x15d   :  { %2956 = vmatprep.mubr.bf16.mxu0 %v8975_v50  ;;  %3022 = vmatpush1.bf16.msra.mxu1 %v7931_v41 }
 0x15e   :  { %3135 = vmatpush1.bf16.msra.mxu0 %v7934_v43  ;;  %v702_v4 = vpop.f32.mrf.mxu0  ;;  %3023 = vmatprep.subr.bf16.mxu1 %v7939_v44 }
 0x15f   :  { %3136 = vmatprep.subr.bf16.mxu0 %v7942_v47  ;;  %v9064_v18 = vpack.c.bf16 %v702_v4, %v698_v53  ;;  %v7958_v47 = vld [vmem:[#allocation5 + $0x638] ss:$24 sps:$4 sm:$0xff]   ;;  %v7963_v53 = vld [vmem:[#allocation5 + $0x30c] ss:$24 sps:$4 sm:$0xff]   ;;  %v7969_v4 = vld [vmem:[#allocation5 + $0x5dc] ss:$24 sps:$4 sm:$0xff]  }
 0x160   :  { %v704_v7 = vpop.f32.mrf.mxu0 }
 0x161   :  { %v9062_v16 = vpack.c.bf16 %v704_v7, %v700_v58  ;;  %3024 = vmatpush1.bf16.msra.mxu1 %v7937_v55  ;;  %v7966_v55 = vld [vmem:[#allocation5 + $0x60c] ss:$24 sps:$4 sm:$0xff]  }
 0x162   :  { %3137 = vmatpush1.bf16.msra.mxu0 %v7940_v63  ;;  %v708_v21 = vpop.f32.mrf.mxu0  ;;  %3025 = vmatprep.subr.bf16.mxu1 %v7945_v1  ;;  %v7961_v63 = vld [vmem:[#allocation5 + $0x308] ss:$24 sps:$4 sm:$0xff]  }
 0x163   :  { %2843 = vmatprep.mubr.bf16.mxu1 %v9062_v16  ;;  %3138 = vmatprep.subr.bf16.mxu0 %v7948_v3  ;;  %v7964_v3 = vld [vmem:[#allocation5 + $0x608] ss:$24 sps:$4 sm:$0xff]  }
 0x164   :  { %v710_v29 = vpop.f32.mrf.mxu0  ;;  %2844 = vmatmul.mubr.bf16.gmra.mxu1 %v9064_v18  ;;  %2957 = vmatmul.mubr.bf16.gmra.mxu0 %v8979_v52 }
 0x165   :  { %2966 = vmatprep.mubr.bf16.mxu0 %v8987_v8  ;;  %3026 = vmatpush1.bf16.msra.mxu1 %v7943_v6  ;;  %v7972_v6 = vld [vmem:[#allocation5 + $0x8dc] ss:$24 sps:$4 sm:$0xff]  }
 0x166   :  { %3139 = vmatpush1.bf16.msra.mxu0 %v7946_v14  ;;  %v712_v40 = vpop.f32.mrf.mxu0  ;;  %3027 = vmatprep.subr.bf16.mxu1 %v7951_v15  ;;  %v7967_v15 = vld [vmem:[#allocation5 + $0x5d8] ss:$24 sps:$4 sm:$0xff]  }
 0x167   :  { %3140 = vmatprep.subr.bf16.mxu0 %v7954_v17  ;;  %v9072_v43 = vpack.c.bf16 %v712_v40, %v708_v21 }
 0x168   :  { %v714_v39 = vpop.f32.mrf.mxu0 }
 0x169   :  { %v9070_v41 = vpack.c.bf16 %v714_v39, %v710_v29  ;;  %3028 = vmatpush1.bf16.msra.mxu1 %v7949_v23  ;;  %v7970_v23 = vld [vmem:[#allocation5 + $0x8d8] ss:$24 sps:$4 sm:$0xff]   ;;  %v7975_v29 = vld [vmem:[#allocation5 + $0x5ac] ss:$24 sps:$4 sm:$0xff]   ;;  %v7976_v39 = vld [vmem:[#allocation5 + $0x8a8] ss:$24 sps:$4 sm:$0xff]  }
 0x16a   :  { %3141 = vmatpush1.bf16.msra.mxu0 %v7952_v33  ;;  %v718_v44 = vpop.f32.mrf.mxu0  ;;  %3029 = vmatprep.subr.bf16.mxu1 %v7957_v34  ;;  %v7978_v33 = vld [vmem:[#allocation5 + $0x8ac] ss:$24 sps:$4 sm:$0xff]  }
 0x16b   :  { %2853 = vmatprep.mubr.bf16.mxu1 %v9070_v41  ;;  %3142 = vmatprep.subr.bf16.mxu0 %v7960_v38  ;;  %v7973_v38 = vld [vmem:[#allocation5 + $0x5a8] ss:$24 sps:$4 sm:$0xff]  }
 0x16c   :  { %v720_v58 = vpop.f32.mrf.mxu0  ;;  %2854 = vmatmul.mubr.bf16.gmra.mxu1 %v9072_v43  ;;  %2967 = vmatmul.mubr.bf16.gmra.mxu0 %v8991_v13 }
 0x16d   :  { %2976 = vmatprep.mubr.bf16.mxu0 %v8999_v35  ;;  %3030 = vmatpush1.bf16.msra.mxu1 %v7955_v42  ;;  %v7981_v42 = vld [vmem:[#allocation5 + $0x57c] ss:$24 sps:$4 sm:$0xff]  }
 0x16e   :  { %3143 = vmatpush1.bf16.msra.mxu0 %v7958_v47  ;;  %v722_v1 = vpop.f32.mrf.mxu0  ;;  %3031 = vmatprep.subr.bf16.mxu1 %v7963_v53 }
 0x16f   :  { %3144 = vmatprep.subr.bf16.mxu0 %v7966_v55  ;;  %v9080_v17 = vpack.c.bf16 %v722_v1, %v718_v44  ;;  %v7984_v44 = vld [vmem:[#allocation5 + $0x87c] ss:$24 sps:$4 sm:$0xff]   ;;  %v7979_v55 = vld [vmem:[#allocation5 + $0x578] ss:$24 sps:$4 sm:$0xff]  }
 0x170   :  { %v724_v7 = vpop.f32.mrf.mxu0  ;;  %v7982_v1 = vld [vmem:[#allocation5 + $0x878] ss:$24 sps:$4 sm:$0xff]  }
 0x171   :  { %v9078_v14 = vpack.c.bf16 %v724_v7, %v720_v58  ;;  %3032 = vmatpush1.bf16.msra.mxu1 %v7961_v63  ;;  %v7985_v7 = vld [vmem:[#allocation5 + $0x548] ss:$24 sps:$4 sm:$0xff]  }
 0x172   :  { %3145 = vmatpush1.bf16.msra.mxu0 %v7964_v3  ;;  %v728_v21 = vpop.f32.mrf.mxu0  ;;  %3033 = vmatprep.subr.bf16.mxu1 %v7969_v4  ;;  %v7987_v3 = vld [vmem:[#allocation5 + $0x54c] ss:$24 sps:$4 sm:$0xff]  }
 0x173   :  { %2863 = vmatprep.mubr.bf16.mxu1 %v9078_v14  ;;  %3146 = vmatprep.subr.bf16.mxu0 %v7972_v6  ;;  %v7990_v4 = vld [vmem:[#allocation5 + $0x84c] ss:$24 sps:$4 sm:$0xff]  }
 0x174   :  { %v730_v34 = vpop.f32.mrf.mxu0  ;;  %2864 = vmatmul.mubr.bf16.gmra.mxu1 %v9080_v17  ;;  %2977 = vmatmul.mubr.bf16.gmra.mxu0 %v9003_v37 }
 0x175   :  { %2986 = vmatprep.mubr.bf16.mxu0 %v9011_v59  ;;  %3034 = vmatpush2.bf16.msra.mxu1 %v7967_v15 }
 0x176   :  { %3147 = vmatpush2.bf16.msra.mxu0 %v7970_v23  ;;  %v732_v40 = vpop.f32.mrf.mxu0  ;;  %3035 = vmatprep.subr.bf16.mxu1 %v7975_v29  ;;  %v7993_v23 = vld [vmem:[#allocation5 + $0x51c] ss:$24 sps:$4 sm:$0xff]  }
 0x177   :  { %3148 = vmatprep.subr.bf16.mxu0 %v7978_v33  ;;  %v9088_v58 = vpack.c.bf16 %v732_v40, %v728_v21  ;;  %v7988_v21 = vld [vmem:[#allocation5 + $0x848] ss:$24 sps:$4 sm:$0xff]   ;;  %v7996_v29 = vld [vmem:[#allocation5 + $0x81c] ss:$24 sps:$4 sm:$0xff]  }
 0x178   :  { %v734_v47 = vpop.f32.mrf.mxu0 }
 0x179   :  { %v9086_v53 = vpack.c.bf16 %v734_v47, %v730_v34  ;;  %3036 = vmatpush2.bf16.msra.mxu1 %v7973_v38  ;;  %v7991_v38 = vld [vmem:[#allocation5 + $0x518] ss:$24 sps:$4 sm:$0xff]   ;;  %v8002_v47 = vld [vmem:[#allocation5 + $0x7ec] ss:$24 sps:$4 sm:$0xff]  }
 0x17a   :  { %3149 = vmatpush2.bf16.msra.mxu0 %v7976_v39  ;;  %v738_v63 = vpop.f32.mrf.mxu0  ;;  %3037 = vmatprep.subr.bf16.mxu1 %v7981_v42  ;;  %v7994_v42 = vld [vmem:[#allocation5 + $0x818] ss:$24 sps:$4 sm:$0xff]  }
 0x17b   :  { %2873 = vmatprep.mubr.bf16.mxu1 %v9086_v53  ;;  %3150 = vmatprep.subr.bf16.mxu0 %v7984_v44  ;;  %v7999_v44 = vld [vmem:[#allocation5 + $0x4ec] ss:$24 sps:$4 sm:$0xff]  }
 0x17c   :  { %v740_v6 = vpop.f32.mrf.mxu0  ;;  %2874 = vmatmul.mubr.bf16.gmra.mxu1 %v9088_v58  ;;  %2987 = vmatmul.mubr.bf16.gmra.mxu0 %v9015_v61 }
 0x17d   :  { %2996 = vmatprep.mubr.bf16.mxu0 %v9023_v24  ;;  %3038 = vmatpush2.bf16.msra.mxu1 %v7979_v55 }
 0x17e   :  { %3151 = vmatpush2.bf16.msra.mxu0 %v7982_v1  ;;  %v742_v15 = vpop.f32.mrf.mxu0  ;;  %3039 = vmatprep.subr.bf16.mxu1 %v7987_v3  ;;  %v7997_v1 = vld [vmem:[#allocation5 + $0x4e8] ss:$24 sps:$4 sm:$0xff]  }
 0x17f   :  { %3152 = vmatprep.subr.bf16.mxu0 %v7990_v4  ;;  %v9096_v40 = vpack.c.bf16 %v742_v15, %v738_v63  ;;  %v8000_v3 = vld [vmem:[#allocation5 + $0x7e8] ss:$24 sps:$4 sm:$0xff]   ;;  %v8005_v4 = vld [vmem:[#allocation5 + $0x4bc] ss:$24 sps:$4 sm:$0xff]  }
 0x180   :  { %v744_v33 = vpop.f32.mrf.mxu0 }
 0x181   :  { %v9094_v34 = vpack.c.bf16 %v744_v33, %v740_v6  ;;  %3040 = vmatpush2.bf16.msra.mxu1 %v7985_v7  ;;  %v8008_v6 = vld [vmem:[#allocation5 + $0x7bc] ss:$24 sps:$4 sm:$0xff]   ;;  %v8011_v33 = vld [vmem:[#allocation5 + $0x48c] ss:$24 sps:$4 sm:$0xff]  }
 0x182   :  { %3153 = vmatpush2.bf16.msra.mxu0 %v7988_v21  ;;  %v748_v39 = vpop.f32.mrf.mxu0  ;;  %3041 = vmatprep.subr.bf16.mxu1 %v7993_v23  ;;  %v8003_v21 = vld [vmem:[#allocation5 + $0x4b8] ss:$24 sps:$4 sm:$0xff]  }
 0x183   :  { %2883 = vmatprep.mubr.bf16.mxu1 %v9094_v34  ;;  %3154 = vmatprep.subr.bf16.mxu0 %v7996_v29  ;;  %v8006_v29 = vld [vmem:[#allocation5 + $0x7b8] ss:$24 sps:$4 sm:$0xff]  }
 0x184   :  { %v750_v55 = vpop.f32.mrf.mxu0  ;;  %2884 = vmatmul.mubr.bf16.gmra.mxu1 %v9096_v40  ;;  %2997 = vmatmul.mubr.bf16.gmra.mxu0 %v9027_v28 }
 0x185   :  { %3006 = vmatprep.mubr.bf16.mxu0 %v9035_v56  ;;  %3042 = vmatpush2.bf16.msra.mxu1 %v7991_v38  ;;  %v8014_v38 = vld [vmem:[#allocation5 + $0x78c] ss:$24 sps:$4 sm:$0xff]  }
 0x186   :  { %3155 = vmatpush2.bf16.msra.mxu0 %v7994_v42  ;;  %v752_v63 = vpop.f32.mrf.mxu0  ;;  %3043 = vmatprep.subr.bf16.mxu1 %v7999_v44  ;;  %v8009_v42 = vld [vmem:[#allocation5 + $0x488] ss:$24 sps:$4 sm:$0xff]   ;;  %v8017_v44 = vld [vmem:[#allocation5 + $0x164] ss:$24 sps:$4 sm:$0xff]  }
 0x187   :  { %3156 = vmatprep.subr.bf16.mxu0 %v8002_v47  ;;  %v9104_v23 = vpack.c.bf16 %v752_v63, %v748_v39  ;;  %v8012_v39 = vld [vmem:[#allocation5 + $0x788] ss:$24 sps:$4 sm:$0xff]   ;;  %v8020_v47 = vld [vmem:[#allocation5 + $0x464] ss:$24 sps:$4 sm:$0xff]   ;;  %v8023_v63 = vld [vmem:[#allocation5 + $0x134] ss:$24 sps:$4 sm:$0xff]  }
 0x188   :  { %v754_v7 = vpop.f32.mrf.mxu0 }
 0x189   :  { %v9102_v15 = vpack.c.bf16 %v754_v7, %v750_v55  ;;  %3044 = vmatpush2.bf16.msra.mxu1 %v7997_v1  ;;  %10802 = vst [vmem:[#allocation12_spill] sm:$0xff] %v9104_v23  ;;  %v8015_v55 = vld [vmem:[#allocation5 + $0x160] ss:$24 sps:$4 sm:$0xff]   ;;  %v8029_v7 = vld [vmem:[#allocation5 + $0x104] ss:$24 sps:$4 sm:$0xff]  }
 0x18a   :  { %3157 = vmatpush2.bf16.msra.mxu0 %v8000_v3  ;;  %3045 = vmatprep.subr.bf16.mxu1 %v8005_v4  ;;  %v8018_v1 = vld [vmem:[#allocation5 + $0x460] ss:$24 sps:$4 sm:$0xff]   ;;  %v8026_v3 = vld [vmem:[#allocation5 + $0x434] ss:$24 sps:$4 sm:$0xff]   ;;  %v8021_v4 = vld [vmem:[#allocation5 + $0x130] ss:$24 sps:$4 sm:$0xff]  }
 0x18b   :  { %2893 = vmatprep.mubr.bf16.mxu1 %v9102_v15  ;;  %3158 = vmatprep.subr.bf16.mxu0 %v8008_v6  ;;  %v8024_v6 = vld [vmem:[#allocation5 + $0x430] ss:$24 sps:$4 sm:$0xff]  }
 0x18c   :  { %2894 = vmatmul.mubr.bf16.gmra.mxu1 %v9104_v23  ;;  %3007 = vmatmul.mubr.bf16.gmra.mxu0 %v9039_v62 }
 0x18d   :  { %3046 = vmatpush2.bf16.msra.mxu1 %v8003_v21  ;;  %3049 = vmatprep.mubr.bf16.mxu1 %v8953_v11  ;;  %v8032_v21 = vld [vmem:[#allocation5 + $0x404] ss:$24 sps:$4 sm:$0xff]  }
 0x18e   :  { %3159 = vmatpush2.bf16.msra.mxu0 %v8006_v29  ;;  %3162 = vmatprep.mubr.bf16.mxu0 %v9046_v20  ;;  %v8027_v29 = vld [vmem:[#allocation5 + $0x100] ss:$24 sps:$4 sm:$0xff]  }
 0x18f   :  { %3047 = vmatprep.subr.bf16.mxu1 %v8011_v33  ;;  %3160 = vmatprep.subr.bf16.mxu0 %v8014_v38  ;;  %v8030_v33 = vld [vmem:[#allocation5 + $0x400] ss:$24 sps:$4 sm:$0xff]   ;;  %v8035_v38 = vld [vmem:[#allocation5 + $0xd4] ss:$24 sps:$4 sm:$0xff]  }
 0x191   :  { %3048 = vmatpush2.bf16.msra.mxu1 %v8009_v42  ;;  %v8038_v42 = vld [vmem:[#allocation5 + $0x3d4] ss:$24 sps:$4 sm:$0xff]  }
 0x192   :  { %3161 = vmatpush2.bf16.msra.mxu0 %v8012_v39  ;;  %3243 = vmatprep.subr.bf16.mxu1 %v8017_v44  ;;  %v8033_v39 = vld [vmem:[#allocation5 + $0xd0] ss:$24 sps:$4 sm:$0xff]  }
 0x193   :  { %3356 = vmatprep.subr.bf16.mxu0 %v8020_v47  ;;  %v8036_v44 = vld [vmem:[#allocation5 + $0x3d0] ss:$24 sps:$4 sm:$0xff]   ;;  %v8041_v47 = vld [vmem:[#allocation5 + $0xa4] ss:$24 sps:$4 sm:$0xff]  }
 0x194   :  { %3050 = vmatmul.mubr.bf16.vlgmr.msra.gmra.mxu1 %v8949_v5 }
 0x195   :  { %3163 = vmatmul.mubr.bf16.vlgmr.msra.gmra.mxu0 %v9048_v22  ;;  %3059 = vmatprep.mubr.bf16.mxu1 %v8965_v31 }
 0x196   :  { %3172 = vmatprep.mubr.bf16.mxu0 %v9054_v46  ;;  %3244 = vmatpush1.bf16.msra.mxu1 %v8015_v55  ;;  %v8044_v55 = vld [vmem:[#allocation5 + $0x3a4] ss:$24 sps:$4 sm:$0xff]  }
 0x197   :  { %3357 = vmatpush1.bf16.msra.mxu0 %v8018_v1  ;;  %3245 = vmatprep.subr.bf16.mxu1 %v8023_v63  ;;  %v8039_v1 = vld [vmem:[#allocation5 + $0xa0] ss:$24 sps:$4 sm:$0xff]  }
 0x198   :  { %3358 = vmatprep.subr.bf16.mxu0 %v8026_v3  ;;  %v8042_v63 = vld [vmem:[#allocation5 + $0x3a0] ss:$24 sps:$4 sm:$0xff]   ;;  %v8047_v3 = vld [vmem:[#allocation5 + $0x74] ss:$24 sps:$4 sm:$0xff]  }
 0x19a   :  { %3246 = vmatpush1.bf16.msra.mxu1 %v8021_v4  ;;  %v8050_v4 = vld [vmem:[#allocation5 + $0x374] ss:$24 sps:$4 sm:$0xff]  }
 0x19b   :  { %3359 = vmatpush1.bf16.msra.mxu0 %v8024_v6  ;;  %3247 = vmatprep.subr.bf16.mxu1 %v8029_v7  ;;  %v8045_v6 = vld [vmem:[#allocation5 + $0x70] ss:$24 sps:$4 sm:$0xff]  }
 0x19c   :  { %3060 = vmatmul.mubr.bf16.gmra.mxu1 %v8961_v25  ;;  %3360 = vmatprep.subr.bf16.mxu0 %v8032_v21  ;;  %v8048_v7 = vld [vmem:[#allocation5 + $0x370] ss:$24 sps:$4 sm:$0xff]   ;;  %v8053_v21 = vld [vmem:[#allocation5 + $0x44] ss:$24 sps:$4 sm:$0xff]  }
 0x19d   :  { %3173 = vmatmul.mubr.bf16.gmra.mxu0 %v9056_v49  ;;  %3069 = vmatprep.mubr.bf16.mxu1 %v8977_v51 }
 0x19e   :  { %3182 = vmatprep.mubr.bf16.mxu0 %v9062_v16  ;;  %3248 = vmatpush1.bf16.msra.mxu1 %v8027_v29  ;;  %v8056_v29 = vld [vmem:[#allocation5 + $0x344] ss:$24 sps:$4 sm:$0xff]  }
 0x19f   :  { %3361 = vmatpush1.bf16.msra.mxu0 %v8030_v33  ;;  %3249 = vmatprep.subr.bf16.mxu1 %v8035_v38  ;;  %v8051_v33 = vld [vmem:[#allocation5 + $0x40] ss:$24 sps:$4 sm:$0xff]  }
 0x1a0   :  { %3362 = vmatprep.subr.bf16.mxu0 %v8038_v42  ;;  %v8054_v38 = vld [vmem:[#allocation5 + $0x340] ss:$24 sps:$4 sm:$0xff]   ;;  %v8059_v42 = vld [vmem:[#allocation5 + $0x14] ss:$24 sps:$4 sm:$0xff]  }
 0x1a2   :  { %3250 = vmatpush1.bf16.msra.mxu1 %v8033_v39  ;;  %v8062_v39 = vld [vmem:[#allocation5 + $0x314] ss:$24 sps:$4 sm:$0xff]  }
 0x1a3   :  { %3363 = vmatpush1.bf16.msra.mxu0 %v8036_v44  ;;  %3251 = vmatprep.subr.bf16.mxu1 %v8041_v47  ;;  %v8057_v44 = vld [vmem:[#allocation5 + $0x10] ss:$24 sps:$4 sm:$0xff]  }
 0x1a4   :  { %3070 = vmatmul.mubr.bf16.gmra.mxu1 %v8973_v45  ;;  %3364 = vmatprep.subr.bf16.mxu0 %v8044_v55  ;;  %v8060_v47 = vld [vmem:[#allocation5 + $0x310] ss:$24 sps:$4 sm:$0xff]   ;;  %v8065_v55 = vld [vmem:[#allocation5 + $0x2e4] ss:$24 sps:$4 sm:$0xff]  }
 0x1a5   :  { %3183 = vmatmul.mubr.bf16.gmra.mxu0 %v9064_v18  ;;  %3079 = vmatprep.mubr.bf16.mxu1 %v8989_v9 }
 0x1a6   :  { %3192 = vmatprep.mubr.bf16.mxu0 %v9070_v41  ;;  %3252 = vmatpush1.bf16.msra.mxu1 %v8039_v1  ;;  %v8068_v1 = vld [vmem:[#allocation5 + $0x5e4] ss:$24 sps:$4 sm:$0xff]  }
 0x1a7   :  { %3365 = vmatpush1.bf16.msra.mxu0 %v8042_v63  ;;  %3253 = vmatprep.subr.bf16.mxu1 %v8047_v3  ;;  %v8063_v63 = vld [vmem:[#allocation5 + $0x2e0] ss:$24 sps:$4 sm:$0xff]  }
 0x1a8   :  { %3366 = vmatprep.subr.bf16.mxu0 %v8050_v4  ;;  %v8066_v3 = vld [vmem:[#allocation5 + $0x5e0] ss:$24 sps:$4 sm:$0xff]   ;;  %v8071_v4 = vld [vmem:[#allocation5 + $0x2b4] ss:$24 sps:$4 sm:$0xff]  }
 0x1aa   :  { %3254 = vmatpush1.bf16.msra.mxu1 %v8045_v6  ;;  %v8074_v6 = vld [vmem:[#allocation5 + $0x5b4] ss:$24 sps:$4 sm:$0xff]  }
 0x1ab   :  { %3367 = vmatpush1.bf16.msra.mxu0 %v8048_v7  ;;  %3255 = vmatprep.subr.bf16.mxu1 %v8053_v21  ;;  %v8069_v7 = vld [vmem:[#allocation5 + $0x2b0] ss:$24 sps:$4 sm:$0xff]  }
 0x1ac   :  { %3080 = vmatmul.mubr.bf16.gmra.mxu1 %v8985_v2  ;;  %3368 = vmatprep.subr.bf16.mxu0 %v8056_v29  ;;  %v8072_v21 = vld [vmem:[#allocation5 + $0x5b0] ss:$24 sps:$4 sm:$0xff]   ;;  %v8077_v29 = vld [vmem:[#allocation5 + $0x284] ss:$24 sps:$4 sm:$0xff]  }
 0x1ad   :  { %3193 = vmatmul.mubr.bf16.gmra.mxu0 %v9072_v43  ;;  %3089 = vmatprep.mubr.bf16.mxu1 %v9001_v36 }
 0x1ae   :  { %3202 = vmatprep.mubr.bf16.mxu0 %v9078_v14  ;;  %3256 = vmatpush1.bf16.msra.mxu1 %v8051_v33  ;;  %v8080_v33 = vld [vmem:[#allocation5 + $0x584] ss:$24 sps:$4 sm:$0xff]  }
 0x1af   :  { %3369 = vmatpush1.bf16.msra.mxu0 %v8054_v38  ;;  %3257 = vmatprep.subr.bf16.mxu1 %v8059_v42  ;;  %v8075_v38 = vld [vmem:[#allocation5 + $0x280] ss:$24 sps:$4 sm:$0xff]  }
 0x1b0   :  { %3370 = vmatprep.subr.bf16.mxu0 %v8062_v39  ;;  %v8078_v42 = vld [vmem:[#allocation5 + $0x580] ss:$24 sps:$4 sm:$0xff]   ;;  %v8083_v39 = vld [vmem:[#allocation5 + $0x254] ss:$24 sps:$4 sm:$0xff]  }
 0x1b2   :  { %3258 = vmatpush1.bf16.msra.mxu1 %v8057_v44  ;;  %v8086_v44 = vld [vmem:[#allocation5 + $0x554] ss:$24 sps:$4 sm:$0xff]  }
 0x1b3   :  { %3371 = vmatpush1.bf16.msra.mxu0 %v8060_v47  ;;  %3259 = vmatprep.subr.bf16.mxu1 %v8065_v55  ;;  %v8081_v47 = vld [vmem:[#allocation5 + $0x250] ss:$24 sps:$4 sm:$0xff]  }
 0x1b4   :  { %3090 = vmatmul.mubr.bf16.gmra.mxu1 %v8997_v27  ;;  %3372 = vmatprep.subr.bf16.mxu0 %v8068_v1  ;;  %v8084_v55 = vld [vmem:[#allocation5 + $0x550] ss:$24 sps:$4 sm:$0xff]   ;;  %v8089_v1 = vld [vmem:[#allocation5 + $0x224] ss:$24 sps:$4 sm:$0xff]  }
 0x1b5   :  { %3203 = vmatmul.mubr.bf16.gmra.mxu0 %v9080_v17  ;;  %3099 = vmatprep.mubr.bf16.mxu1 %v9013_v60 }
 0x1b6   :  { %3212 = vmatprep.mubr.bf16.mxu0 %v9086_v53  ;;  %3260 = vmatpush2.bf16.msra.mxu1 %v8063_v63  ;;  %v8092_v63 = vld [vmem:[#allocation5 + $0x524] ss:$24 sps:$4 sm:$0xff]  }
 0x1b7   :  { %3373 = vmatpush2.bf16.msra.mxu0 %v8066_v3  ;;  %3261 = vmatprep.subr.bf16.mxu1 %v8071_v4  ;;  %v8087_v3 = vld [vmem:[#allocation5 + $0x220] ss:$24 sps:$4 sm:$0xff]  }
 0x1b8   :  { %3374 = vmatprep.subr.bf16.mxu0 %v8074_v6  ;;  %v8090_v4 = vld [vmem:[#allocation5 + $0x520] ss:$24 sps:$4 sm:$0xff]   ;;  %v8095_v6 = vld [vmem:[#allocation5 + $0x1f4] ss:$24 sps:$4 sm:$0xff]  }
 0x1ba   :  { %3262 = vmatpush2.bf16.msra.mxu1 %v8069_v7  ;;  %v8098_v7 = vld [vmem:[#allocation5 + $0x4f4] ss:$24 sps:$4 sm:$0xff]  }
 0x1bb   :  { %3375 = vmatpush2.bf16.msra.mxu0 %v8072_v21  ;;  %3263 = vmatprep.subr.bf16.mxu1 %v8077_v29  ;;  %v1095_v21 = vlaneseq  ;;  %v8093_v29 = vld [vmem:[#allocation5 + $0x1f0] ss:$24 sps:$4 sm:$0xff]  }
 0x1bc   :  { %3100 = vmatmul.mubr.bf16.gmra.mxu1 %v9009_v54  ;;  %3376 = vmatprep.subr.bf16.mxu0 %v8080_v33  ;;  %v8096_v33 = vld [vmem:[#allocation5 + $0x4f0] ss:$24 sps:$4 sm:$0xff]  }
 0x1bd   :  { %3213 = vmatmul.mubr.bf16.gmra.mxu0 %v9088_v58  ;;  %3109 = vmatprep.mubr.bf16.mxu1 %v9025_v26 }
 0x1be   :  { %3222 = vmatprep.mubr.bf16.mxu0 %v9094_v34  ;;  %3264 = vmatpush2.bf16.msra.mxu1 %v8075_v38  ;;  %v8101_v38 = vld [vmem:[#allocation5 + $0x1c4] ss:$24 sps:$4 sm:$0xff]  }
 0x1bf   :  { %3377 = vmatpush2.bf16.msra.mxu0 %v8078_v42  ;;  %3265 = vmatprep.subr.bf16.mxu1 %v8083_v39  ;;  %v8104_v42 = vld [vmem:[#allocation5 + $0x4c4] ss:$24 sps:$4 sm:$0xff]   ;;  %v9139_v39 = vshrl.u32 %v1095_v21, 7 }
 0x1c0   :  { %3378 = vmatprep.subr.bf16.mxu0 %v8086_v44  ;;  %v8099_v44 = vld [vmem:[#allocation5 + $0x1c0] ss:$24 sps:$4 sm:$0xff]  }
 0x1c1   :  { %10803 = vst [vmem:[#allocation13_spill] sm:$0xff] %v9139_v39  ;;  %v10770_v21 = vsub.s32 1, %v9139_v39 }
 0x1c2   :  { %3266 = vmatpush2.bf16.msra.mxu1 %v8081_v47  ;;  %v8102_v47 = vld [vmem:[#allocation5 + $0x4c0] ss:$24 sps:$4 sm:$0xff]  }
 0x1c3   :  { %3379 = vmatpush2.bf16.msra.mxu0 %v8084_v55  ;;  %3267 = vmatprep.subr.bf16.mxu1 %v8089_v1  ;;  %v8107_v55 = vld [vmem:[#allocation5 + $0x194] ss:$24 sps:$4 sm:$0xff]  }
 0x1c4   :  { %3110 = vmatmul.mubr.bf16.gmra.mxu1 %v9021_v19  ;;  %3380 = vmatprep.subr.bf16.mxu0 %v8092_v63  ;;  %v8110_v1 = vld [vmem:[#allocation5 + $0x494] ss:$24 sps:$4 sm:$0xff]   ;;  %v10771_v63 = vsub.s32 0, %v9139_v39 }
 0x1c5   :  { %3223 = vmatmul.mubr.bf16.gmra.mxu0 %v9096_v40  ;;  %3119 = vmatprep.mubr.bf16.mxu1 %v9037_v57 }
 0x1c6   :  { %3232 = vmatprep.mubr.bf16.mxu0 %v9102_v15  ;;  %3268 = vmatpush2.bf16.msra.mxu1 %v8087_v3  ;;  %v8105_v3 = vld [vmem:[#allocation5 + $0x190] ss:$24 sps:$4 sm:$0xff]  }
 0x1c7   :  { %3381 = vmatpush2.bf16.msra.mxu0 %v8090_v4  ;;  %3269 = vmatprep.subr.bf16.mxu1 %v8095_v6  ;;  %v9149_v4 = vld [vmem:[%s10766_s3] sm:$0x3f]  ;;  %v8108_v6 = vld [vmem:[#allocation5 + $0x490] ss:$24 sps:$4 sm:$0xff]  }
 0x1c8   :  { %3382 = vmatprep.subr.bf16.mxu0 %v8098_v7  ;;  %10804 = vst [vmem:[#allocation14_spill] sm:$0xff] %v9149_v4  ;;  %v8113_v7 = vld [vmem:[#allocation5 + $0x764] ss:$24 sps:$4 sm:$0xff]  }
 0x1ca   :  { %3270 = vmatpush2.bf16.msra.mxu1 %v8093_v29  ;;  %v9160_v29 = vrot.slane %v9149_v4, %v10770_v21 }
 0x1cb   :  { %3383 = vmatpush2.bf16.msra.mxu0 %v8096_v33  ;;  %3271 = vmatprep.subr.bf16.mxu1 %v8101_v38 }
 0x1cc   :  { %3120 = vmatmul.mubr.bf16.gmra.mxu1 %v9033_v48  ;;  %3384 = vmatprep.subr.bf16.mxu0 %v8104_v42  ;;  %v8116_v42 = vld [vmem:[#allocation5 + $0x734] ss:$24 sps:$4 sm:$0xff]  }
 0x1cd   :  { %3233 = vmatmul.mubr.bf16.gmra.mxu0 %v9104_v23  ;;  %3275 = vmatprep.mubr.bf16.mxu1 %v8951_v10  ;;  %v9155_v10 = vrot.slane %v9149_v4, %v10771_v63 }
 0x1ce   :  { %3272 = vmatpush2.bf16.msra.mxu1 %v8099_v44  ;;  %3388 = vmatprep.mubr.bf16.mxu0 %v8953_v11  ;;  %v8111_v11 = vld [vmem:[#allocation5 + $0x760] ss:$24 sps:$4 sm:$0xff]  }
 0x1cf   :  { %3385 = vmatpush2.bf16.msra.mxu0 %v8102_v47  ;;  %3273 = vmatprep.subr.bf16.mxu1 %v8107_v55 }
 0x1d0   :  { %3386 = vmatprep.subr.bf16.mxu0 %v8110_v1 }
 0x1d2   :  { %3274 = vmatpush2.bf16.msra.mxu1 %v8105_v3 }
 0x1d3   :  { %3387 = vmatpush2.bf16.msra.mxu0 %v8108_v6  ;;  %3469 = vmatprep.subr.bf16.mxu1 %v8113_v7  ;;  %v8114_v6 = vld [vmem:[#allocation5 + $0x730] ss:$24 sps:$4 sm:$0xff]  }
 0x1d4   :  { %v2599_v33 = vpop.f32.mrf.mxu1  ;;  %v2712_v38 = vpop.f32.mrf.mxu0 }
 0x1d5   :  { %v2600_v44 = vadd.f32 %v2599_v33, %v9155_v10  ;;  %3276 = vmatmul.mubr.bf16.vlgmr.msra.gmra.mxu1 %v8955_v12  ;;  %v8119_v33 = vld [vmem:[#allocation5 + $0x704] ss:$24 sps:$4 sm:$0xff]  }
 0x1d6   :  { %3389 = vmatmul.mubr.bf16.vlgmr.msra.gmra.mxu0 %v8949_v5  ;;  %3285 = vmatprep.mubr.bf16.mxu1 %v8963_v30  ;;  %v2601_v47 = vpop.f32.mrf.mxu1  ;;  %v2714_v55 = vpop.f32.mrf.mxu0 }
 0x1d7   :  { %v9166_v1 = vadd.f32 %v2712_v38, %v2600_v44  ;;  %3398 = vmatprep.mubr.bf16.mxu0 %v8965_v31  ;;  %3470 = vmatpush1.bf16.msra.mxu1 %v8111_v11  ;;  %v2602_v3 = vadd.f32 %v2601_v47, %v9160_v29  ;;  %v8117_v31 = vld [vmem:[#allocation5 + $0x700] ss:$24 sps:$4 sm:$0xff]   ;;  %v8122_v47 = vld [vmem:[#allocation5 + $0x6d4] ss:$24 sps:$4 sm:$0xff]  }
 0x1d8   :  { %v2603_v7 = vpop.f32.mrf.mxu1  ;;  %v2716_v21 = vpop.f32.mrf.mxu0  ;;  %3471 = vmatprep.subr.bf16.mxu1 %v8116_v42 }
 0x1d9   :  { %v9170_v63 = vadd.f32 %v2714_v55, %v2602_v3  ;;  %v2604_v5 = vadd.f32 %v2603_v7, %v9155_v10  ;;  %v8120_v7 = vld [vmem:[#allocation5 + $0x6d0] ss:$24 sps:$4 sm:$0xff]  }
 0x1da   :  { %v2605_v12 = vpop.f32.mrf.mxu1  ;;  %v2718_v30 = vpop.f32.mrf.mxu0 }
 0x1db   :  { %v9173_v0 = vadd.f32 %v2716_v21, %v2604_v5  ;;  %3472 = vmatpush1.bf16.msra.mxu1 %v8114_v6  ;;  %v2606_v38 = vadd.f32 %v2605_v12, %v9160_v29  ;;  %v8125_v12 = vld [vmem:[#allocation5 + $0x6a4] ss:$24 sps:$4 sm:$0xff]  }
 0x1dc   :  { %v2609_v11 = vpop.f32.mrf.mxu1  ;;  %v2722_v44 = vpop.f32.mrf.mxu0  ;;  %3473 = vmatprep.subr.bf16.mxu1 %v8119_v33 }
 0x1dd   :  { %v9176_v4 = vadd.f32 %v2718_v30, %v2606_v38  ;;  %v2610_v42 = vadd.f32 %v2609_v11, %v9155_v10  ;;  %3286 = vmatmul.mubr.bf16.gmra.mxu1 %v8967_v32 }
 0x1de   :  { %3399 = vmatmul.mubr.bf16.gmra.mxu0 %v8961_v25  ;;  %3295 = vmatprep.mubr.bf16.mxu1 %v8975_v50  ;;  %v2611_v21 = vpop.f32.mrf.mxu1  ;;  %v2724_v55 = vpop.f32.mrf.mxu0 }
 0x1df   :  { %v9182_v3 = vadd.f32 %v2722_v44, %v2610_v42  ;;  %3408 = vmatprep.mubr.bf16.mxu0 %v8977_v51  ;;  %3474 = vmatpush1.bf16.msra.mxu1 %v8117_v31  ;;  %v2612_v6 = vadd.f32 %v2611_v21, %v9160_v29  ;;  %v8123_v51 = vld [vmem:[#allocation5 + $0x6a0] ss:$24 sps:$4 sm:$0xff]   ;;  %v8128_v42 = vld [vmem:[#allocation5 + $0x674] ss:$24 sps:$4 sm:$0xff]  }
 0x1e0   :  { %v2613_v33 = vpop.f32.mrf.mxu1  ;;  %v2726_v5 = vpop.f32.mrf.mxu0  ;;  %3475 = vmatprep.subr.bf16.mxu1 %v8122_v47 }
 0x1e1   :  { %v9186_v30 = vadd.f32 %v2724_v55, %v2612_v6  ;;  %v2614_v25 = vadd.f32 %v2613_v33, %v9155_v10 }
 0x1e2   :  { %v2615_v32 = vpop.f32.mrf.mxu1  ;;  %v2728_v50 = vpop.f32.mrf.mxu0 }
 0x1e3   :  { %v9189_v38 = vadd.f32 %v2726_v5, %v2614_v25  ;;  %3476 = vmatpush1.bf16.msra.mxu1 %v8120_v7  ;;  %v2616_v11 = vadd.f32 %v2615_v32, %v9160_v29  ;;  %v8126_v5 = vld [vmem:[#allocation5 + $0x670] ss:$24 sps:$4 sm:$0xff]   ;;  %v8131_v32 = vld [vmem:[#allocation5 + $0x644] ss:$24 sps:$4 sm:$0xff]  }
 0x1e4   :  { %v2619_v31 = vpop.f32.mrf.mxu1  ;;  %v2732_v44 = vpop.f32.mrf.mxu0  ;;  %3477 = vmatprep.subr.bf16.mxu1 %v8125_v12 }
 0x1e5   :  { %v9192_v21 = vadd.f32 %v2728_v50, %v2616_v11  ;;  %v2620_v47 = vadd.f32 %v2619_v31, %v9155_v10  ;;  %3296 = vmatmul.mubr.bf16.gmra.mxu1 %v8979_v52 }
 0x1e6   :  { %3409 = vmatmul.mubr.bf16.gmra.mxu0 %v8973_v45  ;;  %3305 = vmatprep.mubr.bf16.mxu1 %v8987_v8  ;;  %v2621_v55 = vpop.f32.mrf.mxu1  ;;  %v2734_v6 = vpop.f32.mrf.mxu0 }
 0x1e7   :  { %v9198_v7 = vadd.f32 %v2732_v44, %v2620_v47  ;;  %3418 = vmatprep.mubr.bf16.mxu0 %v8989_v9  ;;  %3478 = vmatpush1.bf16.msra.mxu1 %v8123_v51  ;;  %v2622_v33 = vadd.f32 %v2621_v55, %v9160_v29  ;;  %v8129_v9 = vld [vmem:[#allocation5 + $0x640] ss:$24 sps:$4 sm:$0xff]   ;;  %v8134_v47 = vld [vmem:[#allocation5 + $0x614] ss:$24 sps:$4 sm:$0xff]  }
 0x1e8   :  { %v2623_v12 = vpop.f32.mrf.mxu1  ;;  %v2736_v25 = vpop.f32.mrf.mxu0  ;;  %3479 = vmatprep.subr.bf16.mxu1 %v8128_v42 }
 0x1e9   :  { %v9202_v50 = vadd.f32 %v2734_v6, %v2622_v33  ;;  %v2624_v45 = vadd.f32 %v2623_v12, %v9155_v10 }
 0x1ea   :  { %v2625_v52 = vpop.f32.mrf.mxu1  ;;  %v2738_v8 = vpop.f32.mrf.mxu0 }
 0x1eb   :  { %v9205_v11 = vadd.f32 %v2736_v25, %v2624_v45  ;;  %3480 = vmatpush1.bf16.msra.mxu1 %v8126_v5  ;;  %v2626_v31 = vadd.f32 %v2625_v52, %v9160_v29  ;;  %v8132_v25 = vld [vmem:[#allocation5 + $0x610] ss:$24 sps:$4 sm:$0xff]   ;;  %v8137_v52 = vld [vmem:[#allocation5 + $0x8e4] ss:$24 sps:$4 sm:$0xff]  }
 0x1ec   :  { %v2629_v51 = vpop.f32.mrf.mxu1  ;;  %v2742_v44 = vpop.f32.mrf.mxu0  ;;  %3481 = vmatprep.subr.bf16.mxu1 %v8131_v32 }
 0x1ed   :  { %v9208_v55 = vadd.f32 %v2738_v8, %v2626_v31  ;;  %v2630_v42 = vadd.f32 %v2629_v51, %v9155_v10  ;;  %3306 = vmatmul.mubr.bf16.gmra.mxu1 %v8991_v13 }
 0x1ee   :  { %3419 = vmatmul.mubr.bf16.gmra.mxu0 %v8985_v2  ;;  %3315 = vmatprep.mubr.bf16.mxu1 %v8999_v35  ;;  %v2631_v6 = vpop.f32.mrf.mxu1  ;;  %v2744_v33 = vpop.f32.mrf.mxu0 }
 0x1ef   :  { %v9214_v5 = vadd.f32 %v2742_v44, %v2630_v42  ;;  %3428 = vmatprep.mubr.bf16.mxu0 %v9001_v36  ;;  %3482 = vmatpush1.bf16.msra.mxu1 %v8129_v9  ;;  %v2632_v12 = vadd.f32 %v2631_v6, %v9160_v29  ;;  %v8135_v36 = vld [vmem:[#allocation5 + $0x8e0] ss:$24 sps:$4 sm:$0xff]   ;;  %v8140_v42 = vld [vmem:[#allocation5 + $0x8b4] ss:$24 sps:$4 sm:$0xff]  }
 0x1f0   :  { %v2633_v32 = vpop.f32.mrf.mxu1  ;;  %v2746_v45 = vpop.f32.mrf.mxu0  ;;  %3483 = vmatprep.subr.bf16.mxu1 %v8134_v47 }
 0x1f1   :  { %v9218_v8 = vadd.f32 %v2744_v33, %v2632_v12  ;;  %v2634_v2 = vadd.f32 %v2633_v32, %v9155_v10 }
 0x1f2   :  { %v2635_v13 = vpop.f32.mrf.mxu1  ;;  %v2748_v35 = vpop.f32.mrf.mxu0 }
 0x1f3   :  { %v9221_v31 = vadd.f32 %v2746_v45, %v2634_v2  ;;  %3484 = vmatpush1.bf16.msra.mxu1 %v8132_v25  ;;  %v2636_v51 = vadd.f32 %v2635_v13, %v9160_v29  ;;  %v8138_v45 = vld [vmem:[#allocation5 + $0x8b0] ss:$24 sps:$4 sm:$0xff]   ;;  %v8143_v13 = vld [vmem:[#allocation5 + $0x884] ss:$24 sps:$4 sm:$0xff]  }
 0x1f4   :  { %v2639_v9 = vpop.f32.mrf.mxu1  ;;  %v2752_v44 = vpop.f32.mrf.mxu0  ;;  %3485 = vmatprep.subr.bf16.mxu1 %v8137_v52 }
 0x1f5   :  { %v9224_v6 = vadd.f32 %v2748_v35, %v2636_v51  ;;  %v2640_v47 = vadd.f32 %v2639_v9, %v9155_v10  ;;  %3316 = vmatmul.mubr.bf16.gmra.mxu1 %v9003_v37 }
 0x1f6   :  { %3429 = vmatmul.mubr.bf16.gmra.mxu0 %v8997_v27  ;;  %3325 = vmatprep.mubr.bf16.mxu1 %v9011_v59  ;;  %v2641_v33 = vpop.f32.mrf.mxu1  ;;  %v2754_v12 = vpop.f32.mrf.mxu0 }
 0x1f7   :  { %v9230_v25 = vadd.f32 %v2752_v44, %v2640_v47  ;;  %3438 = vmatprep.mubr.bf16.mxu0 %v9013_v60  ;;  %3486 = vmatpush2.bf16.msra.mxu1 %v8135_v36  ;;  %v2642_v32 = vadd.f32 %v2641_v33, %v9160_v29  ;;  %v8141_v60 = vld [vmem:[#allocation5 + $0x880] ss:$24 sps:$4 sm:$0xff]   ;;  %v8146_v44 = vld [vmem:[#allocation5 + $0x854] ss:$24 sps:$4 sm:$0xff]  }
 0x1f8   :  { %v2643_v52 = vpop.f32.mrf.mxu1  ;;  %v2756_v2 = vpop.f32.mrf.mxu0  ;;  %3487 = vmatprep.subr.bf16.mxu1 %v8140_v42 }
 0x1f9   :  { %v9234_v35 = vadd.f32 %v2754_v12, %v2642_v32  ;;  %v2644_v27 = vadd.f32 %v2643_v52, %v9155_v10 }
 0x1fa   :  { %v9237_v37 = vpop.f32.mrf.mxu1  ;;  %v9239_v59 = vpop.f32.mrf.mxu0 }
 0x1fb   :  { %v9241_v51 = vadd.f32 %v2756_v2, %v2644_v27  ;;  %3488 = vmatpush2.bf16.msra.mxu1 %v8138_v45  ;;  %v8144_v45 = vld [vmem:[#allocation5 + $0x850] ss:$24 sps:$4 sm:$0xff]  }
 0x1fc   :  { %v2649_v36 = vpop.f32.mrf.mxu1  ;;  %v2762_v9 = vpop.f32.mrf.mxu0  ;;  %3489 = vmatprep.subr.bf16.mxu1 %v8143_v13  ;;  %v8149_v13 = vld [vmem:[#allocation5 + $0x824] ss:$24 sps:$4 sm:$0xff]  }
 0x1fd   :  { %v2650_v47 = vadd.f32 %v2649_v36, %v9155_v10  ;;  %3326 = vmatmul.mubr.bf16.gmra.mxu1 %v9015_v61 }
 0x1fe   :  { %3439 = vmatmul.mubr.bf16.gmra.mxu0 %v9009_v54  ;;  %3335 = vmatprep.mubr.bf16.mxu1 %v9023_v24  ;;  %v2651_v42 = vpop.f32.mrf.mxu1  ;;  %v2764_v33 = vpop.f32.mrf.mxu0 }
 0x1ff   :  { %v9247_v12 = vadd.f32 %v2762_v9, %v2650_v47  ;;  %3448 = vmatprep.mubr.bf16.mxu0 %v9025_v26  ;;  %3490 = vmatpush2.bf16.msra.mxu1 %v8141_v60  ;;  %v2652_v32 = vadd.f32 %v2651_v42, %v9160_v29  ;;  %v8147_v26 = vld [vmem:[#allocation5 + $0x820] ss:$24 sps:$4 sm:$0xff]   ;;  %v8152_v47 = vld [vmem:[#allocation5 + $0x7f4] ss:$24 sps:$4 sm:$0xff]  }
 0x200   :  { %v2653_v52 = vpop.f32.mrf.mxu1  ;;  %v2766_v2 = vpop.f32.mrf.mxu0  ;;  %3491 = vmatprep.subr.bf16.mxu1 %v8146_v44 }
 0x201   :  { %v9251_v27 = vadd.f32 %v2764_v33, %v2652_v32  ;;  %v2654_v54 = vadd.f32 %v2653_v52, %v9155_v10  ;;  %v8150_v52 = vld [vmem:[#allocation5 + $0x7f0] ss:$24 sps:$4 sm:$0xff]  }
 0x202   :  { %v9254_v61 = vpop.f32.mrf.mxu1  ;;  %v9256_v24 = vpop.f32.mrf.mxu0 }
 0x203   :  { %v9258_v36 = vadd.f32 %v2766_v2, %v2654_v54  ;;  %3492 = vmatpush2.bf16.msra.mxu1 %v8144_v45  ;;  %v8155_v54 = vld [vmem:[#allocation5 + $0x7c4] ss:$24 sps:$4 sm:$0xff]  }
 0x204   :  { %v2659_v60 = vpop.f32.mrf.mxu1  ;;  %v2772_v9 = vpop.f32.mrf.mxu0  ;;  %3493 = vmatprep.subr.bf16.mxu1 %v8149_v13 }
 0x205   :  { %v2660_v42 = vadd.f32 %v2659_v60, %v9155_v10  ;;  %3336 = vmatmul.mubr.bf16.gmra.mxu1 %v9027_v28 }
 0x206   :  { %3449 = vmatmul.mubr.bf16.gmra.mxu0 %v9021_v19  ;;  %3345 = vmatprep.mubr.bf16.mxu1 %v9035_v56  ;;  %v2661_v44 = vpop.f32.mrf.mxu1  ;;  %v2774_v33 = vpop.f32.mrf.mxu0 }
 0x207   :  { %v9264_v32 = vadd.f32 %v2772_v9, %v2660_v42  ;;  %3458 = vmatprep.mubr.bf16.mxu0 %v9037_v57  ;;  %3494 = vmatpush2.bf16.msra.mxu1 %v8147_v26  ;;  %v2662_v45 = vadd.f32 %v2661_v44, %v9160_v29  ;;  %v8153_v57 = vld [vmem:[#allocation5 + $0x7c0] ss:$24 sps:$4 sm:$0xff]   ;;  %v8158_v44 = vld [vmem:[#allocation5 + $0x794] ss:$24 sps:$4 sm:$0xff]  }
 0x208   :  { %v2663_v2 = vpop.f32.mrf.mxu1  ;;  %v2776_v13 = vpop.f32.mrf.mxu0  ;;  %3495 = vmatprep.subr.bf16.mxu1 %v8152_v47 }
 0x209   :  { %v9268_v60 = vadd.f32 %v2774_v33, %v2662_v45  ;;  %v2664_v19 = vadd.f32 %v2663_v2, %v9155_v10  ;;  %v8156_v2 = vld [vmem:[#allocation5 + $0x790] ss:$24 sps:$4 sm:$0xff]  }
 0x20a   :  { %v9271_v28 = vpop.f32.mrf.mxu1  ;;  %v9273_v56 = vpop.f32.mrf.mxu0 }
 0x20b   :  { %v9275_v9 = vadd.f32 %v2776_v13, %v2664_v19  ;;  %3496 = vmatpush2.bf16.msra.mxu1 %v8150_v52  ;;  %v10806_v13 = vmov 0  }
 0x20c   :  { %v2669_v26 = vpop.f32.mrf.mxu1  ;;  %v2782_v42 = vpop.f32.mrf.mxu0  ;;  %3497 = vmatprep.subr.bf16.mxu1 %v8155_v54 }
 0x20d   :  { %v2670_v23 = vadd.f32 %v2669_v26, %v9155_v10  ;;  %3346 = vmatmul.mubr.bf16.gmra.mxu1 %v9039_v62 }
 0x20e   :  { %3459 = vmatmul.mubr.bf16.gmra.mxu0 %v9033_v48  ;;  %3501 = vmatprep.mubr.bf16.mxu1 %v9046_v20  ;;  %v2671_v47 = vpop.f32.mrf.mxu1  ;;  %v2784_v33 = vpop.f32.mrf.mxu0 }
 0x20f   :  { %v9281_v45 = vadd.f32 %v2782_v42, %v2670_v23  ;;  %3498 = vmatpush2.bf16.msra.mxu1 %v8153_v57  ;;  %v2672_v52 = vadd.f32 %v2671_v47, %v9160_v29  ;;  %3758 = vmatprep.mubr.bf16.mxu0 %v10806_v13 }
 0x210   :  { %v9285_v54 = vpop.f32.mrf.mxu1  ;;  %v9287_v19 = vpop.f32.mrf.mxu0  ;;  %3499 = vmatprep.subr.bf16.mxu1 %v8158_v44 }
 0x211   :  { %10805 = vst [vmem:[#allocation15_spill] sm:$0xff] %v9281_v45  ;;  %v9289_v62 = vadd.f32 %v2784_v33, %v2672_v52 }
 0x212   :  { %v9291_v48 = vpop.f32.mrf.mxu1  ;;  %v9293_v20 = vpop.f32.mrf.mxu0 }
 0x213   :  { %10807 = vst [vmem:[#allocation16_spill] sm:$0xff] %v9289_v62  ;;  %10808 = vst [vmem:[#allocation17_spill] sm:$0xff] %v9293_v20  ;;  %3500 = vmatpush2.bf16.msra.mxu1 %v8156_v2 }
 0x214   :  { %v2825_v23 = vpop.f32.mrf.mxu1  ;;  %v9295_v26 = vpop.f32.mrf.mxu0 }
 0x215   :  { %10809 = vst [vmem:[#allocation18_spill] sm:$0xff] %v9295_v26  ;;  %v2826_v57 = vadd.f32 %v2825_v23, %v9166_v1 }
 0x216   :  { %3502 = vmatmul.mubr.bf16.vlgmr.msra.gmra.mxu1 %v9048_v22  ;;  %v2827_v42 = vpop.f32.mrf.mxu1  ;;  %v9299_v47 = vpop.f32.mrf.mxu0 }
 0x217   :  { %10810 = vst [vmem:[#allocation19_spill] sm:$0xff] %v9299_v47  ;;  %3511 = vmatprep.mubr.bf16.mxu1 %v9054_v46  ;;  %v2828_v44 = vadd.f32 %v2827_v42, %v9170_v63  ;;  %v3582_v26 = vmax.f32 %v2826_v57, 0.0 }
 0x218   :  { %v2829_v33 = vpop.f32.mrf.mxu1  ;;  %v9303_v52 = vpop.f32.mrf.mxu0 }
 0x219   :  { %v2830_v45 = vadd.f32 %v2829_v33, %v9173_v0  ;;  %v3583_v47 = vmax.f32 %v2828_v44, 0.0 }
 0x21a   :  { %v2831_v2 = vpop.f32.mrf.mxu1  ;;  %v9306_v62 = vpop.f32.mrf.mxu0 }
 0x21b   :  { %10811 = vst [vmem:[#allocation20_spill] sm:$0xff] %v9306_v62  ;;  %v3588_v20 = vmax.f32 %v2830_v45, 0.0  ;;  %v2832_v1 = vadd.f32 %v2831_v2, %v9176_v4 }
 0x21c   :  { %v2835_v22 = vpop.f32.mrf.mxu1  ;;  %v9309_v23 = vpop.f32.mrf.mxu0 }
 0x21d   :  { %v9311_v13 = vpack.c.bf16 %v3588_v20, %v3582_v26  ;;  %v3589_v46 = vmax.f32 %v2832_v1, 0.0  ;;  %v2836_v63 = vadd.f32 %v2835_v22, %v9182_v3 }
 0x21e   :  { %3512 = vmatmul.mubr.bf16.gmra.mxu1 %v9056_v49  ;;  %v2837_v42 = vpop.f32.mrf.mxu1  ;;  %v9315_v0 = vpop.f32.mrf.mxu0 }
 0x21f   :  { %3521 = vmatprep.mubr.bf16.mxu1 %v9062_v16  ;;  %v2838_v45 = vadd.f32 %v2837_v42, %v9186_v30  ;;  %v9319_v57 = vpack.c.bf16 %v3589_v46, %v3583_v47  ;;  %v3594_v3 = vmax.f32 %v2836_v63, 0.0 }
 0x220   :  { %v2839_v4 = vpop.f32.mrf.mxu1  ;;  %v9321_v33 = vpop.f32.mrf.mxu0 }
 0x221   :  { %v2840_v20 = vadd.f32 %v2839_v4, %v9189_v38  ;;  %v3595_v16 = vmax.f32 %v2838_v45, 0.0 }
 0x222   :  { %v2841_v26 = vpop.f32.mrf.mxu1  ;;  %v9324_v44 = vpop.f32.mrf.mxu0 }
 0x223   :  { %10812 = vst [vmem:[#allocation21_spill] sm:$0xff] %v9324_v44  ;;  %v3600_v2 = vmax.f32 %v2840_v20, 0.0  ;;  %v2842_v49 = vadd.f32 %v2841_v26, %v9192_v21 }
 0x224   :  { %v2845_v1 = vpop.f32.mrf.mxu1  ;;  %v9327_v22 = vpop.f32.mrf.mxu0 }
 0x225   :  { %v9329_v62 = vpack.c.bf16 %v3600_v2, %v3594_v3  ;;  %v3601_v30 = vmax.f32 %v2842_v49, 0.0  ;;  %v2846_v47 = vadd.f32 %v2845_v1, %v9198_v7 }
 0x226   :  { %3522 = vmatmul.mubr.bf16.gmra.mxu1 %v9064_v18  ;;  %v2847_v46 = vpop.f32.mrf.mxu1  ;;  %v9333_v38 = vpop.f32.mrf.mxu0 }
 0x227   :  { %10813 = vst [vmem:[#allocation22_spill] sm:$0xff] %v9333_v38  ;;  %3531 = vmatprep.mubr.bf16.mxu1 %v9070_v41  ;;  %v9336_v63 = vpack.c.bf16 %v3601_v30, %v3595_v16  ;;  %v2848_v4 = vadd.f32 %v2847_v46, %v9202_v50  ;;  %v3606_v7 = vmax.f32 %v2846_v47, 0.0 }
 0x228   :  { %v2849_v42 = vpop.f32.mrf.mxu1  ;;  %v9338_v21 = vpop.f32.mrf.mxu0 }
 0x229   :  { %v2850_v45 = vadd.f32 %v2849_v42, %v9205_v11  ;;  %v3607_v41 = vmax.f32 %v2848_v4, 0.0 }
 0x22a   :  { %v2851_v20 = vpop.f32.mrf.mxu1  ;;  %v9342_v26 = vpop.f32.mrf.mxu0 }
 0x22b   :  { %10814 = vst [vmem:[#allocation23_spill] sm:$0xff] %v9342_v26  ;;  %v3612_v3 = vmax.f32 %v2850_v45, 0.0  ;;  %v2852_v18 = vadd.f32 %v2851_v20, %v9208_v55 }
 0x22c   :  { %v2855_v2 = vpop.f32.mrf.mxu1  ;;  %v9345_v49 = vpop.f32.mrf.mxu0 }
 0x22d   :  { %v9347_v1 = vpack.c.bf16 %v3612_v3, %v3606_v7  ;;  %v3613_v16 = vmax.f32 %v2852_v18, 0.0  ;;  %v2856_v11 = vadd.f32 %v2855_v2, %v9214_v5 }
 0x22e   :  { %3532 = vmatmul.mubr.bf16.gmra.mxu1 %v9072_v43  ;;  %v2857_v30 = vpop.f32.mrf.mxu1  ;;  %v9350_v50 = vpop.f32.mrf.mxu0 }
 0x22f   :  { %10815 = vst [vmem:[#allocation24_spill] sm:$0xff] %v9350_v50  ;;  %3541 = vmatprep.mubr.bf16.mxu1 %v9078_v14  ;;  %v9354_v47 = vpack.c.bf16 %v3613_v16, %v3607_v41  ;;  %v2858_v42 = vadd.f32 %v2857_v30, %v9218_v8  ;;  %v3618_v43 = vmax.f32 %v2856_v11, 0.0  ;;  %v2646_v14 = vadd.f32 %v9237_v37, %v9160_v29 }
 0x230   :  { %v2859_v46 = vpop.f32.mrf.mxu1  ;;  %v9356_v55 = vpop.f32.mrf.mxu0 }
 0x231   :  { %v2860_v4 = vadd.f32 %v2859_v46, %v9221_v31  ;;  %v3619_v2 = vmax.f32 %v2858_v42, 0.0  ;;  %v2759_v37 = vadd.f32 %v9239_v59, %v2646_v14 }
 0x232   :  { %v2861_v45 = vpop.f32.mrf.mxu1  ;;  %v9360_v20 = vpop.f32.mrf.mxu0 }
 0x233   :  { %10816 = vst [vmem:[#allocation25_spill] sm:$0xff] %v9360_v20  ;;  %v3624_v7 = vmax.f32 %v2860_v4, 0.0  ;;  %v2862_v3 = vadd.f32 %v2861_v45, %v9224_v6 }
 0x234   :  { %v2865_v18 = vpop.f32.mrf.mxu1  ;;  %v9363_v5 = vpop.f32.mrf.mxu0 }
 0x235   :  { %v9367_v41 = vpack.c.bf16 %v3624_v7, %v3618_v43  ;;  %v3625_v16 = vmax.f32 %v2862_v3, 0.0  ;;  %v2866_v30 = vadd.f32 %v2865_v18, %v9230_v25 }
 0x236   :  { %3542 = vmatmul.mubr.bf16.gmra.mxu1 %v9080_v17  ;;  %v2867_v8 = vpop.f32.mrf.mxu1  ;;  %v9370_v31 = vpop.f32.mrf.mxu0 }
 0x237   :  { %10817 = vst [vmem:[#allocation26_spill] sm:$0xff] %v9370_v31  ;;  %3551 = vmatprep.mubr.bf16.mxu1 %v9086_v53  ;;  %v9374_v6 = vpack.c.bf16 %v3625_v16, %v3619_v2  ;;  %v2868_v42 = vadd.f32 %v2867_v8, %v9234_v35  ;;  %v3630_v43 = vmax.f32 %v2866_v30, 0.0  ;;  %v2656_v53 = vadd.f32 %v9254_v61, %v9160_v29 }
 0x238   :  { %v2869_v11 = vpop.f32.mrf.mxu1  ;;  %v9376_v46 = vpop.f32.mrf.mxu0 }
 0x239   :  { %v2870_v4 = vadd.f32 %v2869_v11, %v9241_v51  ;;  %v3631_v2 = vmax.f32 %v2868_v42, 0.0  ;;  %v2769_v61 = vadd.f32 %v9256_v24, %v2656_v53 }
 0x23a   :  { %v2871_v45 = vpop.f32.mrf.mxu1  ;;  %v9381_v17 = vpop.f32.mrf.mxu0 }
 0x23b   :  { %10818 = vst [vmem:[#allocation27_spill] sm:$0xff] %v9381_v17  ;;  %v3636_v7 = vmax.f32 %v2870_v4, 0.0  ;;  %v2872_v3 = vadd.f32 %v2871_v45, %v2759_v37 }
 0x23c   :  { %v2875_v25 = vpop.f32.mrf.mxu1  ;;  %v9383_v18 = vpop.f32.mrf.mxu0 }
 0x23d   :  { %v9387_v16 = vpack.c.bf16 %v3636_v7, %v3630_v43  ;;  %v3637_v59 = vmax.f32 %v2872_v3, 0.0  ;;  %v2876_v14 = vadd.f32 %v2875_v25, %v9247_v12 }
 0x23e   :  { %3552 = vmatmul.mubr.bf16.gmra.mxu1 %v9088_v58  ;;  %v2877_v35 = vpop.f32.mrf.mxu1  ;;  %v9390_v51 = vpop.f32.mrf.mxu0 }
 0x23f   :  { %3561 = vmatprep.mubr.bf16.mxu1 %v9094_v34  ;;  %v9394_v8 = vpack.c.bf16 %v3637_v59, %v3631_v2  ;;  %v2878_v37 = vadd.f32 %v2877_v35, %v9251_v27  ;;  %v3642_v45 = vmax.f32 %v2876_v14, 0.0  ;;  %v2666_v34 = vadd.f32 %v9271_v28, %v9160_v29 }
 0x240   :  { %v2879_v30 = vpop.f32.mrf.mxu1  ;;  %v9396_v11 = vpop.f32.mrf.mxu0 }
 0x241   :  { %v2880_v42 = vadd.f32 %v2879_v30, %v9258_v36  ;;  %v3643_v25 = vmax.f32 %v2878_v37, 0.0  ;;  %v2779_v28 = vadd.f32 %v9273_v56, %v2666_v34 }
 0x242   :  { %v2881_v4 = vpop.f32.mrf.mxu1  ;;  %v9401_v58 = vpop.f32.mrf.mxu0 }
 0x243   :  { %v3648_v43 = vmax.f32 %v2880_v42, 0.0  ;;  %v2882_v7 = vadd.f32 %v2881_v4, %v2769_v61 }
 0x244   :  { %v2885_v12 = vpop.f32.mrf.mxu1  ;;  %v9403_v3 = vpop.f32.mrf.mxu0 }
 0x245   :  { %v9407_v2 = vpack.c.bf16 %v3648_v43, %v3642_v45  ;;  %v3649_v24 = vmax.f32 %v2882_v7, 0.0  ;;  %v2886_v53 = vadd.f32 %v2885_v12, %v9264_v32  ;;  %v2674_v32 = vadd.f32 %v9285_v54, %v9155_v10  ;;  %v10820_v54 = vld [vmem:[#allocation14_spill] sm:$0xff] }
 0x246   :  { %3562 = vmatmul.mubr.bf16.gmra.mxu1 %v9096_v40  ;;  %v2887_v27 = vpop.f32.mrf.mxu1  ;;  %v9410_v36 = vpop.f32.mrf.mxu0  ;;  %v10777_v40 = vsub.s32 2, %v9139_v39  ;;  %v10778_v43 = vsub.s32 3, %v9139_v39 }
 0x247   :  { %3571 = vmatprep.mubr.bf16.mxu1 %v9102_v15  ;;  %v9414_v59 = vpack.c.bf16 %v3649_v24, %v3643_v25  ;;  %v2888_v30 = vadd.f32 %v2887_v27, %v9268_v60  ;;  %v3654_v15 = vmax.f32 %v2886_v53, 0.0  ;;  %v2676_v60 = vadd.f32 %v9291_v48, %v9160_v29  ;;  %v10819_v25 = vld [vmem:[#allocation12_spill] sm:$0xff]  ;;  %v10822_v48 = vld [vmem:[#allocation17_spill] sm:$0xff] }
 0x248   :  { %v2889_v35 = vpop.f32.mrf.mxu1  ;;  %v9416_v14 = vpop.f32.mrf.mxu0  ;;  %v2787_v10 = vadd.f32 %v9287_v19, %v2674_v32  ;;  %v9438_v53 = vrot.slane %v10820_v54, %v10777_v40 }
 0x249   :  { %v2890_v61 = vadd.f32 %v2889_v35, %v9275_v9  ;;  %v3655_v56 = vmax.f32 %v2888_v30, 0.0  ;;  %v2789_v30 = vadd.f32 %v10822_v48, %v2676_v60  ;;  %v10826_v60 = vld [vmem:[#allocation19_spill] sm:$0xff] }
 0x24a   :  { %v2891_v37 = vpop.f32.mrf.mxu1  ;;  %v9422_v42 = vpop.f32.mrf.mxu0 }
 0x24b   :  { %v3660_v4 = vmax.f32 %v2890_v61, 0.0  ;;  %v2892_v45 = vadd.f32 %v2891_v37, %v2779_v28  ;;  %v10821_v28 = vmov 0   ;;  %v9447_v37 = vrot.slane %v10820_v54, %v10778_v43 }
 0x24c   :  { %v2895_v7 = vpop.f32.mrf.mxu1  ;;  %v9427_v12 = vpop.f32.mrf.mxu0 }
 0x24d   :  { %v3714_v9 = vpack.c.bf16 %v3660_v4, %v3654_v15  ;;  %v3661_v34 = vmax.f32 %v2892_v45, 0.0  ;;  %v10823_v15 = vld [vmem:[#allocation16_spill] sm:$0xff]  ;;  %v10824_v4 = vld [vmem:[#allocation15_spill] sm:$0xff]  ;;  %v2941_v48 = vadd.f32 %v10826_v60, %v9447_v37 }
 0x24e   :  { %3572 = vmatmul.mubr.bf16.gmra.mxu1 %v10819_v25  ;;  %v2897_v24 = vpop.f32.mrf.mxu1  ;;  %v9432_v27 = vpop.f32.mrf.mxu0  ;;  %v2896_v45 = vadd.f32 %v2895_v7, %v10824_v4  ;;  %v2943_v7 = vadd.f32 %v9303_v52, %v9438_v53 }
 0x24f   :  { %v3715_v35 = vpack.c.bf16 %v3661_v34, %v3655_v56  ;;  %3871 = vmatprep.mubr.bf16.mxu1 %v10821_v28  ;;  %v2898_v19 = vadd.f32 %v2897_v24, %v10823_v15  ;;  %v10825_v56 = vld [vmem:[#allocation18_spill] sm:$0xff] }
 0x250   :  { %v2899_v61 = vpop.f32.mrf.mxu1  ;;  %v9441_v29 = vpop.f32.mrf.mxu0  ;;  %v2939_v34 = vadd.f32 %v10825_v56, %v9438_v53  ;;  %v3666_v24 = vmax.f32 %v2896_v45, 0.0 }
 0x251   :  { %v2900_v32 = vadd.f32 %v2899_v61, %v2787_v10  ;;  %v3667_v50 = vmax.f32 %v2898_v19, 0.0 }
 0x252   :  { %v2901_v25 = vpop.f32.mrf.mxu1  ;;  %v9451_v40 = vpop.f32.mrf.mxu0 }
 0x253   :  { %v2902_v44 = vadd.f32 %v2901_v25, %v2789_v30  ;;  %v3672_v38 = vmax.f32 %v2900_v32, 0.0 }
 0x254   :  { %v3051_v26 = vpop.f32.mrf.mxu1 }
 0x255   :  { %v3673_v54 = vmax.f32 %v2902_v44, 0.0  ;;  %v3052_v43 = vadd.f32 %v3051_v26, %v2939_v34  ;;  %v3164_v20 = vpop.f32.mrf.mxu0  ;;  %v3720_v56 = vpack.c.bf16 %v3672_v38, %v3666_v24  ;;  %v2949_v44 = vadd.f32 %v9309_v23, %v9438_v53 }
 0x256   :  { %v3053_v10 = vpop.f32.mrf.mxu1  ;;  %v2951_v38 = vadd.f32 %v9315_v0, %v9447_v37 }
 0x257   :  { %v3165_v61 = vadd.f32 %v3164_v20, %v3052_v43  ;;  %v3054_v15 = vadd.f32 %v3053_v10, %v2941_v48  ;;  %v3166_v4 = vpop.f32.mrf.mxu0  ;;  %v3721_v31 = vpack.c.bf16 %v3673_v54, %v3667_v50 }
 0x258   :  { %v3055_v30 = vpop.f32.mrf.mxu1 }
 0x259   :  { %v9459_v32 = vadd.f32 %v3166_v4, %v3054_v15  ;;  %v3056_v25 = vadd.f32 %v3055_v30, %v2943_v7  ;;  %v3168_v17 = vpop.f32.mrf.mxu0  ;;  %3726 = vmatprep.subr.bf16.mxu0 %v3721_v31  ;;  %v3584_v50 = vmax.f32 %v3165_v61, 0.0  ;;  %v2953_v31 = vadd.f32 %v9321_v33, %v9438_v53 }
 0x25a   :  { %v9461_v19 = vpop.f32.mrf.mxu1  ;;  %3727 = vmatpush1.bf16.msra.mxu0 %v3720_v56 }
 0x25b   :  { %v3169_v26 = vadd.f32 %v3168_v17, %v3056_v25  ;;  %v9465_v45 = vpop.f32.mrf.mxu0  ;;  %3728 = vmatprep.subr.bf16.mxu0 %v3715_v35 }
 0x25c   :  { %v3061_v52 = vpop.f32.mrf.mxu1 }
 0x25d   :  { %v3590_v20 = vmax.f32 %v3169_v26, 0.0  ;;  %v3062_v43 = vadd.f32 %v3061_v52, %v2949_v44  ;;  %v3174_v34 = vpop.f32.mrf.mxu0 }
 0x25e   :  { %v3063_v60 = vpop.f32.mrf.mxu1  ;;  %3729 = vmatpush1.bf16.msra.mxu0 %v3714_v9  ;;  %v2959_v9 = vadd.f32 %v9327_v22, %v9438_v53 }
 0x25f   :  { %v9471_v48 = vpack.c.bf16 %v3590_v20, %v3584_v50  ;;  %v3175_v23 = vadd.f32 %v3174_v34, %v3062_v43  ;;  %v3064_v17 = vadd.f32 %v3063_v60, %v2951_v38  ;;  %v3176_v54 = vpop.f32.mrf.mxu0  ;;  %3730 = vmatprep.subr.bf16.mxu0 %v9414_v59 }
 0x260   :  { %v3065_v35 = vpop.f32.mrf.mxu1 }
 0x261   :  { %v9474_v24 = vadd.f32 %v3176_v54, %v3064_v17  ;;  %v3066_v0 = vadd.f32 %v3065_v35, %v2953_v31  ;;  %v3178_v10 = vpop.f32.mrf.mxu0  ;;  %v3596_v4 = vmax.f32 %v3175_v23, 0.0 }
 0x262   :  { %v9476_v7 = vpop.f32.mrf.mxu1  ;;  %3731 = vmatpush1.bf16.msra.mxu0 %v9407_v2  ;;  %v2963_v2 = vadd.f32 %v9338_v21, %v9438_v53 }
 0x263   :  { %v3179_v33 = vadd.f32 %v3178_v10, %v3066_v0  ;;  %v9481_v61 = vpop.f32.mrf.mxu0  ;;  %3732 = vmatprep.subr.bf16.mxu0 %v9394_v8 }
 0x264   :  { %v3071_v15 = vpop.f32.mrf.mxu1 }
 0x265   :  { %v3602_v59 = vmax.f32 %v3179_v33, 0.0  ;;  %v3072_v56 = vadd.f32 %v3071_v15, %v2959_v9  ;;  %v3184_v30 = vpop.f32.mrf.mxu0 }
 0x266   :  { %v9484_v25 = vpop.f32.mrf.mxu1  ;;  %3733 = vmatpush1.bf16.msra.mxu0 %v9387_v16  ;;  %v2969_v16 = vadd.f32 %v9345_v49, %v9438_v53 }
 0x267   :  { %v9489_v44 = vpack.c.bf16 %v3602_v59, %v3596_v4  ;;  %v3185_v22 = vadd.f32 %v3184_v30, %v3072_v56  ;;  %v9491_v26 = vpop.f32.mrf.mxu0  ;;  %3734 = vmatprep.subr.bf16.mxu0 %v9374_v6 }
 0x268   :  { %v3075_v8 = vpop.f32.mrf.mxu1 }
 0x269   :  { %v3076_v52 = vadd.f32 %v3075_v8, %v2963_v2  ;;  %v3188_v38 = vpop.f32.mrf.mxu0  ;;  %v3608_v34 = vmax.f32 %v3185_v22, 0.0 }
 0x26a   :  { %v9494_v50 = vpop.f32.mrf.mxu1  ;;  %3735 = vmatpush1.bf16.msra.mxu0 %v9367_v41  ;;  %v2973_v41 = vadd.f32 %v9356_v55, %v9438_v53 }
 0x26b   :  { %v3189_v20 = vadd.f32 %v3188_v38, %v3076_v52  ;;  %v9499_v43 = vpop.f32.mrf.mxu0  ;;  %3736 = vmatprep.subr.bf16.mxu0 %v9354_v47  ;;  %v9529_v52 = vld [vmem:[#allocation2] sm:$0xff]  }
 0x26c   :  { %v3081_v21 = vpop.f32.mrf.mxu1  ;;  %10827 = vst [vmem:[#allocation12_spill] sm:$0xff] %v9529_v52 }
 0x26d   :  { %v3614_v60 = vmax.f32 %v3189_v20, 0.0  ;;  %v3082_v31 = vadd.f32 %v3081_v21, %v2969_v16  ;;  %v3194_v6 = vpop.f32.mrf.mxu0 }
 0x26e   :  { %v9502_v23 = vpop.f32.mrf.mxu1  ;;  %3737 = vmatpush1.bf16.msra.mxu0 %v9347_v1  ;;  %v2979_v1 = vadd.f32 %v9363_v5, %v9438_v53 }
 0x26f   :  { %v9507_v17 = vpack.c.bf16 %v3614_v60, %v3608_v34  ;;  %v9509_v49 = vpop.f32.mrf.mxu0  ;;  %3738 = vmatprep.subr.bf16.mxu0 %v9336_v63  ;;  %v3195_v47 = vadd.f32 %v3194_v6, %v3082_v31 }
 0x270   :  { %v3085_v54 = vpop.f32.mrf.mxu1 }
 0x271   :  { %v3086_v35 = vadd.f32 %v3085_v54, %v2973_v41  ;;  %v3198_v0 = vpop.f32.mrf.mxu0  ;;  %v3620_v15 = vmax.f32 %v3195_v47, 0.0  ;;  %v2993_v41 = vadd.f32 %v9396_v11, %v9438_v53 }
 0x272   :  { %v9512_v10 = vpop.f32.mrf.mxu1  ;;  %3739 = vmatpush1.bf16.msra.mxu0 %v9329_v62  ;;  %v2983_v62 = vadd.f32 %v9376_v46, %v9438_v53 }
 0x273   :  { %v3199_v9 = vadd.f32 %v3198_v0, %v3086_v35  ;;  %v9517_v33 = vpop.f32.mrf.mxu0  ;;  %3740 = vmatprep.subr.bf16.mxu0 %v9319_v57 }
 0x274   :  { %v3091_v55 = vpop.f32.mrf.mxu1 }
 0x275   :  { %v3626_v4 = vmax.f32 %v3199_v9, 0.0  ;;  %v3092_v63 = vadd.f32 %v3091_v55, %v2979_v1  ;;  %v3204_v59 = vpop.f32.mrf.mxu0  ;;  %v9547_v9 = vld [vmem:[#allocation2 + $0x8] sm:$0xff]  }
 0x276   :  { %v9520_v56 = vpop.f32.mrf.mxu1  ;;  %3741 = vmatpush1.bf16.msra.mxu0 %v9311_v13  ;;  %v2989_v13 = vadd.f32 %v9383_v18, %v9438_v53  ;;  %10828 = vst [vmem:[#allocation14_spill] sm:$0xff] %v9547_v9 }
 0x277   :  { %v9525_v30 = vpack.c.bf16 %v3626_v4, %v3620_v15  ;;  %v9527_v5 = vpop.f32.mrf.mxu0  ;;  %v3205_v22 = vadd.f32 %v3204_v59, %v3092_v63  ;;  %v2999_v15 = vadd.f32 %v9403_v3, %v9438_v53  ;;  %v9559_v3 = vld [vmem:[#allocation2 + $0x10] sm:$0xff]  }
 0x278   :  { %v3095_v2 = vpop.f32.mrf.mxu1  ;;  %10829 = vst [vmem:[#allocation17_spill] sm:$0xff] %v9559_v3 }
 0x279   :  { %v3096_v8 = vadd.f32 %v3095_v2, %v2983_v62  ;;  %v3208_v57 = vpop.f32.mrf.mxu0  ;;  %3759 = vmatmul.mubr.bf16.vlgmr.msra.gmra.mxu0 %v9529_v52  ;;  %v3632_v21 = vmax.f32 %v3205_v22, 0.0 }
 0x27a   :  { %v9532_v38 = vpop.f32.mrf.mxu1  ;;  %3768 = vmatprep.mubr.bf16.mxu0 %v10821_v28 }
 0x27b   :  { %v3209_v46 = vadd.f32 %v3208_v57, %v3096_v8  ;;  %v9537_v16 = vpop.f32.mrf.mxu0  ;;  %v3003_v57 = vadd.f32 %v9416_v14, %v9438_v53  ;;  %v3005_v14 = vadd.f32 %v9422_v42, %v9447_v37 }
 0x27c   :  { %v3101_v20 = vpop.f32.mrf.mxu1 }
 0x27d   :  { %v3638_v34 = vmax.f32 %v3209_v46, 0.0  ;;  %v3102_v60 = vadd.f32 %v3101_v20, %v2989_v13  ;;  %v3214_v31 = vpop.f32.mrf.mxu0 }
 0x27e   :  { %v9539_v6 = vpop.f32.mrf.mxu1 }
 0x27f   :  { %v9543_v54 = vpack.c.bf16 %v3638_v34, %v3632_v21  ;;  %v9545_v47 = vpop.f32.mrf.mxu0  ;;  %v3215_v0 = vadd.f32 %v3214_v31, %v3102_v60 }
 0x280   :  { %v3105_v35 = vpop.f32.mrf.mxu1 }
 0x281   :  { %v3106_v18 = vadd.f32 %v3105_v35, %v2993_v41  ;;  %v3218_v1 = vpop.f32.mrf.mxu0  ;;  %3769 = vmatmul.mubr.bf16.gmra.mxu0 %v9547_v9  ;;  %v3644_v59 = vmax.f32 %v3215_v0, 0.0  ;;  %v9581_v9 = vld [vmem:[#allocation2 + $0x18] sm:$0xff]  }
 0x282   :  { %v3107_v55 = vpop.f32.mrf.mxu1  ;;  %3778 = vmatprep.mubr.bf16.mxu0 %v10821_v28  ;;  %10830 = vst [vmem:[#allocation16_spill] sm:$0xff] %v9581_v9 }
 0x283   :  { %v3219_v4 = vadd.f32 %v3218_v1, %v3106_v18  ;;  %v9553_v11 = vpop.f32.mrf.mxu0  ;;  %v3011_v18 = vadd.f32 %v9432_v27, %v9447_v37 }
 0x284   :  { %v3111_v63 = vpop.f32.mrf.mxu1 }
 0x285   :  { %v3650_v62 = vmax.f32 %v3219_v4, 0.0  ;;  %v3112_v2 = vadd.f32 %v3111_v63, %v2999_v15  ;;  %v3224_v22 = vpop.f32.mrf.mxu0  ;;  %v3001_v63 = vadd.f32 %v9410_v36, %v9447_v37  ;;  %v10783_v36 = vsub.s32 5, %v9139_v39 }
 0x286   :  { %v3113_v8 = vpop.f32.mrf.mxu1 }
 0x287   :  { %v9557_v13 = vpack.c.bf16 %v3650_v62, %v3644_v59  ;;  %v3226_v46 = vpop.f32.mrf.mxu0  ;;  %v3225_v21 = vadd.f32 %v3224_v22, %v3112_v2  ;;  %v3009_v59 = vadd.f32 %v9427_v12, %v9438_v53  ;;  %v3013_v22 = vadd.f32 %v9441_v29, %v9438_v53 }
 0x288   :  { %v3115_v20 = vpop.f32.mrf.mxu1  ;;  %v3015_v12 = vadd.f32 %v9451_v40, %v9447_v37  ;;  %v2991_v53 = vadd.f32 %v9390_v51, %v9447_v37 }
 0x289   :  { %v3116_v34 = vadd.f32 %v3115_v20, %v3003_v57  ;;  %v3228_v60 = vpop.f32.mrf.mxu0  ;;  %3779 = vmatmul.mubr.bf16.gmra.mxu0 %v9559_v3  ;;  %v3656_v1 = vmax.f32 %v3225_v21, 0.0  ;;  %v2995_v21 = vadd.f32 %v9401_v58, %v9447_v37  ;;  %v8595_v58 = vld [vmem:[%s10766_s3] sm:$0x3f] }
 0x28a   :  { %v3117_v31 = vpop.f32.mrf.mxu1  ;;  %3788 = vmatprep.mubr.bf16.mxu0 %v10821_v28 }
 0x28b   :  { %v3229_v41 = vadd.f32 %v3228_v60, %v3116_v34  ;;  %v3230_v35 = vpop.f32.mrf.mxu0  ;;  %v3118_v42 = vadd.f32 %v3117_v31, %v3005_v14  ;;  %v3108_v29 = vadd.f32 %v3107_v55, %v2995_v21 }
 0x28c   :  { %v3121_v0 = vpop.f32.mrf.mxu1 }
 0x28d   :  { %v3662_v15 = vmax.f32 %v3229_v41, 0.0  ;;  %v3234_v4 = vpop.f32.mrf.mxu0  ;;  %v3122_v34 = vadd.f32 %v3121_v0, %v3009_v59  ;;  %v3114_v41 = vadd.f32 %v3113_v8, %v3001_v63  ;;  %v10831_v0 = vsub.s32 4, %v9139_v39  ;;  %v10832_v63 = vld [vmem:[#allocation27_spill] sm:$0xff] }
 0x28e   :  { %v3123_v62 = vpop.f32.mrf.mxu1  ;;  %v3231_v40 = vadd.f32 %v3230_v35, %v3118_v42  ;;  %v2985_v51 = vadd.f32 %v10832_v63, %v9447_v37  ;;  %v9598_v59 = vrot.slane %v8595_v58, %v10783_v36 }
 0x28f   :  { %v9574_v57 = vpack.c.bf16 %v3662_v15, %v3656_v1  ;;  %v3124_v20 = vadd.f32 %v3123_v62, %v3011_v18  ;;  %v3236_v27 = vpop.f32.mrf.mxu0  ;;  %v9591_v14 = vrot.slane %v8595_v58, %v10831_v0  ;;  %v3235_v55 = vadd.f32 %v3234_v4, %v3122_v34  ;;  %v10833_v0 = vld [vmem:[#allocation26_spill] sm:$0xff] }
 0x290   :  { %v3125_v60 = vpop.f32.mrf.mxu1  ;;  %v3104_v62 = vadd.f32 %v9539_v6, %v2991_v53  ;;  %v2981_v35 = vadd.f32 %v10833_v0, %v9447_v37  ;;  %v3221_v4 = vadd.f32 %v9553_v11, %v3108_v29  ;;  %v10834_v6 = vld [vmem:[#allocation25_spill] sm:$0xff]  ;;  %v9613_v29 = vld [vmem:[#allocation2 + $0x20] sm:$0xff]  }
 0x291   :  { %v3126_v2 = vadd.f32 %v3125_v60, %v3013_v22  ;;  %v3238_v3 = vpop.f32.mrf.mxu0  ;;  %3789 = vmatmul.mubr.bf16.gmra.mxu0 %v9581_v9  ;;  %v3237_v8 = vadd.f32 %v3236_v27, %v3124_v20  ;;  %v3227_v22 = vadd.f32 %v3226_v46, %v3114_v41  ;;  %v3663_v27 = vmax.f32 %v3231_v40, 0.0  ;;  %10835 = vst [vmem:[#allocation15_spill] sm:$0xff] %v9613_v29  ;;  %v10836_v40 = vld [vmem:[#allocation24_spill] sm:$0xff] }
 0x292   :  { %v3127_v31 = vpop.f32.mrf.mxu1  ;;  %3798 = vmatprep.mubr.bf16.mxu0 %v10821_v28  ;;  %v2975_v46 = vadd.f32 %v10834_v6, %v9447_v37  ;;  %v3668_v41 = vmax.f32 %v3235_v55, 0.0 }
 0x293   :  { %v3239_v18 = vadd.f32 %v3238_v3, %v3126_v2  ;;  %v3128_v1 = vadd.f32 %v3127_v31, %v3015_v12  ;;  %v3240_v15 = vpop.f32.mrf.mxu0  ;;  %v3098_v3 = vadd.f32 %v9532_v38, %v2985_v51  ;;  %v3669_v34 = vmax.f32 %v3237_v8, 0.0 }
 0x294   :  { %v3094_v38 = vadd.f32 %v9520_v56, %v2981_v35  ;;  %v2971_v8 = vadd.f32 %v10836_v40, %v9447_v37  ;;  %v3088_v56 = vadd.f32 %v9512_v10, %v2975_v46 }
 0x295   :  { %v3241_v21 = vadd.f32 %v3240_v15, %v3128_v1  ;;  %v3277_v60 = vpop.f32.mrf.mxu1  ;;  %v3674_v2 = vmax.f32 %v3239_v18, 0.0  ;;  %v3217_v18 = vadd.f32 %v9545_v47, %v3104_v62  ;;  %v3657_v15 = vmax.f32 %v3227_v22, 0.0 }
 0x296   :  { %v3278_v42 = vadd.f32 %v3277_v60, %v9591_v14  ;;  %v3390_v20 = vpop.f32.mrf.mxu0  ;;  %v3211_v47 = vadd.f32 %v9537_v16, %v3098_v3  ;;  %v3651_v62 = vmax.f32 %v3221_v4, 0.0  ;;  %v10839_v16 = vld [vmem:[#allocation22_spill] sm:$0xff]  ;;  %v3201_v46 = vadd.f32 %v9517_v33, %v3088_v56  ;;  %v9647_v33 = vld [vmem:[#allocation2 + $0x28] sm:$0xff]  }
 0x297   :  { %v3675_v12 = vmax.f32 %v3241_v21, 0.0  ;;  %v3279_v31 = vpop.f32.mrf.mxu1  ;;  %v3722_v51 = vpack.c.bf16 %v3674_v2, %v3668_v41  ;;  %v3717_v0 = vpack.c.bf16 %v3663_v27, %v3657_v15  ;;  %v10838_v2 = vld [vmem:[#allocation23_spill] sm:$0xff]  ;;  %v3645_v10 = vmax.f32 %v3217_v18, 0.0  ;;  %10841 = vst [vmem:[#allocation19_spill] sm:$0xff] %v9647_v33 }
 0x298   :  { %v9608_v53 = vadd.f32 %v3390_v20, %v3278_v42  ;;  %v3280_v58 = vadd.f32 %v3279_v31, %v9598_v59  ;;  %v3392_v1 = vpop.f32.mrf.mxu0  ;;  %v2965_v20 = vadd.f32 %v10838_v2, %v9447_v37  ;;  %v2961_v3 = vadd.f32 %v10839_v16, %v9447_v37 }
 0x299   :  { %v3281_v63 = vpop.f32.mrf.mxu1  ;;  %v3723_v11 = vpack.c.bf16 %v3675_v12, %v3669_v34  ;;  %3799 = vmatmul.mubr.bf16.gmra.mxu0 %v9613_v29  ;;  %v3084_v34 = vadd.f32 %v9502_v23, %v2971_v8  ;;  %v3207_v12 = vadd.f32 %v9527_v5, %v3094_v38  ;;  %v3639_v41 = vmax.f32 %v3211_v47, 0.0  ;;  %v10840_v38 = vld [vmem:[#allocation21_spill] sm:$0xff] }
 0x29a   :  { %v9618_v55 = vadd.f32 %v3392_v1, %v3280_v58  ;;  %v3282_v21 = vadd.f32 %v3281_v63, %v9591_v14  ;;  %v3394_v60 = vpop.f32.mrf.mxu0  ;;  %3808 = vmatprep.mubr.bf16.mxu0 %v10821_v28  ;;  %v3078_v6 = vadd.f32 %v9494_v50, %v2965_v20  ;;  %v3711_v1 = vpack.c.bf16 %v3651_v62, %v3645_v10 }
 0x29b   :  { %v9624_v22 = vpop.f32.mrf.mxu1  ;;  %3839 = vmatprep.subr.bf16.mxu1 %v3723_v11  ;;  %v2955_v18 = vadd.f32 %v10840_v38, %v9447_v37  ;;  %v3074_v63 = vadd.f32 %v9484_v25, %v2961_v3  ;;  %v3197_v11 = vadd.f32 %v9509_v49, %v3084_v34  ;;  %v3633_v50 = vmax.f32 %v3207_v12, 0.0  ;;  %v9693_v38 = vld [vmem:[#allocation2 + $0x38] sm:$0xff]  }
 0x29c   :  { %v9626_v35 = vadd.f32 %v3394_v60, %v3282_v21  ;;  %v9628_v42 = vpop.f32.mrf.mxu0  ;;  %3840 = vmatpush1.bf16.msra.mxu1 %v3722_v51  ;;  %v3191_v25 = vadd.f32 %v9499_v43, %v3078_v6  ;;  %v3627_v60 = vmax.f32 %v3201_v46, 0.0  ;;  %10844 = vst [vmem:[#allocation26_spill] sm:$0xff] %v9693_v38 }
 0x29d   :  { %10837 = vst [vmem:[#allocation18_spill] sm:$0xff] %v9628_v42  ;;  %v3287_v31 = vpop.f32.mrf.mxu1  ;;  %3841 = vmatprep.subr.bf16.mxu1 %v3717_v0  ;;  %v3705_v56 = vpack.c.bf16 %v3639_v41, %v3633_v50  ;;  %v10842_v0 = vld [vmem:[#allocation20_spill] sm:$0xff]  ;;  %v3187_v20 = vadd.f32 %v9491_v26, %v3074_v63  ;;  %v3621_v34 = vmax.f32 %v3197_v11, 0.0 }
 0x29e   :  { %v3288_v4 = vadd.f32 %v3287_v31, %v9591_v14  ;;  %v3400_v27 = vpop.f32.mrf.mxu0  ;;  %v2945_v2 = vadd.f32 %v10842_v0, %v9447_v37  ;;  %v3615_v31 = vmax.f32 %v3191_v25, 0.0 }
 0x29f   :  { %v3289_v58 = vpop.f32.mrf.mxu1  ;;  %v3609_v37 = vmax.f32 %v3187_v20, 0.0 }
 0x2a0   :  { %v9639_v15 = vadd.f32 %v3400_v27, %v3288_v4  ;;  %v3290_v23 = vadd.f32 %v3289_v58, %v9598_v59  ;;  %v3402_v5 = vpop.f32.mrf.mxu0  ;;  %3842 = vmatpush1.bf16.msra.mxu1 %v9574_v57  ;;  %v3068_v57 = vadd.f32 %v9476_v7, %v2955_v18  ;;  %v3058_v43 = vadd.f32 %v9461_v19, %v2945_v2  ;;  %v9676_v27 = vld [vmem:[#allocation2 + $0x30] sm:$0xff]  }
 0x2a1   :  { %v3291_v40 = vpop.f32.mrf.mxu1  ;;  %3843 = vmatprep.subr.bf16.mxu1 %v3711_v1  ;;  %3809 = vmatmul.mubr.bf16.gmra.mxu0 %v9647_v33  ;;  %v3699_v4 = vpack.c.bf16 %v3627_v60, %v3621_v34  ;;  %10843 = vst [vmem:[#allocation27_spill] sm:$0xff] %v9676_v27  ;;  %v3693_v46 = vpack.c.bf16 %v3615_v31, %v3609_v37  ;;  %v10846_v34 = vld [vmem:[#allocation17_spill] sm:$0xff] }
 0x2a2   :  { %v9650_v8 = vadd.f32 %v3402_v5, %v3290_v23  ;;  %v3292_v51 = vadd.f32 %v3291_v40, %v9591_v14  ;;  %v3404_v21 = vpop.f32.mrf.mxu0  ;;  %3818 = vmatprep.mubr.bf16.mxu0 %v10821_v28  ;;  %v3181_v10 = vadd.f32 %v9481_v61, %v3068_v57  ;;  %v3171_v19 = vadd.f32 %v9465_v45, %v3058_v43  ;;  %v10845_v57 = vld [vmem:[#allocation14_spill] sm:$0xff] }
 0x2a3   :  { %v9656_v49 = vpop.f32.mrf.mxu1  ;;  %v3585_v5 = vmax.f32 %v9459_v32, 0.0 }
 0x2a4   :  { %v9658_v47 = vadd.f32 %v3404_v21, %v3292_v51  ;;  %v9660_v62 = vpop.f32.mrf.mxu0  ;;  %3844 = vmatpush1.bf16.msra.mxu1 %v9557_v13  ;;  %v3603_v61 = vmax.f32 %v3181_v10, 0.0  ;;  %v3591_v58 = vmax.f32 %v3171_v19, 0.0 }
 0x2a5   :  { %v3297_v12 = vpop.f32.mrf.mxu1  ;;  %3845 = vmatprep.subr.bf16.mxu1 %v3705_v56 }
 0x2a6   :  { %v3298_v7 = vadd.f32 %v3297_v12, %v9591_v14  ;;  %v3410_v16 = vpop.f32.mrf.mxu0 }
 0x2a7   :  { %v9669_v3 = vpop.f32.mrf.mxu1 }
 0x2a8   :  { %v9671_v13 = vadd.f32 %v3410_v16, %v3298_v7  ;;  %3846 = vmatpush1.bf16.msra.mxu1 %v9543_v54  ;;  %v3597_v54 = vmax.f32 %v9474_v24, 0.0  ;;  %v9707_v63 = vpop.f32.mrf.mxu0 }
 0x2a9   :  { %v9674_v26 = vpop.f32.mrf.mxu1  ;;  %3847 = vmatprep.subr.bf16.mxu1 %v3699_v4  ;;  %3819 = vmatmul.mubr.bf16.gmra.mxu0 %v9676_v27 }
 0x2aa   :  { %3828 = vmatprep.mubr.bf16.mxu0 %v10821_v28  ;;  %v3687_v23 = vpack.c.bf16 %v3603_v61, %v3597_v54 }
 0x2ab   :  { %v9681_v6 = vpop.f32.mrf.mxu1 }
 0x2ac   :  { %3848 = vmatpush1.bf16.msra.mxu1 %v9525_v30  ;;  %v3681_v30 = vpack.c.bf16 %v3591_v58, %v3585_v5 }
 0x2ad   :  { %v9685_v41 = vpop.f32.mrf.mxu1  ;;  %3849 = vmatprep.subr.bf16.mxu1 %v3693_v46 }
 0x2af   :  { %v9687_v1 = vpop.f32.mrf.mxu1 }
 0x2b0   :  { %3850 = vmatpush1.bf16.msra.mxu1 %v9507_v17 }
 0x2b1   :  { %v9691_v45 = vpop.f32.mrf.mxu1  ;;  %3851 = vmatprep.subr.bf16.mxu1 %v3687_v23  ;;  %3829 = vmatmul.mubr.bf16.gmra.mxu0 %v9693_v38 }
 0x2b2   :  { %3984 = vmatprep.mubr.bf16.mxu0 %v10821_v28 }
 0x2b3   :  { %v9697_v24 = vpop.f32.mrf.mxu1 }
 0x2b4   :  { %3852 = vmatpush1.bf16.msra.mxu1 %v9489_v44  ;;  %v3414_v44 = vpop.f32.mrf.mxu0 }
 0x2b5   :  { %v9700_v18 = vpop.f32.mrf.mxu1  ;;  %3853 = vmatprep.subr.bf16.mxu1 %v3681_v30 }
 0x2b6   :  { %v9719_v21 = vpop.f32.mrf.mxu0 }
 0x2b7   :  { %v9702_v17 = vpop.f32.mrf.mxu1 }
 0x2b8   :  { %3854 = vmatpush1.bf16.msra.mxu1 %v9471_v48  ;;  %v3420_v60 = vpop.f32.mrf.mxu0 }
 0x2b9   :  { %v9705_v32 = vpop.f32.mrf.mxu1 }
 0x2ba   :  { %v9731_v2 = vpop.f32.mrf.mxu0 }
 0x2bb   :  { %v9709_v11 = vpop.f32.mrf.mxu1  ;;  %3872 = vmatmul.mubr.bf16.vlgmr.msra.gmra.mxu1 %v9529_v52 }
 0x2bc   :  { %3881 = vmatprep.mubr.bf16.mxu1 %v10821_v28  ;;  %v3424_v7 = vpop.f32.mrf.mxu0 }
 0x2bd   :  { %v9713_v50 = vpop.f32.mrf.mxu1 }
 0x2be   :  { %v9743_v31 = vpop.f32.mrf.mxu0 }
 0x2bf   :  { %v9715_v40 = vpop.f32.mrf.mxu1 }
 0x2c0   :  { %v9749_v4 = vpop.f32.mrf.mxu0 }
 0x2c1   :  { %v9717_v51 = vpop.f32.mrf.mxu1 }
 0x2c2   :  { %v9755_v54 = vpop.f32.mrf.mxu0 }
 0x2c3   :  { %v9721_v48 = vpop.f32.mrf.mxu1  ;;  %3882 = vmatmul.mubr.bf16.gmra.mxu1 %v10845_v57  ;;  %v3308_v57 = vadd.f32 %v9685_v41, %v9591_v14 }
 0x2c4   :  { %3891 = vmatprep.mubr.bf16.mxu1 %v10821_v28  ;;  %v3434_v39 = vpop.f32.mrf.mxu0 }
 0x2c5   :  { %v9725_v25 = vpop.f32.mrf.mxu1 }
 0x2c7   :  { %v9727_v56 = vpop.f32.mrf.mxu1 }
 0x2c9   :  { %v9729_v0 = vpop.f32.mrf.mxu1 }
 0x2cb   :  { %v9733_v20 = vpop.f32.mrf.mxu1  ;;  %3892 = vmatmul.mubr.bf16.gmra.mxu1 %v10846_v34  ;;  %v9768_v34 = vpop.f32.mrf.mxu0 }
 0x2cc   :  { %3901 = vmatprep.mubr.bf16.mxu1 %v10821_v28 }
 0x2cd   :  { %v9737_v12 = vpop.f32.mrf.mxu1 }
 0x2cf   :  { %v9739_v43 = vpop.f32.mrf.mxu1 }
 0x2d1   :  { %v9741_v10 = vpop.f32.mrf.mxu1 }
 0x2d3   :  { %v9745_v16 = vpop.f32.mrf.mxu1  ;;  %3902 = vmatmul.mubr.bf16.gmra.mxu1 %v9581_v9 }
 0x2d4   :  { %3911 = vmatprep.mubr.bf16.mxu1 %v10821_v28 }
 0x2d6   :  { %v3503_v37 = vpop.f32.mrf.mxu1 }
 0x2d7   :  { %v3504_v19 = vadd.f32 %v3503_v37, %v9608_v53 }
 0x2d8   :  { %v3505_v61 = vpop.f32.mrf.mxu1 }
 0x2d9   :  { %v9753_v46 = vadd.f32 %v3505_v61, %v9618_v55  ;;  %v3586_v30 = vmax.f32 %v3504_v19, 0.0 }
 0x2da   :  { %v3507_v58 = vpop.f32.mrf.mxu1 }
 0x2db   :  { %10847 = vst [vmem:[#allocation25_spill] sm:$0xff] %v9753_v46  ;;  %v3508_v23 = vadd.f32 %v3507_v58, %v9626_v35  ;;  %3912 = vmatmul.mubr.bf16.gmra.mxu1 %v9613_v29 }
 0x2dc   :  { %v9759_v5 = vpop.f32.mrf.mxu1  ;;  %3921 = vmatprep.mubr.bf16.mxu1 %v10821_v28 }
 0x2dd   :  { %10848 = vst [vmem:[#allocation24_spill] sm:$0xff] %v9759_v5  ;;  %v3592_v36 = vmax.f32 %v3508_v23, 0.0  ;;  %v8249_v5 = vld [vmem:[#allocation7] ss:$24 sps:$4 sm:$0xff]  }
 0x2de   :  { %v3513_v9 = vpop.f32.mrf.mxu1 }
 0x2df   :  { %v9762_v53 = vpack.c.bf16 %v3592_v36, %v3586_v30  ;;  %v3514_v55 = vadd.f32 %v3513_v9, %v9639_v15  ;;  %v3302_v36 = vadd.f32 %v9674_v26, %v9591_v14  ;;  %v3440_v15 = vpop.f32.mrf.mxu0 }
 0x2e0   :  { %v3515_v37 = vpop.f32.mrf.mxu1 }
 0x2e1   :  { %10849 = vst [vmem:[#allocation23_spill] sm:$0xff] %v9762_v53  ;;  %v9766_v61 = vadd.f32 %v3515_v37, %v9650_v8  ;;  %v3598_v19 = vmax.f32 %v3514_v55, 0.0  ;;  %v3312_v55 = vadd.f32 %v9691_v45, %v9591_v14 }
 0x2e2   :  { %v3517_v35 = vpop.f32.mrf.mxu1 }
 0x2e3   :  { %10850 = vst [vmem:[#allocation22_spill] sm:$0xff] %v9766_v61  ;;  %v3518_v58 = vadd.f32 %v3517_v35, %v9658_v47  ;;  %3922 = vmatmul.mubr.bf16.gmra.mxu1 %v9647_v33  ;;  %v3415_v47 = vadd.f32 %v3414_v44, %v3302_v36  ;;  %v9782_v35 = vpop.f32.mrf.mxu0  ;;  %v3421_v36 = vadd.f32 %v3420_v60, %v3308_v57  ;;  %v8239_v61 = vld [vmem:[#allocation7 + $0x64] ss:$24 sps:$4 sm:$0xff]  }
 0x2e4   :  { %v9772_v29 = vpop.f32.mrf.mxu1  ;;  %3931 = vmatprep.mubr.bf16.mxu1 %v10821_v28  ;;  %v3425_v41 = vadd.f32 %v3424_v7, %v3312_v55  ;;  %v8209_v7 = vld [vmem:[#allocation7 + $0x154] ss:$24 sps:$4 sm:$0xff]  }
 0x2e5   :  { %v3604_v9 = vmax.f32 %v3518_v58, 0.0  ;;  %5873 = vmatprep.subr.bf16.mxu1 %v8209_v7 }
 0x2e6   :  { %v3523_v23 = vpop.f32.mrf.mxu1 }
 0x2e7   :  { %v9777_v8 = vpack.c.bf16 %v3604_v9, %v3598_v19  ;;  %v3524_v30 = vadd.f32 %v3523_v23, %v9671_v13  ;;  %v3444_v19 = vpop.f32.mrf.mxu0 }
 0x2e8   :  { %v9780_v37 = vpop.f32.mrf.mxu1 }
 0x2e9   :  { %10851 = vst [vmem:[#allocation21_spill] sm:$0xff] %v9777_v8  ;;  %v3610_v13 = vmax.f32 %v3524_v30, 0.0  ;;  %v8213_v8 = vld [vmem:[#allocation7 + $0x120] ss:$24 sps:$4 sm:$0xff]  }
 0x2ea   :  { %v3527_v33 = vpop.f32.mrf.mxu1 }
 0x2eb   :  { %v3528_v52 = vadd.f32 %v3527_v33, %v3415_v47  ;;  %3932 = vmatmul.mubr.bf16.gmra.mxu1 %v9676_v27  ;;  %v9796_v47 = vpop.f32.mrf.mxu0 }
 0x2ec   :  { %v9787_v26 = vpop.f32.mrf.mxu1  ;;  %3941 = vmatprep.mubr.bf16.mxu1 %v10821_v28  ;;  %v3318_v28 = vadd.f32 %v9700_v18, %v9591_v14 }
 0x2ed   :  { %v3616_v58 = vmax.f32 %v3528_v52, 0.0  ;;  %v3322_v52 = vadd.f32 %v9705_v32, %v9591_v14  ;;  %v3450_v30 = vpop.f32.mrf.mxu0  ;;  %v8215_v32 = vld [vmem:[#allocation7 + $0x124] ss:$24 sps:$4 sm:$0xff]  }
 0x2ee   :  { %v3533_v44 = vpop.f32.mrf.mxu1  ;;  %v3431_v55 = vadd.f32 %v9749_v4, %v3318_v28  ;;  %v3332_v28 = vadd.f32 %v9717_v51, %v9591_v14  ;;  %v3338_v51 = vadd.f32 %v9725_v25, %v9591_v14 }
 0x2ef   :  { %v9792_v9 = vpack.c.bf16 %v3616_v58, %v3610_v13  ;;  %v3534_v33 = vadd.f32 %v3533_v44, %v3421_v36  ;;  %v8207_v44 = vld [vmem:[#allocation7 + $0x150] ss:$24 sps:$4 sm:$0xff]  }
 0x2f0   :  { %v9794_v23 = vpop.f32.mrf.mxu1  ;;  %5874 = vmatpush1.bf16.msra.mxu1 %v8207_v44 }
 0x2f1   :  { %10852 = vst [vmem:[#allocation20_spill] sm:$0xff] %v9792_v9  ;;  %v3622_v57 = vmax.f32 %v3534_v33, 0.0  ;;  %5875 = vmatprep.subr.bf16.mxu1 %v8215_v32  ;;  %v8227_v9 = vld [vmem:[#allocation7 + $0xc4] ss:$24 sps:$4 sm:$0xff]  }
 0x2f2   :  { %v3537_v27 = vpop.f32.mrf.mxu1 }
 0x2f3   :  { %v3538_v53 = vadd.f32 %v3537_v27, %v3425_v41  ;;  %3942 = vmatmul.mubr.bf16.gmra.mxu1 %v9693_v38  ;;  %v3435_v27 = vadd.f32 %v3434_v39, %v3322_v52  ;;  %v9810_v41 = vpop.f32.mrf.mxu0 }
 0x2f4   :  { %v9801_v45 = vpop.f32.mrf.mxu1  ;;  %5876 = vmatpush1.bf16.msra.mxu1 %v8213_v8 }
 0x2f5   :  { %v3628_v60 = vmax.f32 %v3538_v53, 0.0  ;;  %v3328_v53 = vadd.f32 %v9713_v50, %v9591_v14  ;;  %v3454_v39 = vpop.f32.mrf.mxu0 }
 0x2f6   :  { %v3543_v13 = vpop.f32.mrf.mxu1 }
 0x2f7   :  { %v9806_v58 = vpack.c.bf16 %v3628_v60, %v3622_v57  ;;  %v3544_v18 = vadd.f32 %v3543_v13, %v3431_v55  ;;  %v8221_v60 = vld [vmem:[#allocation7 + $0xf4] ss:$24 sps:$4 sm:$0xff]   ;;  %v3441_v13 = vadd.f32 %v3440_v15, %v3328_v53  ;;  %v8219_v55 = vld [vmem:[#allocation7 + $0xf0] ss:$24 sps:$4 sm:$0xff]   ;;  %v3342_v15 = vadd.f32 %v9729_v0, %v9591_v14  ;;  %v8237_v0 = vld [vmem:[#allocation7 + $0x60] ss:$24 sps:$4 sm:$0xff]  }
 0x2f8   :  { %v9808_v36 = vpop.f32.mrf.mxu1  ;;  %5877 = vmatprep.subr.bf16.mxu1 %v8221_v60 }
 0x2f9   :  { %10853 = vst [vmem:[#allocation28_spill] sm:$0xff] %v9806_v58  ;;  %v3634_v4 = vmax.f32 %v3544_v18, 0.0  ;;  %5878 = vmatpush1.bf16.msra.mxu1 %v8219_v55  ;;  %v8225_v18 = vld [vmem:[#allocation7 + $0xc0] ss:$24 sps:$4 sm:$0xff]   ;;  %v3455_v25 = vadd.f32 %v3454_v39, %v3342_v15  ;;  %v3340_v15 = vadd.f32 %v9727_v56, %v9598_v59 }
 0x2fa   :  { %v3547_v38 = vpop.f32.mrf.mxu1  ;;  %5879 = vmatprep.subr.bf16.mxu1 %v8227_v9 }
 0x2fb   :  { %v3548_v33 = vadd.f32 %v3547_v38, %v3435_v27  ;;  %v3445_v38 = vadd.f32 %v3444_v19, %v3332_v28  ;;  %v3456_v27 = vpop.f32.mrf.mxu0 }
 0x2fc   :  { %v9814_v46 = vpop.f32.mrf.mxu1 }
 0x2fd   :  { %v3640_v57 = vmax.f32 %v3548_v33, 0.0  ;;  %5880 = vmatpush1.bf16.msra.mxu1 %v8225_v18  ;;  %v3460_v19 = vpop.f32.mrf.mxu0 }
 0x2fe   :  { %v3553_v52 = vpop.f32.mrf.mxu1 }
 0x2ff   :  { %v9818_v7 = vpack.c.bf16 %v3640_v57, %v3634_v4  ;;  %v3554_v50 = vadd.f32 %v3553_v52, %v3441_v13  ;;  %v8233_v57 = vld [vmem:[#allocation7 + $0x94] ss:$24 sps:$4 sm:$0xff]   ;;  %v3451_v52 = vadd.f32 %v3450_v30, %v3338_v51  ;;  %v8231_v13 = vld [vmem:[#allocation7 + $0x90] ss:$24 sps:$4 sm:$0xff]   ;;  %v3350_v30 = vadd.f32 %v9739_v43, %v9598_v59 }
 0x300   :  { %v9820_v44 = vpop.f32.mrf.mxu1  ;;  %5881 = vmatprep.subr.bf16.mxu1 %v8233_v57  ;;  %v3352_v51 = vadd.f32 %v9741_v10, %v9591_v14  ;;  %v8243_v43 = vld [vmem:[#allocation7 + $0x30] ss:$24 sps:$4 sm:$0xff]   ;;  %v3334_v10 = vadd.f32 %v9721_v48, %v9598_v59 }
 0x301   :  { %v3646_v53 = vmax.f32 %v3554_v50, 0.0  ;;  %5882 = vmatpush1.bf16.msra.mxu1 %v8231_v13  ;;  %v3344_v50 = vadd.f32 %v9733_v20, %v9598_v59  ;;  %v8245_v20 = vld [vmem:[#allocation7 + $0x34] ss:$24 sps:$4 sm:$0xff]  }
 0x302   :  { %v3557_v32 = vpop.f32.mrf.mxu1  ;;  %5883 = vmatprep.subr.bf16.mxu1 %v8239_v61  ;;  %v3354_v61 = vadd.f32 %v9745_v16, %v9598_v59 }
 0x303   :  { %v3558_v8 = vadd.f32 %v3557_v32, %v3445_v38  ;;  %v3462_v32 = vpop.f32.mrf.mxu0 }
 0x304   :  { %v9824_v33 = vpop.f32.mrf.mxu1  ;;  %v3463_v13 = vadd.f32 %v3462_v32, %v3350_v30  ;;  %v3447_v32 = vadd.f32 %v9796_v47, %v3334_v10  ;;  %v8257_v30 = vld [vmem:[#allocation7 + $0x2d4] ss:$24 sps:$4 sm:$0xff]  }
 0x305   :  { %v3652_v4 = vmax.f32 %v3558_v8, 0.0  ;;  %5884 = vmatpush1.bf16.msra.mxu1 %v8237_v0 }
 0x306   :  { %v3563_v28 = vpop.f32.mrf.mxu1  ;;  %5885 = vmatprep.subr.bf16.mxu1 %v8245_v20 }
 0x307   :  { %v9828_v60 = vpack.c.bf16 %v3652_v4, %v3646_v53  ;;  %v3564_v38 = vadd.f32 %v3563_v28, %v3451_v52  ;;  %v3348_v53 = vadd.f32 %v9737_v12, %v9591_v14  ;;  %v3464_v4 = vpop.f32.mrf.mxu0  ;;  %v3330_v14 = vadd.f32 %v9715_v40, %v9598_v59 }
 0x308   :  { %v3565_v55 = vpop.f32.mrf.mxu1  ;;  %v3465_v56 = vadd.f32 %v3464_v4, %v3352_v51  ;;  %v3453_v12 = vadd.f32 %v9810_v41, %v3340_v15  ;;  %v3320_v41 = vadd.f32 %v9702_v17, %v9598_v59  ;;  %v3560_v51 = vadd.f32 %v9824_v33, %v3447_v32 }
 0x309   :  { %v3658_v18 = vmax.f32 %v3564_v38, 0.0  ;;  %5886 = vmatpush1.bf16.msra.mxu1 %v8243_v43  ;;  %v3466_v38 = vpop.f32.mrf.mxu0  ;;  %v8263_v43 = vld [vmem:[#allocation7 + $0x2a4] ss:$24 sps:$4 sm:$0xff]  }
 0x30a   :  { %v3567_v9 = vpop.f32.mrf.mxu1  ;;  %v3467_v0 = vadd.f32 %v3466_v38, %v3354_v61  ;;  %v3566_v40 = vadd.f32 %v3565_v55, %v3453_v12  ;;  %v8267_v38 = vld [vmem:[#allocation7 + $0x270] ss:$24 sps:$4 sm:$0xff]  }
 0x30b   :  { %v3568_v58 = vadd.f32 %v3567_v9, %v3455_v25  ;;  %v3461_v25 = vadd.f32 %v3460_v19, %v3348_v53  ;;  %v8251_v9 = vld [vmem:[#allocation7 + $0x4] ss:$24 sps:$4 sm:$0xff]   ;;  %v3443_v19 = vadd.f32 %v9782_v35, %v3330_v14  ;;  %v3310_v35 = vadd.f32 %v9687_v1, %v9598_v59 }
 0x30c   :  { %v3569_v8 = vpop.f32.mrf.mxu1  ;;  %5887 = vmatprep.subr.bf16.mxu1 %v8251_v9  ;;  %v3659_v17 = vmax.f32 %v3566_v40, 0.0 }
 0x30d   :  { %v3664_v39 = vmax.f32 %v3568_v58, 0.0  ;;  %v3457_v58 = vadd.f32 %v3456_v27, %v3344_v50  ;;  %v3324_v27 = vadd.f32 %v9709_v11, %v9598_v59  ;;  %5888 = vmatpush1.bf16.msra.mxu1 %v8249_v5  ;;  %v3314_v11 = vadd.f32 %v9697_v24, %v9598_v59  ;;  %v8261_v24 = vld [vmem:[#allocation7 + $0x2a0] ss:$24 sps:$4 sm:$0xff]  }
 0x30e   :  { %v3573_v28 = vpop.f32.mrf.mxu1  ;;  %5889 = vmatprep.subr.bf16.mxu1 %v8257_v30  ;;  %v3556_v55 = vadd.f32 %v9820_v44, %v3443_v19 }
 0x30f   :  { %v9842_v57 = vpack.c.bf16 %v3664_v39, %v3658_v18  ;;  %v3570_v18 = vadd.f32 %v3569_v8, %v3457_v58  ;;  %v3574_v42 = vadd.f32 %v3573_v28, %v3461_v25  ;;  %v8255_v28 = vld [vmem:[#allocation7 + $0x2d0] ss:$24 sps:$4 sm:$0xff]   ;;  %v3437_v5 = vadd.f32 %v9768_v34, %v3324_v27 }
 0x310   :  { %v3575_v52 = vpop.f32.mrf.mxu1  ;;  %v3653_v58 = vmax.f32 %v3560_v51, 0.0  ;;  %v3304_v34 = vadd.f32 %v9681_v6, %v9598_v59  ;;  %v3427_v44 = vadd.f32 %v9743_v31, %v3314_v11  ;;  %v3647_v1 = vmax.f32 %v3556_v55, 0.0  ;;  %v8291_v51 = vld [vmem:[#allocation7 + $0x1b0] ss:$24 sps:$4 sm:$0xff]   ;;  %v8161_v55 = vld [vmem:[#allocation7 + $0x454] ss:$24 sps:$4 sm:$0xff]  }
 0x311   :  { %v3576_v39 = vadd.f32 %v3575_v52, %v3463_v13  ;;  %v3665_v15 = vmax.f32 %v3570_v18, 0.0  ;;  %v3670_v47 = vmax.f32 %v3574_v42, 0.0  ;;  %5890 = vmatpush2.bf16.msra.mxu1 %v8255_v28  ;;  %v3433_v52 = vadd.f32 %v9755_v54, %v3320_v41  ;;  %v8273_v18 = vld [vmem:[#allocation7 + $0x240] ss:$24 sps:$4 sm:$0xff]   ;;  %v8299_v28 = vld [vmem:[#allocation7 + $0x184] ss:$24 sps:$4 sm:$0xff]  }
 0x312   :  { %v3577_v16 = vpop.f32.mrf.mxu1  ;;  %v3550_v10 = vadd.f32 %v9814_v46, %v3437_v5  ;;  %5891 = vmatprep.subr.bf16.mxu1 %v8263_v43  ;;  %v3300_v54 = vadd.f32 %v9669_v3, %v9598_v59  ;;  %v8269_v46 = vld [vmem:[#allocation7 + $0x274] ss:$24 sps:$4 sm:$0xff]   ;;  %v3540_v14 = vadd.f32 %v9801_v45, %v3427_v44  ;;  %v3713_v25 = vpack.c.bf16 %v3653_v58, %v3647_v1  ;;  %v8275_v3 = vld [vmem:[#allocation7 + $0x244] ss:$24 sps:$4 sm:$0xff]   ;;  %v8162_v58 = vld [vmem:[#allocation7 + $0x420] ss:$24 sps:$4 sm:$0xff]  }
 0x313   :  { %v3578_v20 = vadd.f32 %v3577_v16, %v3465_v56  ;;  %v3671_v53 = vmax.f32 %v3576_v39, 0.0  ;;  %v3719_v42 = vpack.c.bf16 %v3665_v15, %v3659_v17  ;;  %v3546_v13 = vadd.f32 %v9808_v36, %v3433_v52  ;;  %v8281_v39 = vld [vmem:[#allocation7 + $0x214] ss:$24 sps:$4 sm:$0xff]   ;;  %v10856_v41 = vld [vmem:[#allocation28_spill] sm:$0xff]  ;;  %v10861_v17 = vld [vmem:[#allocation23_spill] sm:$0xff] }
 0x314   :  { %v3579_v48 = vpop.f32.mrf.mxu1  ;;  %v3423_v56 = vadd.f32 %v9731_v2, %v3310_v35  ;;  %v3641_v12 = vmax.f32 %v3550_v10, 0.0  ;;  %v3294_v6 = vadd.f32 %v9656_v49, %v9598_v59  ;;  %v3417_v31 = vadd.f32 %v9719_v21, %v3304_v34  ;;  %v10858_v15 = vld [vmem:[#allocation20_spill] sm:$0xff]  ;;  %v10860_v5 = vld [vmem:[#allocation21_spill] sm:$0xff] }
 0x315   :  { %v3580_v50 = vadd.f32 %v3579_v48, %v3467_v0  ;;  %v3676_v8 = vmax.f32 %v3578_v20, 0.0  ;;  %5892 = vmatpush2.bf16.msra.mxu1 %v8261_v24  ;;  %v3635_v16 = vmax.f32 %v3546_v13, 0.0  ;;  %v3413_v2 = vadd.f32 %v9707_v63, %v3300_v54  ;;  %v8279_v48 = vld [vmem:[#allocation7 + $0x210] ss:$24 sps:$4 sm:$0xff]   ;;  %v8164_v35 = vld [vmem:[#allocation7 + $0x424] ss:$24 sps:$4 sm:$0xff]  }
 0x316   :  { %5893 = vmatprep.subr.bf16.mxu1 %v8269_v46  ;;  %v3536_v36 = vadd.f32 %v9794_v23, %v3423_v56  ;;  %v3530_v45 = vadd.f32 %v9787_v26, %v3417_v31  ;;  %v3629_v9 = vmax.f32 %v3540_v14, 0.0  ;;  %v3284_v49 = vadd.f32 %v9624_v22, %v9598_v59  ;;  %v8287_v59 = vld [vmem:[#allocation7 + $0x1e4] ss:$24 sps:$4 sm:$0xff]   ;;  %v8165_v13 = vld [vmem:[#allocation7 + $0x3f0] ss:$24 sps:$4 sm:$0xff]  }
 0x317   :  { %v3677_v4 = vmax.f32 %v3580_v50, 0.0  ;;  %v3724_v33 = vpack.c.bf16 %v3676_v8, %v3670_v47  ;;  %v3707_v0 = vpack.c.bf16 %v3641_v12, %v3635_v16  ;;  %v3407_v21 = vadd.f32 %v9660_v62, %v3294_v6  ;;  %v10855_v22 = vld [vmem:[#allocation24_spill] sm:$0xff]  ;;  %v8303_v56 = vld [vmem:[#allocation7 + $0x750] ss:$24 sps:$4 sm:$0xff]   ;;  %v8305_v14 = vld [vmem:[#allocation7 + $0x754] ss:$24 sps:$4 sm:$0xff]  }
 0x318   :  { %v3526_v23 = vadd.f32 %v9780_v37, %v3413_v2  ;;  %v3617_v26 = vmax.f32 %v3530_v45, 0.0  ;;  %v8285_v50 = vld [vmem:[#allocation7 + $0x1e0] ss:$24 sps:$4 sm:$0xff]   ;;  %v10863_v10 = vmov 0   ;;  %v8170_v54 = vld [vmem:[#allocation7 + $0x3c4] ss:$24 sps:$4 sm:$0xff]  }
 0x319   :  { %v3725_v61 = vpack.c.bf16 %v3677_v4, %v3671_v53  ;;  %5894 = vmatpush2.bf16.msra.mxu1 %v8267_v38  ;;  %v3520_v63 = vadd.f32 %v9772_v29, %v3407_v21  ;;  %v10857_v29 = vld [vmem:[#allocation22_spill] sm:$0xff]  ;;  %v10859_v53 = vld [vmem:[#allocation25_spill] sm:$0xff]  ;;  %v8297_v47 = vld [vmem:[#allocation7 + $0x180] ss:$24 sps:$4 sm:$0xff]  }
 0x31a   :  { %5895 = vmatprep.subr.bf16.mxu1 %v8275_v3  ;;  %v3611_v32 = vmax.f32 %v3526_v23, 0.0  ;;  %v3599_v19 = vmax.f32 %v10857_v29, 0.0  ;;  %v3587_v4 = vmax.f32 %v10859_v53, 0.0  ;;  %v10862_v43 = vld [vmem:[#allocation12_spill] sm:$0xff]  ;;  %v10864_v12 = vld [vmem:[#allocation14_spill] sm:$0xff]  ;;  %v10865_v23 = vld [vmem:[#allocation17_spill] sm:$0xff] }
 0x31b   :  { %3952 = vmatprep.subr.bf16.mxu0 %v3725_v61  ;;  %v3605_v37 = vmax.f32 %v3520_v63, 0.0  ;;  %v8159_v61 = vld [vmem:[#allocation7 + $0x450] ss:$24 sps:$4 sm:$0xff]   ;;  %v8168_v38 = vld [vmem:[#allocation7 + $0x3c0] ss:$24 sps:$4 sm:$0xff]  }
 0x31c   :  { %3953 = vmatpush1.bf16.msra.mxu0 %v3724_v33  ;;  %v3695_v40 = vpack.c.bf16 %v3617_v26, %v3611_v32  ;;  %v8173_v6 = vld [vmem:[#allocation7 + $0x394] ss:$24 sps:$4 sm:$0xff]   ;;  %v8311_v16 = vld [vmem:[#allocation7 + $0x724] ss:$24 sps:$4 sm:$0xff]   ;;  %v8171_v45 = vld [vmem:[#allocation7 + $0x390] ss:$24 sps:$4 sm:$0xff]  }
 0x31d   :  { %3954 = vmatprep.subr.bf16.mxu0 %v3719_v42  ;;  %5896 = vmatpush2.bf16.msra.mxu1 %v8273_v18  ;;  %v3689_v30 = vpack.c.bf16 %v3605_v37, %v3599_v19  ;;  %v8167_v42 = vld [vmem:[#allocation7 + $0x3f4] ss:$24 sps:$4 sm:$0xff]   ;;  %v8177_v32 = vld [vmem:[#allocation7 + $0x330] ss:$24 sps:$4 sm:$0xff]   ;;  %v8180_v29 = vld [vmem:[#allocation7 + $0x300] ss:$24 sps:$4 sm:$0xff]  }
 0x31e   :  { %5897 = vmatprep.subr.bf16.mxu1 %v8281_v39  ;;  %v8317_v21 = vld [vmem:[#allocation7 + $0x6f4] ss:$24 sps:$4 sm:$0xff]   ;;  %v8174_v39 = vld [vmem:[#allocation7 + $0x360] ss:$24 sps:$4 sm:$0xff]   ;;  %v8327_v37 = vld [vmem:[#allocation7 + $0x690] ss:$24 sps:$4 sm:$0xff]  }
 0x31f   :  { %v8179_v63 = vld [vmem:[#allocation7 + $0x334] ss:$24 sps:$4 sm:$0xff]   ;;  %v8183_v53 = vld [vmem:[#allocation7 + $0x5d0] ss:$24 sps:$4 sm:$0xff]  }
 0x320   :  { %3955 = vmatpush1.bf16.msra.mxu0 %v9842_v57  ;;  %v3623_v57 = vmax.f32 %v3536_v36, 0.0  ;;  %v8309_v36 = vld [vmem:[#allocation7 + $0x720] ss:$24 sps:$4 sm:$0xff]   ;;  %v8185_v19 = vld [vmem:[#allocation7 + $0x5d4] ss:$24 sps:$4 sm:$0xff]  }
 0x321   :  { %3956 = vmatprep.subr.bf16.mxu0 %v3713_v25  ;;  %5898 = vmatpush2.bf16.msra.mxu1 %v8279_v48  ;;  %v8323_v48 = vld [vmem:[#allocation7 + $0x6c4] ss:$24 sps:$4 sm:$0xff]  }
 0x322   :  { %v3701_v20 = vpack.c.bf16 %v3629_v9, %v3623_v57  ;;  %5899 = vmatprep.subr.bf16.mxu1 %v8287_v59 }
 0x324   :  { %3957 = vmatpush1.bf16.msra.mxu0 %v9828_v60  ;;  %v10854_v60 = vld [vmem:[#allocation18_spill] sm:$0xff] }
 0x325   :  { %3958 = vmatprep.subr.bf16.mxu0 %v3707_v0  ;;  %v3397_v27 = vadd.f32 %v10854_v60, %v3284_v49  ;;  %5900 = vmatpush2.bf16.msra.mxu1 %v8285_v50  ;;  %v8176_v0 = vld [vmem:[#allocation7 + $0x364] ss:$24 sps:$4 sm:$0xff]   ;;  %v8315_v49 = vld [vmem:[#allocation7 + $0x6f0] ss:$24 sps:$4 sm:$0xff]  }
 0x326   :  { %v10866_v50 = vld [vmem:[#allocation16_spill] sm:$0xff] }
 0x327   :  { %v3510_v62 = vadd.f32 %v10855_v22, %v3397_v27  ;;  %v8182_v22 = vld [vmem:[#allocation7 + $0x304] ss:$24 sps:$4 sm:$0xff]  }
 0x328   :  { %3959 = vmatpush1.bf16.msra.mxu0 %v9818_v7  ;;  %v8293_v7 = vld [vmem:[#allocation7 + $0x1b4] ss:$24 sps:$4 sm:$0xff]  }
 0x329   :  { %3960 = vmatprep.subr.bf16.mxu0 %v3701_v20  ;;  %v3593_v8 = vmax.f32 %v3510_v62, 0.0  ;;  %5901 = vmatprep.subr.bf16.mxu1 %v8293_v7  ;;  %v8321_v20 = vld [vmem:[#allocation7 + $0x6c0] ss:$24 sps:$4 sm:$0xff]  }
 0x32a   :  { %5902 = vmatpush2.bf16.msra.mxu1 %v8291_v51 }
 0x32b   :  { %v3683_v11 = vpack.c.bf16 %v3593_v8, %v3587_v4  ;;  %5903 = vmatprep.subr.bf16.mxu1 %v8299_v28  ;;  %v8333_v8 = vld [vmem:[#allocation7 + $0x660] ss:$24 sps:$4 sm:$0xff]   ;;  %v8188_v28 = vld [vmem:[#allocation7 + $0x5a4] ss:$24 sps:$4 sm:$0xff]  }
 0x32c   :  { %3961 = vmatpush1.bf16.msra.mxu0 %v10856_v41 }
 0x32d   :  { %3962 = vmatprep.subr.bf16.mxu0 %v3695_v40  ;;  %v8329_v40 = vld [vmem:[#allocation7 + $0x694] ss:$24 sps:$4 sm:$0xff]  }
 0x32e   :  { %5904 = vmatpush2.bf16.msra.mxu1 %v8297_v47  ;;  %v8339_v47 = vld [vmem:[#allocation7 + $0x630] ss:$24 sps:$4 sm:$0xff]  }
 0x32f   :  { %6099 = vmatprep.subr.bf16.mxu1 %v8305_v14  ;;  %v10868_v14 = vld [vmem:[#allocation19_spill] sm:$0xff] }
 0x330   :  { %3963 = vmatpush1.bf16.msra.mxu0 %v10858_v15 }
 0x331   :  { %3964 = vmatprep.subr.bf16.mxu0 %v3689_v30  ;;  %v8335_v30 = vld [vmem:[#allocation7 + $0x664] ss:$24 sps:$4 sm:$0xff]  }
 0x334   :  { %3965 = vmatpush1.bf16.msra.mxu0 %v10860_v5  ;;  %v8341_v5 = vld [vmem:[#allocation7 + $0x634] ss:$24 sps:$4 sm:$0xff]  }
 0x335   :  { %3966 = vmatprep.subr.bf16.mxu0 %v3683_v11 }
 0x338   :  { %3967 = vmatpush1.bf16.msra.mxu0 %v10861_v17 }
 0x339   :  { %5986 = vmatprep.subr.bf16.mxu0 %v8161_v55  ;;  %v3760_v33 = vpop.f32.mrf.mxu0  ;;  %v10867_v55 = vld [vmem:[#allocation15_spill] sm:$0xff] }
 0x33b   :  { %3985 = vmatmul.mubr.bf16.vlgmr.msra.gmra.mxu0 %v10862_v43  ;;  %v3762_v52 = vpop.f32.mrf.mxu0  ;;  %v8345_v43 = vld [vmem:[#allocation7 + $0x600] ss:$24 sps:$4 sm:$0xff]  }
 0x33c   :  { %3994 = vmatprep.mubr.bf16.mxu0 %v10863_v10  ;;  %5987 = vmatpush1.bf16.msra.mxu0 %v8159_v61  ;;  %v8186_v61 = vld [vmem:[#allocation7 + $0x5a0] ss:$24 sps:$4 sm:$0xff]  }
 0x33d   :  { %5988 = vmatprep.subr.bf16.mxu0 %v8164_v35  ;;  %v3764_v24 = vpop.f32.mrf.mxu0  ;;  %v8191_v35 = vld [vmem:[#allocation7 + $0x574] ss:$24 sps:$4 sm:$0xff]  }
 0x33e   :  { %v9896_v34 = vpack.c.bf16 %v3764_v24, %v3760_v33  ;;  %v8189_v24 = vld [vmem:[#allocation7 + $0x570] ss:$24 sps:$4 sm:$0xff]  }
 0x33f   :  { %v3766_v44 = vpop.f32.mrf.mxu0 }
 0x340   :  { %5989 = vmatpush1.bf16.msra.mxu0 %v8162_v58  ;;  %v9898_v1 = vpack.c.bf16 %v3766_v44, %v3762_v52  ;;  %v8347_v52 = vld [vmem:[#allocation7 + $0x604] ss:$24 sps:$4 sm:$0xff]  }
 0x341   :  { %5990 = vmatprep.subr.bf16.mxu0 %v8167_v42  ;;  %v3770_v46 = vpop.f32.mrf.mxu0 }
 0x342   :  { %5905 = vmatprep.mubr.bf16.mxu1 %v9898_v1 }
 0x343   :  { %3995 = vmatmul.mubr.bf16.gmra.mxu0 %v10864_v12  ;;  %v3772_v25 = vpop.f32.mrf.mxu0  ;;  %5906 = vmatmul.mubr.bf16.vlgmr.msra.gmra.mxu1 %v9896_v34 }
 0x344   :  { %4004 = vmatprep.mubr.bf16.mxu0 %v10863_v10  ;;  %5991 = vmatpush1.bf16.msra.mxu0 %v8165_v13  ;;  %v8194_v13 = vld [vmem:[#allocation7 + $0x544] ss:$24 sps:$4 sm:$0xff]  }
 0x345   :  { %5992 = vmatprep.subr.bf16.mxu0 %v8170_v54  ;;  %v3774_v31 = vpop.f32.mrf.mxu0  ;;  %6100 = vmatpush1.bf16.msra.mxu1 %v8303_v56  ;;  %v8353_v56 = vld [vmem:[#allocation7 + $0x8d4] ss:$24 sps:$4 sm:$0xff]  }
 0x346   :  { %v9904_v3 = vpack.c.bf16 %v3774_v31, %v3770_v46  ;;  %6101 = vmatprep.subr.bf16.mxu1 %v8311_v16  ;;  %v8351_v46 = vld [vmem:[#allocation7 + $0x8d0] ss:$24 sps:$4 sm:$0xff]   ;;  %v8357_v31 = vld [vmem:[#allocation7 + $0x8a0] ss:$24 sps:$4 sm:$0xff]  }
 0x347   :  { %v3776_v2 = vpop.f32.mrf.mxu0 }
 0x348   :  { %5993 = vmatpush1.bf16.msra.mxu0 %v8168_v38  ;;  %v9906_v9 = vpack.c.bf16 %v3776_v2, %v3772_v25  ;;  %v8192_v25 = vld [vmem:[#allocation7 + $0x540] ss:$24 sps:$4 sm:$0xff]   ;;  %v8197_v38 = vld [vmem:[#allocation7 + $0x514] ss:$24 sps:$4 sm:$0xff]  }
 0x349   :  { %5994 = vmatprep.subr.bf16.mxu0 %v8173_v6  ;;  %v3780_v18 = vpop.f32.mrf.mxu0  ;;  %6102 = vmatpush1.bf16.msra.mxu1 %v8309_v36  ;;  %v8359_v36 = vld [vmem:[#allocation7 + $0x8a4] ss:$24 sps:$4 sm:$0xff]  }
 0x34a   :  { %5915 = vmatprep.mubr.bf16.mxu1 %v9906_v9  ;;  %6103 = vmatprep.subr.bf16.mxu1 %v8317_v21  ;;  %v8363_v21 = vld [vmem:[#allocation7 + $0x870] ss:$24 sps:$4 sm:$0xff]  }
 0x34b   :  { %4005 = vmatmul.mubr.bf16.gmra.mxu0 %v10865_v23  ;;  %v3782_v57 = vpop.f32.mrf.mxu0  ;;  %5916 = vmatmul.mubr.bf16.gmra.mxu1 %v9904_v3  ;;  %v8365_v23 = vld [vmem:[#allocation7 + $0x874] ss:$24 sps:$4 sm:$0xff]  }
 0x34c   :  { %4014 = vmatprep.mubr.bf16.mxu0 %v10863_v10  ;;  %5995 = vmatpush1.bf16.msra.mxu0 %v8171_v45  ;;  %v8195_v45 = vld [vmem:[#allocation7 + $0x510] ss:$24 sps:$4 sm:$0xff]  }
 0x34d   :  { %5996 = vmatprep.subr.bf16.mxu0 %v8176_v0  ;;  %v3784_v26 = vpop.f32.mrf.mxu0  ;;  %6104 = vmatpush1.bf16.msra.mxu1 %v8315_v49 }
 0x34e   :  { %v9912_v60 = vpack.c.bf16 %v3784_v26, %v3780_v18  ;;  %6105 = vmatprep.subr.bf16.mxu1 %v8323_v48  ;;  %v8200_v18 = vld [vmem:[#allocation7 + $0x4e4] ss:$24 sps:$4 sm:$0xff]   ;;  %v8203_v26 = vld [vmem:[#allocation7 + $0x4b4] ss:$24 sps:$4 sm:$0xff]   ;;  %v8369_v48 = vld [vmem:[#allocation7 + $0x840] ss:$24 sps:$4 sm:$0xff]  }
 0x34f   :  { %v3786_v27 = vpop.f32.mrf.mxu0 }
 0x350   :  { %5997 = vmatpush1.bf16.msra.mxu0 %v8174_v39  ;;  %v9914_v59 = vpack.c.bf16 %v3786_v27, %v3782_v57  ;;  %v10869_v57 = vld [vmem:[#allocation27_spill] sm:$0xff] }
 0x351   :  { %5998 = vmatprep.subr.bf16.mxu0 %v8179_v63  ;;  %v3790_v62 = vpop.f32.mrf.mxu0  ;;  %6106 = vmatpush1.bf16.msra.mxu1 %v8321_v20  ;;  %v8198_v63 = vld [vmem:[#allocation7 + $0x4e0] ss:$24 sps:$4 sm:$0xff]   ;;  %v8371_v27 = vld [vmem:[#allocation7 + $0x844] ss:$24 sps:$4 sm:$0xff]  }
 0x352   :  { %5925 = vmatprep.mubr.bf16.mxu1 %v9914_v59  ;;  %6107 = vmatprep.subr.bf16.mxu1 %v8329_v40  ;;  %v8206_v40 = vld [vmem:[#allocation7 + $0x484] ss:$24 sps:$4 sm:$0xff]  }
 0x353   :  { %4015 = vmatmul.mubr.bf16.gmra.mxu0 %v10866_v50  ;;  %v3792_v41 = vpop.f32.mrf.mxu0  ;;  %5926 = vmatmul.mubr.bf16.gmra.mxu1 %v9912_v60  ;;  %v8375_v50 = vld [vmem:[#allocation7 + $0x810] ss:$24 sps:$4 sm:$0xff]  }
 0x354   :  { %4024 = vmatprep.mubr.bf16.mxu0 %v10863_v10  ;;  %5999 = vmatpush1.bf16.msra.mxu0 %v8177_v32 }
 0x355   :  { %6000 = vmatprep.subr.bf16.mxu0 %v8182_v22  ;;  %v3794_v7 = vpop.f32.mrf.mxu0  ;;  %6108 = vmatpush1.bf16.msra.mxu1 %v8327_v37 }
 0x356   :  { %v9920_v51 = vpack.c.bf16 %v3794_v7, %v3790_v62  ;;  %6109 = vmatprep.subr.bf16.mxu1 %v8335_v30  ;;  %v8201_v62 = vld [vmem:[#allocation7 + $0x4b0] ss:$24 sps:$4 sm:$0xff]   ;;  %v8204_v7 = vld [vmem:[#allocation7 + $0x480] ss:$24 sps:$4 sm:$0xff]  }
 0x357   :  { %v3796_v15 = vpop.f32.mrf.mxu0 }
 0x358   :  { %6001 = vmatpush1.bf16.msra.mxu0 %v8180_v29  ;;  %v9922_v4 = vpack.c.bf16 %v3796_v15, %v3792_v41  ;;  %v8377_v41 = vld [vmem:[#allocation7 + $0x814] ss:$24 sps:$4 sm:$0xff]   ;;  %v8381_v15 = vld [vmem:[#allocation7 + $0x7e0] ss:$24 sps:$4 sm:$0xff]  }
 0x359   :  { %6002 = vmatprep.subr.bf16.mxu0 %v8185_v19  ;;  %v3800_v11 = vpop.f32.mrf.mxu0  ;;  %6110 = vmatpush1.bf16.msra.mxu1 %v8333_v8  ;;  %v10870_v29 = vld [vmem:[#allocation26_spill] sm:$0xff] }
 0x35a   :  { %5935 = vmatprep.mubr.bf16.mxu1 %v9922_v4  ;;  %6111 = vmatprep.subr.bf16.mxu1 %v8341_v5  ;;  %v8212_v8 = vld [vmem:[#allocation7 + $0x15c] ss:$24 sps:$4 sm:$0xff]  }
 0x35b   :  { %4025 = vmatmul.mubr.bf16.gmra.mxu0 %v10867_v55  ;;  %v3802_v17 = vpop.f32.mrf.mxu0  ;;  %5936 = vmatmul.mubr.bf16.gmra.mxu1 %v9920_v51  ;;  %v8389_v55 = vld [vmem:[#allocation7 + $0x7b4] ss:$24 sps:$4 sm:$0xff]  }
 0x35c   :  { %4034 = vmatprep.mubr.bf16.mxu0 %v10863_v10  ;;  %6003 = vmatpush2.bf16.msra.mxu0 %v8183_v53  ;;  %v8383_v53 = vld [vmem:[#allocation7 + $0x7e4] ss:$24 sps:$4 sm:$0xff]  }
 0x35d   :  { %6004 = vmatprep.subr.bf16.mxu0 %v8188_v28  ;;  %v3804_v33 = vpop.f32.mrf.mxu0  ;;  %6112 = vmatpush1.bf16.msra.mxu1 %v8339_v47 }
 0x35e   :  { %v9928_v58 = vpack.c.bf16 %v3804_v33, %v3800_v11  ;;  %6113 = vmatprep.subr.bf16.mxu1 %v8347_v52  ;;  %v8395_v33 = vld [vmem:[#allocation7 + $0x784] ss:$24 sps:$4 sm:$0xff]  }
 0x35f   :  { %v3806_v42 = vpop.f32.mrf.mxu0 }
 0x360   :  { %6005 = vmatpush2.bf16.msra.mxu0 %v8186_v61  ;;  %v9930_v44 = vpack.c.bf16 %v3806_v42, %v3802_v17  ;;  %v8387_v17 = vld [vmem:[#allocation7 + $0x7b0] ss:$24 sps:$4 sm:$0xff]  }
 0x361   :  { %6006 = vmatprep.subr.bf16.mxu0 %v8191_v35  ;;  %v3810_v54 = vpop.f32.mrf.mxu0  ;;  %6114 = vmatpush1.bf16.msra.mxu1 %v8345_v43  ;;  %v8393_v43 = vld [vmem:[#allocation7 + $0x780] ss:$24 sps:$4 sm:$0xff]  }
 0x362   :  { %5945 = vmatprep.mubr.bf16.mxu1 %v9930_v44  ;;  %6115 = vmatprep.subr.bf16.mxu1 %v8353_v56  ;;  %v8401_v56 = vld [vmem:[#allocation7 + $0x45c] ss:$24 sps:$4 sm:$0xff]  }
 0x363   :  { %4035 = vmatmul.mubr.bf16.gmra.mxu0 %v10868_v14  ;;  %v3812_v12 = vpop.f32.mrf.mxu0  ;;  %5946 = vmatmul.mubr.bf16.gmra.mxu1 %v9928_v58 }
 0x364   :  { %4044 = vmatprep.mubr.bf16.mxu0 %v10863_v10  ;;  %6007 = vmatpush2.bf16.msra.mxu0 %v8189_v24 }
 0x365   :  { %6008 = vmatprep.subr.bf16.mxu0 %v8194_v13  ;;  %v3814_v6 = vpop.f32.mrf.mxu0  ;;  %6116 = vmatpush2.bf16.msra.mxu1 %v8351_v46  ;;  %v8210_v13 = vld [vmem:[#allocation7 + $0x158] ss:$24 sps:$4 sm:$0xff]   ;;  %v8218_v46 = vld [vmem:[#allocation7 + $0x12c] ss:$24 sps:$4 sm:$0xff]  }
 0x366   :  { %v9936_v16 = vpack.c.bf16 %v3814_v6, %v3810_v54  ;;  %6117 = vmatprep.subr.bf16.mxu1 %v8359_v36 }
 0x367   :  { %v3816_v2 = vpop.f32.mrf.mxu0 }
 0x368   :  { %6009 = vmatpush2.bf16.msra.mxu0 %v8192_v25  ;;  %v9938_v0 = vpack.c.bf16 %v3816_v2, %v3812_v12  ;;  %v8216_v12 = vld [vmem:[#allocation7 + $0x128] ss:$24 sps:$4 sm:$0xff]   ;;  %v8222_v2 = vld [vmem:[#allocation7 + $0xf8] ss:$24 sps:$4 sm:$0xff]  }
 0x369   :  { %6010 = vmatprep.subr.bf16.mxu0 %v8197_v38  ;;  %v3820_v49 = vpop.f32.mrf.mxu0  ;;  %6118 = vmatpush2.bf16.msra.mxu1 %v8357_v31  ;;  %v8224_v38 = vld [vmem:[#allocation7 + $0xfc] ss:$24 sps:$4 sm:$0xff]  }
 0x36a   :  { %5955 = vmatprep.mubr.bf16.mxu1 %v9938_v0  ;;  %6119 = vmatprep.subr.bf16.mxu1 %v8365_v23 }
 0x36b   :  { %4045 = vmatmul.mubr.bf16.gmra.mxu0 %v10869_v57  ;;  %v3822_v39 = vpop.f32.mrf.mxu0  ;;  %5956 = vmatmul.mubr.bf16.gmra.mxu1 %v9936_v16  ;;  %v8236_v57 = vld [vmem:[#allocation7 + $0x9c] ss:$24 sps:$4 sm:$0xff]  }
 0x36c   :  { %4054 = vmatprep.mubr.bf16.mxu0 %v10863_v10  ;;  %6011 = vmatpush2.bf16.msra.mxu0 %v8195_v45 }
 0x36d   :  { %6012 = vmatprep.subr.bf16.mxu0 %v8200_v18  ;;  %v3824_v20 = vpop.f32.mrf.mxu0  ;;  %6120 = vmatpush2.bf16.msra.mxu1 %v8363_v21  ;;  %v8230_v18 = vld [vmem:[#allocation7 + $0xcc] ss:$24 sps:$4 sm:$0xff]   ;;  %v8228_v21 = vld [vmem:[#allocation7 + $0xc8] ss:$24 sps:$4 sm:$0xff]  }
 0x36e   :  { %v9944_v32 = vpack.c.bf16 %v3824_v20, %v3820_v49  ;;  %6121 = vmatprep.subr.bf16.mxu1 %v8371_v27  ;;  %v8234_v20 = vld [vmem:[#allocation7 + $0x98] ss:$24 sps:$4 sm:$0xff]   ;;  %v8242_v27 = vld [vmem:[#allocation7 + $0x6c] ss:$24 sps:$4 sm:$0xff]  }
 0x36f   :  { %v3826_v22 = vpop.f32.mrf.mxu0 }
 0x370   :  { %6013 = vmatpush2.bf16.msra.mxu0 %v8198_v63  ;;  %v9946_v37 = vpack.c.bf16 %v3826_v22, %v3822_v39 }
 0x371   :  { %6014 = vmatprep.subr.bf16.mxu0 %v8203_v26  ;;  %v3830_v10 = vpop.f32.mrf.mxu0  ;;  %6122 = vmatpush2.bf16.msra.mxu1 %v8369_v48 }
 0x372   :  { %5965 = vmatprep.mubr.bf16.mxu1 %v9946_v37  ;;  %6123 = vmatprep.subr.bf16.mxu1 %v8377_v41 }
 0x373   :  { %4055 = vmatmul.mubr.bf16.gmra.mxu0 %v10870_v29  ;;  %v3832_v19 = vpop.f32.mrf.mxu0  ;;  %5966 = vmatmul.mubr.bf16.gmra.mxu1 %v9944_v32 }
 0x374   :  { %6015 = vmatpush2.bf16.msra.mxu0 %v8201_v62  ;;  %v8240_v62 = vld [vmem:[#allocation7 + $0x68] ss:$24 sps:$4 sm:$0xff]  }
 0x375   :  { %6016 = vmatprep.subr.bf16.mxu0 %v8206_v40  ;;  %v3834_v30 = vpop.f32.mrf.mxu0  ;;  %6124 = vmatpush2.bf16.msra.mxu1 %v8375_v50 }
 0x376   :  { %v9951_v28 = vpack.c.bf16 %v3834_v30, %v3830_v10  ;;  %6125 = vmatprep.subr.bf16.mxu1 %v8383_v53  ;;  %v8248_v10 = vld [vmem:[#allocation7 + $0x3c] ss:$24 sps:$4 sm:$0xff]  }
 0x377   :  { %v3836_v11 = vpop.f32.mrf.mxu0 }
 0x378   :  { %6017 = vmatpush2.bf16.msra.mxu0 %v8204_v7  ;;  %v9953_v47 = vpack.c.bf16 %v3836_v11, %v3832_v19  ;;  %v8246_v19 = vld [vmem:[#allocation7 + $0x38] ss:$24 sps:$4 sm:$0xff]   ;;  %v8260_v11 = vld [vmem:[#allocation7 + $0x2dc] ss:$24 sps:$4 sm:$0xff]  }
 0x379   :  { %6212 = vmatprep.subr.bf16.mxu0 %v8212_v8  ;;  %6126 = vmatpush2.bf16.msra.mxu1 %v8381_v15  ;;  %v8254_v8 = vld [vmem:[#allocation7 + $0xc] ss:$24 sps:$4 sm:$0xff]   ;;  %v8252_v15 = vld [vmem:[#allocation7 + $0x8] ss:$24 sps:$4 sm:$0xff]  }
 0x37a   :  { %5975 = vmatprep.mubr.bf16.mxu1 %v9953_v47  ;;  %6127 = vmatprep.subr.bf16.mxu1 %v8389_v55 }
 0x37b   :  { %v3873_v5 = vpop.f32.mrf.mxu1  ;;  %5976 = vmatmul.mubr.bf16.gmra.mxu1 %v9951_v28 }
 0x37d   :  { %v3875_v61 = vpop.f32.mrf.mxu1  ;;  %6128 = vmatpush2.bf16.msra.mxu1 %v8387_v17 }
 0x37e   :  { %6129 = vmatprep.subr.bf16.mxu1 %v8395_v33  ;;  %v8266_v33 = vld [vmem:[#allocation7 + $0x2ac] ss:$24 sps:$4 sm:$0xff]  }
 0x37f   :  { %v3877_v35 = vpop.f32.mrf.mxu1 }
 0x380   :  { %v9957_v52 = vpack.c.bf16 %v3877_v35, %v3873_v5 }
 0x381   :  { %v3879_v42 = vpop.f32.mrf.mxu1  ;;  %6130 = vmatpush2.bf16.msra.mxu1 %v8393_v43 }
 0x382   :  { %v9959_v24 = vpack.c.bf16 %v3879_v42, %v3875_v61  ;;  %6325 = vmatprep.subr.bf16.mxu1 %v8401_v56  ;;  %v8258_v61 = vld [vmem:[#allocation7 + $0x2d8] ss:$24 sps:$4 sm:$0xff]   ;;  %v8264_v42 = vld [vmem:[#allocation7 + $0x2a8] ss:$24 sps:$4 sm:$0xff]  }
 0x383   :  { %v3883_v54 = vpop.f32.mrf.mxu1 }
 0x384   :  { %6018 = vmatprep.mubr.bf16.mxu0 %v9959_v24 }
 0x385   :  { %v3885_v14 = vpop.f32.mrf.mxu1  ;;  %6019 = vmatmul.mubr.bf16.vlgmr.msra.gmra.mxu0 %v9957_v52 }
 0x386   :  { %6213 = vmatpush1.bf16.msra.mxu0 %v8210_v13 }
 0x387   :  { %v3887_v25 = vpop.f32.mrf.mxu1  ;;  %6214 = vmatprep.subr.bf16.mxu0 %v8218_v46 }
 0x388   :  { %v9963_v6 = vpack.c.bf16 %v3887_v25, %v3883_v54  ;;  %v8272_v54 = vld [vmem:[#allocation7 + $0x27c] ss:$24 sps:$4 sm:$0xff]  }
 0x389   :  { %v3889_v31 = vpop.f32.mrf.mxu1 }
 0x38a   :  { %v9965_v36 = vpack.c.bf16 %v3889_v31, %v3885_v14  ;;  %6215 = vmatpush1.bf16.msra.mxu0 %v8216_v12  ;;  %v8270_v12 = vld [vmem:[#allocation7 + $0x278] ss:$24 sps:$4 sm:$0xff]  }
 0x38b   :  { %v3893_v45 = vpop.f32.mrf.mxu1  ;;  %6216 = vmatprep.subr.bf16.mxu0 %v8224_v38  ;;  %v8278_v38 = vld [vmem:[#allocation7 + $0x24c] ss:$24 sps:$4 sm:$0xff]  }
 0x38c   :  { %6028 = vmatprep.mubr.bf16.mxu0 %v9965_v36 }
 0x38d   :  { %v3895_v49 = vpop.f32.mrf.mxu1  ;;  %6029 = vmatmul.mubr.bf16.gmra.mxu0 %v9963_v6 }
 0x38e   :  { %6217 = vmatpush1.bf16.msra.mxu0 %v8222_v2  ;;  %v8276_v2 = vld [vmem:[#allocation7 + $0x248] ss:$24 sps:$4 sm:$0xff]  }
 0x38f   :  { %v3897_v23 = vpop.f32.mrf.mxu1  ;;  %6218 = vmatprep.subr.bf16.mxu0 %v8230_v18  ;;  %v8284_v18 = vld [vmem:[#allocation7 + $0x21c] ss:$24 sps:$4 sm:$0xff]  }
 0x390   :  { %v9969_v39 = vpack.c.bf16 %v3897_v23, %v3893_v45 }
 0x391   :  { %v3899_v63 = vpop.f32.mrf.mxu1 }
 0x392   :  { %v9971_v26 = vpack.c.bf16 %v3899_v63, %v3895_v49  ;;  %6219 = vmatpush1.bf16.msra.mxu0 %v8228_v21 }
 0x393   :  { %v3903_v48 = vpop.f32.mrf.mxu1  ;;  %6220 = vmatprep.subr.bf16.mxu0 %v8236_v57  ;;  %v8282_v57 = vld [vmem:[#allocation7 + $0x218] ss:$24 sps:$4 sm:$0xff]  }
 0x394   :  { %6038 = vmatprep.mubr.bf16.mxu0 %v9971_v26 }
 0x395   :  { %v3905_v22 = vpop.f32.mrf.mxu1  ;;  %6039 = vmatmul.mubr.bf16.gmra.mxu0 %v9969_v39 }
 0x396   :  { %6221 = vmatpush1.bf16.msra.mxu0 %v8234_v20  ;;  %v8290_v20 = vld [vmem:[#allocation7 + $0x1ec] ss:$24 sps:$4 sm:$0xff]  }
 0x397   :  { %v3907_v40 = vpop.f32.mrf.mxu1  ;;  %6222 = vmatprep.subr.bf16.mxu0 %v8242_v27  ;;  %v8288_v27 = vld [vmem:[#allocation7 + $0x1e8] ss:$24 sps:$4 sm:$0xff]  }
 0x398   :  { %v9975_v50 = vpack.c.bf16 %v3907_v40, %v3903_v48 }
 0x399   :  { %v3909_v41 = vpop.f32.mrf.mxu1 }
 0x39a   :  { %v9977_v29 = vpack.c.bf16 %v3909_v41, %v3905_v22  ;;  %6223 = vmatpush1.bf16.msra.mxu0 %v8240_v62  ;;  %v8296_v62 = vld [vmem:[#allocation7 + $0x1bc] ss:$24 sps:$4 sm:$0xff]  }
 0x39b   :  { %v3913_v7 = vpop.f32.mrf.mxu1  ;;  %6224 = vmatprep.subr.bf16.mxu0 %v8248_v10 }
 0x39c   :  { %6048 = vmatprep.mubr.bf16.mxu0 %v9977_v29 }
 0x39d   :  { %v3915_v30 = vpop.f32.mrf.mxu1  ;;  %6049 = vmatmul.mubr.bf16.gmra.mxu0 %v9975_v50 }
 0x39e   :  { %6225 = vmatpush1.bf16.msra.mxu0 %v8246_v19  ;;  %v8294_v19 = vld [vmem:[#allocation7 + $0x1b8] ss:$24 sps:$4 sm:$0xff]  }
 0x39f   :  { %v3917_v53 = vpop.f32.mrf.mxu1  ;;  %6226 = vmatprep.subr.bf16.mxu0 %v8254_v8  ;;  %v8300_v8 = vld [vmem:[#allocation7 + $0x188] ss:$24 sps:$4 sm:$0xff]  }
 0x3a0   :  { %v9981_v5 = vpack.c.bf16 %v3917_v53, %v3913_v7  ;;  %v8302_v7 = vld [vmem:[#allocation7 + $0x18c] ss:$24 sps:$4 sm:$0xff]  }
 0x3a1   :  { %v3919_v55 = vpop.f32.mrf.mxu1  ;;  %v8314_v53 = vld [vmem:[#allocation7 + $0x72c] ss:$24 sps:$4 sm:$0xff]  }
 0x3a2   :  { %v9983_v17 = vpack.c.bf16 %v3919_v55, %v3915_v30  ;;  %6227 = vmatpush1.bf16.msra.mxu0 %v8252_v15  ;;  %v8308_v30 = vld [vmem:[#allocation7 + $0x75c] ss:$24 sps:$4 sm:$0xff]   ;;  %v8306_v15 = vld [vmem:[#allocation7 + $0x758] ss:$24 sps:$4 sm:$0xff]  }
 0x3a3   :  { %v3923_v35 = vpop.f32.mrf.mxu1  ;;  %6228 = vmatprep.subr.bf16.mxu0 %v8260_v11  ;;  %v8312_v11 = vld [vmem:[#allocation7 + $0x728] ss:$24 sps:$4 sm:$0xff]   ;;  %v8320_v55 = vld [vmem:[#allocation7 + $0x6fc] ss:$24 sps:$4 sm:$0xff]  }
 0x3a4   :  { %6058 = vmatprep.mubr.bf16.mxu0 %v9983_v17 }
 0x3a5   :  { %v3925_v43 = vpop.f32.mrf.mxu1  ;;  %6059 = vmatmul.mubr.bf16.gmra.mxu0 %v9981_v5 }
 0x3a6   :  { %6229 = vmatpush2.bf16.msra.mxu0 %v8258_v61  ;;  %v8318_v61 = vld [vmem:[#allocation7 + $0x6f8] ss:$24 sps:$4 sm:$0xff]  }
 0x3a7   :  { %v3927_v13 = vpop.f32.mrf.mxu1  ;;  %6230 = vmatprep.subr.bf16.mxu0 %v8266_v33  ;;  %v8324_v33 = vld [vmem:[#allocation7 + $0x6c8] ss:$24 sps:$4 sm:$0xff]  }
 0x3a8   :  { %v9987_v46 = vpack.c.bf16 %v3927_v13, %v3923_v35  ;;  %v8326_v35 = vld [vmem:[#allocation7 + $0x6cc] ss:$24 sps:$4 sm:$0xff]  }
 0x3a9   :  { %v3929_v56 = vpop.f32.mrf.mxu1  ;;  %v8338_v13 = vld [vmem:[#allocation7 + $0x66c] ss:$24 sps:$4 sm:$0xff]  }
 0x3aa   :  { %v9989_v14 = vpack.c.bf16 %v3929_v56, %v3925_v43  ;;  %6231 = vmatpush2.bf16.msra.mxu0 %v8264_v42  ;;  %v8332_v43 = vld [vmem:[#allocation7 + $0x69c] ss:$24 sps:$4 sm:$0xff]   ;;  %v8330_v42 = vld [vmem:[#allocation7 + $0x698] ss:$24 sps:$4 sm:$0xff]  }
 0x3ab   :  { %v3933_v25 = vpop.f32.mrf.mxu1  ;;  %6232 = vmatprep.subr.bf16.mxu0 %v8272_v54  ;;  %v8336_v54 = vld [vmem:[#allocation7 + $0x668] ss:$24 sps:$4 sm:$0xff]   ;;  %v8344_v56 = vld [vmem:[#allocation7 + $0x63c] ss:$24 sps:$4 sm:$0xff]  }
 0x3ac   :  { %6068 = vmatprep.mubr.bf16.mxu0 %v9989_v14 }
 0x3ad   :  { %v3935_v31 = vpop.f32.mrf.mxu1  ;;  %6069 = vmatmul.mubr.bf16.gmra.mxu0 %v9987_v46 }
 0x3ae   :  { %6233 = vmatpush2.bf16.msra.mxu0 %v8270_v12  ;;  %v8342_v12 = vld [vmem:[#allocation7 + $0x638] ss:$24 sps:$4 sm:$0xff]  }
 0x3af   :  { %v3937_v45 = vpop.f32.mrf.mxu1  ;;  %6234 = vmatprep.subr.bf16.mxu0 %v8278_v38  ;;  %v8348_v38 = vld [vmem:[#allocation7 + $0x608] ss:$24 sps:$4 sm:$0xff]  }
 0x3b0   :  { %v9993_v49 = vpack.c.bf16 %v3937_v45, %v3933_v25  ;;  %v8350_v25 = vld [vmem:[#allocation7 + $0x60c] ss:$24 sps:$4 sm:$0xff]  }
 0x3b1   :  { %v3939_v21 = vpop.f32.mrf.mxu1  ;;  %v8362_v45 = vld [vmem:[#allocation7 + $0x8ac] ss:$24 sps:$4 sm:$0xff]  }
 0x3b2   :  { %v9995_v23 = vpack.c.bf16 %v3939_v21, %v3935_v31  ;;  %6235 = vmatpush2.bf16.msra.mxu0 %v8276_v2  ;;  %v8356_v31 = vld [vmem:[#allocation7 + $0x8dc] ss:$24 sps:$4 sm:$0xff]   ;;  %v8354_v2 = vld [vmem:[#allocation7 + $0x8d8] ss:$24 sps:$4 sm:$0xff]  }
 0x3b3   :  { %v3943_v63 = vpop.f32.mrf.mxu1  ;;  %6236 = vmatprep.subr.bf16.mxu0 %v8284_v18  ;;  %v8360_v18 = vld [vmem:[#allocation7 + $0x8a8] ss:$24 sps:$4 sm:$0xff]   ;;  %v8368_v21 = vld [vmem:[#allocation7 + $0x87c] ss:$24 sps:$4 sm:$0xff]  }
 0x3b4   :  { %6078 = vmatprep.mubr.bf16.mxu0 %v9995_v23 }
 0x3b5   :  { %v3945_v48 = vpop.f32.mrf.mxu1  ;;  %6079 = vmatmul.mubr.bf16.gmra.mxu0 %v9993_v49 }
 0x3b6   :  { %6237 = vmatpush2.bf16.msra.mxu0 %v8282_v57  ;;  %v8366_v57 = vld [vmem:[#allocation7 + $0x878] ss:$24 sps:$4 sm:$0xff]  }
 0x3b7   :  { %v3947_v22 = vpop.f32.mrf.mxu1  ;;  %6238 = vmatprep.subr.bf16.mxu0 %v8290_v20  ;;  %v8372_v20 = vld [vmem:[#allocation7 + $0x848] ss:$24 sps:$4 sm:$0xff]  }
 0x3b8   :  { %v9999_v40 = vpack.c.bf16 %v3947_v22, %v3943_v63  ;;  %v8374_v63 = vld [vmem:[#allocation7 + $0x84c] ss:$24 sps:$4 sm:$0xff]  }
 0x3b9   :  { %v3949_v10 = vpop.f32.mrf.mxu1  ;;  %v8386_v22 = vld [vmem:[#allocation7 + $0x7ec] ss:$24 sps:$4 sm:$0xff]  }
 0x3ba   :  { %v10001_v41 = vpack.c.bf16 %v3949_v10, %v3945_v48  ;;  %6239 = vmatpush2.bf16.msra.mxu0 %v8288_v27  ;;  %v8380_v48 = vld [vmem:[#allocation7 + $0x81c] ss:$24 sps:$4 sm:$0xff]   ;;  %v8378_v27 = vld [vmem:[#allocation7 + $0x818] ss:$24 sps:$4 sm:$0xff]  }
 0x3bb   :  { %6240 = vmatprep.subr.bf16.mxu0 %v8296_v62  ;;  %v8384_v62 = vld [vmem:[#allocation7 + $0x7e8] ss:$24 sps:$4 sm:$0xff]   ;;  %v8392_v10 = vld [vmem:[#allocation7 + $0x7bc] ss:$24 sps:$4 sm:$0xff]  }
 0x3bc   :  { %6088 = vmatprep.mubr.bf16.mxu0 %v10001_v41 }
 0x3bd   :  { %6089 = vmatmul.mubr.bf16.gmra.mxu0 %v9999_v40 }
 0x3be   :  { %6241 = vmatpush2.bf16.msra.mxu0 %v8294_v19  ;;  %6244 = vmatprep.mubr.bf16.mxu0 %v9898_v1  ;;  %v8390_v19 = vld [vmem:[#allocation7 + $0x7b8] ss:$24 sps:$4 sm:$0xff]  }
 0x3bf   :  { %6242 = vmatprep.subr.bf16.mxu0 %v8302_v7 }
 0x3c2   :  { %6243 = vmatpush2.bf16.msra.mxu0 %v8300_v8  ;;  %v8398_v8 = vld [vmem:[#allocation7 + $0x78c] ss:$24 sps:$4 sm:$0xff]  }
 0x3c3   :  { %6438 = vmatprep.subr.bf16.mxu0 %v8308_v30 }
 0x3c5   :  { %6245 = vmatmul.mubr.bf16.vlgmr.msra.gmra.mxu0 %v9896_v34 }
 0x3c6   :  { %6439 = vmatpush1.bf16.msra.mxu0 %v8306_v15  ;;  %6254 = vmatprep.mubr.bf16.mxu0 %v9906_v9  ;;  %v8396_v15 = vld [vmem:[#allocation7 + $0x788] ss:$24 sps:$4 sm:$0xff]  }
 0x3c7   :  { %6440 = vmatprep.subr.bf16.mxu0 %v8314_v53 }
 0x3ca   :  { %6441 = vmatpush1.bf16.msra.mxu0 %v8312_v11  ;;  %v8404_v11 = vld [vmem:[#allocation7 + $0x464] ss:$24 sps:$4 sm:$0xff]  }
 0x3cb   :  { %6442 = vmatprep.subr.bf16.mxu0 %v8320_v55 }
 0x3cd   :  { %6255 = vmatmul.mubr.bf16.gmra.mxu0 %v9904_v3 }
 0x3ce   :  { %6443 = vmatpush1.bf16.msra.mxu0 %v8318_v61  ;;  %6264 = vmatprep.mubr.bf16.mxu0 %v9914_v59 }
 0x3cf   :  { %6444 = vmatprep.subr.bf16.mxu0 %v8326_v35  ;;  %v8399_v35 = vld [vmem:[#allocation7 + $0x458] ss:$24 sps:$4 sm:$0xff]  }
 0x3d2   :  { %6445 = vmatpush1.bf16.msra.mxu0 %v8324_v33  ;;  %v8402_v33 = vld [vmem:[#allocation7 + $0x460] ss:$24 sps:$4 sm:$0xff]  }
 0x3d3   :  { %6446 = vmatprep.subr.bf16.mxu0 %v8332_v43 }
 0x3d5   :  { %6265 = vmatmul.mubr.bf16.gmra.mxu0 %v9912_v60 }
 0x3d6   :  { %6447 = vmatpush1.bf16.msra.mxu0 %v8330_v42  ;;  %6274 = vmatprep.mubr.bf16.mxu0 %v9922_v4 }
 0x3d7   :  { %6448 = vmatprep.subr.bf16.mxu0 %v8338_v13  ;;  %v8407_v13 = vld [vmem:[#allocation7 + $0x42c] ss:$24 sps:$4 sm:$0xff]  }
 0x3da   :  { %6449 = vmatpush1.bf16.msra.mxu0 %v8336_v54  ;;  %v8410_v54 = vld [vmem:[#allocation7 + $0x434] ss:$24 sps:$4 sm:$0xff]  }
 0x3db   :  { %6450 = vmatprep.subr.bf16.mxu0 %v8344_v56 }
 0x3dd   :  { %6275 = vmatmul.mubr.bf16.gmra.mxu0 %v9920_v51 }
 0x3de   :  { %6451 = vmatpush1.bf16.msra.mxu0 %v8342_v12  ;;  %6284 = vmatprep.mubr.bf16.mxu0 %v9930_v44  ;;  %v8405_v12 = vld [vmem:[#allocation7 + $0x428] ss:$24 sps:$4 sm:$0xff]  }
 0x3df   :  { %6452 = vmatprep.subr.bf16.mxu0 %v8350_v25  ;;  %v8408_v25 = vld [vmem:[#allocation7 + $0x430] ss:$24 sps:$4 sm:$0xff]  }
 0x3e2   :  { %6453 = vmatpush1.bf16.msra.mxu0 %v8348_v38 }
 0x3e3   :  { %6454 = vmatprep.subr.bf16.mxu0 %v8356_v31  ;;  %v8413_v31 = vld [vmem:[#allocation7 + $0x3fc] ss:$24 sps:$4 sm:$0xff]  }
 0x3e5   :  { %6285 = vmatmul.mubr.bf16.gmra.mxu0 %v9928_v58 }
 0x3e6   :  { %6455 = vmatpush2.bf16.msra.mxu0 %v8354_v2  ;;  %6294 = vmatprep.mubr.bf16.mxu0 %v9938_v0  ;;  %v8416_v2 = vld [vmem:[#allocation7 + $0x404] ss:$24 sps:$4 sm:$0xff]  }
 0x3e7   :  { %6456 = vmatprep.subr.bf16.mxu0 %v8362_v45 }
 0x3ea   :  { %6457 = vmatpush2.bf16.msra.mxu0 %v8360_v18 }
 0x3eb   :  { %6458 = vmatprep.subr.bf16.mxu0 %v8368_v21  ;;  %v8411_v21 = vld [vmem:[#allocation7 + $0x3f8] ss:$24 sps:$4 sm:$0xff]  }
 0x3ed   :  { %6295 = vmatmul.mubr.bf16.gmra.mxu0 %v9936_v16 }
 0x3ee   :  { %6459 = vmatpush2.bf16.msra.mxu0 %v8366_v57  ;;  %6304 = vmatprep.mubr.bf16.mxu0 %v9946_v37  ;;  %v8414_v57 = vld [vmem:[#allocation7 + $0x400] ss:$24 sps:$4 sm:$0xff]  }
 0x3ef   :  { %6460 = vmatprep.subr.bf16.mxu0 %v8374_v63 }
 0x3f2   :  { %6461 = vmatpush2.bf16.msra.mxu0 %v8372_v20 }
 0x3f3   :  { %6462 = vmatprep.subr.bf16.mxu0 %v8380_v48  ;;  %v8419_v48 = vld [vmem:[#allocation7 + $0x3cc] ss:$24 sps:$4 sm:$0xff]  }
 0x3f5   :  { %6305 = vmatmul.mubr.bf16.gmra.mxu0 %v9944_v32 }
 0x3f6   :  { %6463 = vmatpush2.bf16.msra.mxu0 %v8378_v27  ;;  %6314 = vmatprep.mubr.bf16.mxu0 %v9953_v47  ;;  %v8422_v27 = vld [vmem:[#allocation7 + $0x3d4] ss:$24 sps:$4 sm:$0xff]  }
 0x3f7   :  { %6464 = vmatprep.subr.bf16.mxu0 %v8386_v22 }
 0x3fa   :  { %6465 = vmatpush2.bf16.msra.mxu0 %v8384_v62  ;;  %v8417_v62 = vld [vmem:[#allocation7 + $0x3c8] ss:$24 sps:$4 sm:$0xff]  }
 0x3fb   :  { %v3986_v7 = vpop.f32.mrf.mxu0  ;;  %6466 = vmatprep.subr.bf16.mxu0 %v8392_v10  ;;  %v8420_v10 = vld [vmem:[#allocation7 + $0x3d0] ss:$24 sps:$4 sm:$0xff]  }
 0x3fd   :  { %v3988_v30 = vpop.f32.mrf.mxu0  ;;  %6315 = vmatmul.mubr.bf16.gmra.mxu0 %v9951_v28 }
 0x3fe   :  { %6467 = vmatpush2.bf16.msra.mxu0 %v8390_v19 }
 0x3ff   :  { %v3990_v53 = vpop.f32.mrf.mxu0  ;;  %6468 = vmatprep.subr.bf16.mxu0 %v8398_v8  ;;  %v8428_v8 = vld [vmem:[#allocation7 + $0x3a4] ss:$24 sps:$4 sm:$0xff]  }
 0x400   :  { %v10023_v43 = vpack.c.bf16 %v3990_v53, %v3986_v7  ;;  %v8425_v7 = vld [vmem:[#allocation7 + $0x39c] ss:$24 sps:$4 sm:$0xff]   ;;  %v8423_v53 = vld [vmem:[#allocation7 + $0x398] ss:$24 sps:$4 sm:$0xff]  }
 0x401   :  { %v3992_v55 = vpop.f32.mrf.mxu0 }
 0x402   :  { %v10021_v61 = vpack.c.bf16 %v3992_v55, %v3988_v30  ;;  %6469 = vmatpush2.bf16.msra.mxu0 %v8396_v15 }
 0x403   :  { %v3996_v42 = vpop.f32.mrf.mxu0  ;;  %6664 = vmatprep.subr.bf16.mxu0 %v8404_v11  ;;  %v8426_v11 = vld [vmem:[#allocation7 + $0x3a0] ss:$24 sps:$4 sm:$0xff]  }
 0x404   :  { %6131 = vmatprep.mubr.bf16.mxu1 %v10021_v61  ;;  %6470 = vmatprep.mubr.bf16.mxu0 %v10021_v61 }
 0x405   :  { %v3998_v56 = vpop.f32.mrf.mxu0  ;;  %6132 = vmatmul.mubr.bf16.vlgmr.msra.gmra.mxu1 %v10023_v43  ;;  %6471 = vmatmul.mubr.bf16.vlgmr.msra.gmra.mxu0 %v10023_v43 }
 0x406   :  { %6326 = vmatpush1.bf16.msra.mxu1 %v8399_v35  ;;  %6665 = vmatpush1.bf16.msra.mxu0 %v8402_v33  ;;  %v8431_v33 = vld [vmem:[#allocation7 + $0x36c] ss:$24 sps:$4 sm:$0xff]  }
 0x407   :  { %v4000_v38 = vpop.f32.mrf.mxu0  ;;  %6327 = vmatprep.subr.bf16.mxu1 %v8407_v13  ;;  %6666 = vmatprep.subr.bf16.mxu0 %v8410_v54  ;;  %v8429_v54 = vld [vmem:[#allocation7 + $0x368] ss:$24 sps:$4 sm:$0xff]  }
 0x408   :  { %v10031_v63 = vpack.c.bf16 %v4000_v38, %v3996_v42  ;;  %v8434_v42 = vld [vmem:[#allocation7 + $0x374] ss:$24 sps:$4 sm:$0xff]   ;;  %v8440_v38 = vld [vmem:[#allocation7 + $0x344] ss:$24 sps:$4 sm:$0xff]  }
 0x409   :  { %v4002_v45 = vpop.f32.mrf.mxu0 }
 0x40a   :  { %v10029_v18 = vpack.c.bf16 %v4002_v45, %v3998_v56  ;;  %6328 = vmatpush1.bf16.msra.mxu1 %v8405_v12  ;;  %6667 = vmatpush1.bf16.msra.mxu0 %v8408_v25  ;;  %v8432_v56 = vld [vmem:[#allocation7 + $0x370] ss:$24 sps:$4 sm:$0xff]   ;;  %v8437_v25 = vld [vmem:[#allocation7 + $0x33c] ss:$24 sps:$4 sm:$0xff]  }
 0x40b   :  { %v4006_v20 = vpop.f32.mrf.mxu0  ;;  %6329 = vmatprep.subr.bf16.mxu1 %v8413_v31  ;;  %6668 = vmatprep.subr.bf16.mxu0 %v8416_v2  ;;  %v8435_v45 = vld [vmem:[#allocation7 + $0x338] ss:$24 sps:$4 sm:$0xff]  }
 0x40c   :  { %6141 = vmatprep.mubr.bf16.mxu1 %v10029_v18  ;;  %6480 = vmatprep.mubr.bf16.mxu0 %v10029_v18 }
 0x40d   :  { %v4008_v22 = vpop.f32.mrf.mxu0  ;;  %6142 = vmatmul.mubr.bf16.gmra.mxu1 %v10031_v63  ;;  %6481 = vmatmul.mubr.bf16.gmra.mxu0 %v10031_v63 }
 0x40e   :  { %6330 = vmatpush1.bf16.msra.mxu1 %v8411_v21  ;;  %6669 = vmatpush1.bf16.msra.mxu0 %v8414_v57  ;;  %v8438_v21 = vld [vmem:[#allocation7 + $0x340] ss:$24 sps:$4 sm:$0xff]  }
 0x40f   :  { %v4010_v19 = vpop.f32.mrf.mxu0  ;;  %6331 = vmatprep.subr.bf16.mxu1 %v8419_v48  ;;  %6670 = vmatprep.subr.bf16.mxu0 %v8422_v27  ;;  %v8443_v48 = vld [vmem:[#allocation7 + $0x30c] ss:$24 sps:$4 sm:$0xff]  }
 0x410   :  { %v10039_v55 = vpack.c.bf16 %v4010_v19, %v4006_v20  ;;  %v8446_v27 = vld [vmem:[#allocation7 + $0x314] ss:$24 sps:$4 sm:$0xff]  }
 0x411   :  { %v4012_v30 = vpop.f32.mrf.mxu0 }
 0x412   :  { %v10037_v15 = vpack.c.bf16 %v4012_v30, %v4008_v22  ;;  %6332 = vmatpush1.bf16.msra.mxu1 %v8417_v62  ;;  %6671 = vmatpush1.bf16.msra.mxu0 %v8420_v10  ;;  %v8441_v62 = vld [vmem:[#allocation7 + $0x308] ss:$24 sps:$4 sm:$0xff]  }
 0x413   :  { %v4016_v35 = vpop.f32.mrf.mxu0  ;;  %6333 = vmatprep.subr.bf16.mxu1 %v8425_v7  ;;  %6672 = vmatprep.subr.bf16.mxu0 %v8428_v8  ;;  %v8444_v10 = vld [vmem:[#allocation7 + $0x310] ss:$24 sps:$4 sm:$0xff]   ;;  %v8449_v7 = vld [vmem:[#allocation7 + $0x5dc] ss:$24 sps:$4 sm:$0xff]  }
 0x414   :  { %6151 = vmatprep.mubr.bf16.mxu1 %v10037_v15  ;;  %6490 = vmatprep.mubr.bf16.mxu0 %v10037_v15  ;;  %v8452_v8 = vld [vmem:[#allocation7 + $0x5e4] ss:$24 sps:$4 sm:$0xff]  }
 0x415   :  { %v4018_v13 = vpop.f32.mrf.mxu0  ;;  %6152 = vmatmul.mubr.bf16.gmra.mxu1 %v10039_v55  ;;  %6491 = vmatmul.mubr.bf16.gmra.mxu0 %v10039_v55 }
 0x416   :  { %6334 = vmatpush1.bf16.msra.mxu1 %v8423_v53  ;;  %6673 = vmatpush1.bf16.msra.mxu0 %v8426_v11  ;;  %v8447_v11 = vld [vmem:[#allocation7 + $0x5d8] ss:$24 sps:$4 sm:$0xff]  }
 0x417   :  { %v4020_v12 = vpop.f32.mrf.mxu0  ;;  %6335 = vmatprep.subr.bf16.mxu1 %v8431_v33  ;;  %6674 = vmatprep.subr.bf16.mxu0 %v8434_v42 }
 0x418   :  { %v10047_v57 = vpack.c.bf16 %v4020_v12, %v4016_v35  ;;  %v8450_v35 = vld [vmem:[#allocation7 + $0x5e0] ss:$24 sps:$4 sm:$0xff]  }
 0x419   :  { %v4022_v31 = vpop.f32.mrf.mxu0  ;;  %v8453_v12 = vld [vmem:[#allocation7 + $0x5a8] ss:$24 sps:$4 sm:$0xff]  }
 0x41a   :  { %v10045_v2 = vpack.c.bf16 %v4022_v31, %v4018_v13  ;;  %6336 = vmatpush1.bf16.msra.mxu1 %v8429_v54  ;;  %6675 = vmatpush1.bf16.msra.mxu0 %v8432_v56  ;;  %v8455_v13 = vld [vmem:[#allocation7 + $0x5ac] ss:$24 sps:$4 sm:$0xff]   ;;  %v8461_v31 = vld [vmem:[#allocation7 + $0x57c] ss:$24 sps:$4 sm:$0xff]  }
 0x41b   :  { %v4026_v20 = vpop.f32.mrf.mxu0  ;;  %6337 = vmatprep.subr.bf16.mxu1 %v8437_v25  ;;  %6676 = vmatprep.subr.bf16.mxu0 %v8440_v38  ;;  %v8458_v54 = vld [vmem:[#allocation7 + $0x5b4] ss:$24 sps:$4 sm:$0xff]   ;;  %v8456_v25 = vld [vmem:[#allocation7 + $0x5b0] ss:$24 sps:$4 sm:$0xff]  }
 0x41c   :  { %6161 = vmatprep.mubr.bf16.mxu1 %v10045_v2  ;;  %6500 = vmatprep.mubr.bf16.mxu0 %v10045_v2 }
 0x41d   :  { %v4028_v22 = vpop.f32.mrf.mxu0  ;;  %6162 = vmatmul.mubr.bf16.gmra.mxu1 %v10047_v57  ;;  %6501 = vmatmul.mubr.bf16.gmra.mxu0 %v10047_v57 }
 0x41e   :  { %6338 = vmatpush1.bf16.msra.mxu1 %v8435_v45  ;;  %6677 = vmatpush1.bf16.msra.mxu0 %v8438_v21  ;;  %v8464_v45 = vld [vmem:[#allocation7 + $0x584] ss:$24 sps:$4 sm:$0xff]  }
 0x41f   :  { %v4030_v19 = vpop.f32.mrf.mxu0  ;;  %6339 = vmatprep.subr.bf16.mxu1 %v8443_v48  ;;  %6678 = vmatprep.subr.bf16.mxu0 %v8446_v27  ;;  %v8459_v48 = vld [vmem:[#allocation7 + $0x578] ss:$24 sps:$4 sm:$0xff]  }
 0x420   :  { %v10055_v33 = vpack.c.bf16 %v4030_v19, %v4026_v20  ;;  %v8462_v27 = vld [vmem:[#allocation7 + $0x580] ss:$24 sps:$4 sm:$0xff]   ;;  %v8470_v19 = vld [vmem:[#allocation7 + $0x554] ss:$24 sps:$4 sm:$0xff]  }
 0x421   :  { %v4032_v30 = vpop.f32.mrf.mxu0 }
 0x422   :  { %v10053_v53 = vpack.c.bf16 %v4032_v30, %v4028_v22  ;;  %6340 = vmatpush1.bf16.msra.mxu1 %v8441_v62  ;;  %6679 = vmatpush1.bf16.msra.mxu0 %v8444_v10  ;;  %10871 = vst [vmem:[#allocation18_spill] sm:$0xff] %v10055_v33  ;;  %v8467_v10 = vld [vmem:[#allocation7 + $0x54c] ss:$24 sps:$4 sm:$0xff]   ;;  %v8468_v30 = vld [vmem:[#allocation7 + $0x550] ss:$24 sps:$4 sm:$0xff]  }
 0x423   :  { %v4036_v42 = vpop.f32.mrf.mxu0  ;;  %6341 = vmatprep.subr.bf16.mxu1 %v8449_v7  ;;  %6680 = vmatprep.subr.bf16.mxu0 %v8452_v8  ;;  %v8465_v8 = vld [vmem:[#allocation7 + $0x548] ss:$24 sps:$4 sm:$0xff]  }
 0x424   :  { %6171 = vmatprep.mubr.bf16.mxu1 %v10053_v53  ;;  %6510 = vmatprep.mubr.bf16.mxu0 %v10053_v53 }
 0x425   :  { %v4038_v56 = vpop.f32.mrf.mxu0  ;;  %6172 = vmatmul.mubr.bf16.gmra.mxu1 %v10055_v33  ;;  %6511 = vmatmul.mubr.bf16.gmra.mxu0 %v10055_v33 }
 0x426   :  { %6342 = vmatpush2.bf16.msra.mxu1 %v8447_v11  ;;  %6681 = vmatpush2.bf16.msra.mxu0 %v8450_v35  ;;  %v8473_v35 = vld [vmem:[#allocation7 + $0x51c] ss:$24 sps:$4 sm:$0xff]  }
 0x427   :  { %v4040_v38 = vpop.f32.mrf.mxu0  ;;  %6343 = vmatprep.subr.bf16.mxu1 %v8455_v13  ;;  %6682 = vmatprep.subr.bf16.mxu0 %v8458_v54 }
 0x428   :  { %v10063_v22 = vpack.c.bf16 %v4040_v38, %v4036_v42  ;;  %v8476_v42 = vld [vmem:[#allocation7 + $0x524] ss:$24 sps:$4 sm:$0xff]  }
 0x429   :  { %v4042_v21 = vpop.f32.mrf.mxu0 }
 0x42a   :  { %v10061_v20 = vpack.c.bf16 %v4042_v21, %v4038_v56  ;;  %6344 = vmatpush2.bf16.msra.mxu1 %v8453_v12  ;;  %6683 = vmatpush2.bf16.msra.mxu0 %v8456_v25  ;;  %10873 = vst [vmem:[#allocation28_spill] sm:$0xff] %v10063_v22  ;;  %v8471_v56 = vld [vmem:[#allocation7 + $0x518] ss:$24 sps:$4 sm:$0xff]  }
 0x42b   :  { %v4046_v62 = vpop.f32.mrf.mxu0  ;;  %6345 = vmatprep.subr.bf16.mxu1 %v8461_v31  ;;  %6684 = vmatprep.subr.bf16.mxu0 %v8464_v45  ;;  %v8474_v12 = vld [vmem:[#allocation7 + $0x520] ss:$24 sps:$4 sm:$0xff]   ;;  %v8479_v31 = vld [vmem:[#allocation7 + $0x4ec] ss:$24 sps:$4 sm:$0xff]  }
 0x42c   :  { %10872 = vst [vmem:[#allocation24_spill] sm:$0xff] %v10061_v20  ;;  %6181 = vmatprep.mubr.bf16.mxu1 %v10061_v20  ;;  %6520 = vmatprep.mubr.bf16.mxu0 %v10061_v20  ;;  %v8482_v45 = vld [vmem:[#allocation7 + $0x4f4] ss:$24 sps:$4 sm:$0xff]  }
 0x42d   :  { %v4048_v7 = vpop.f32.mrf.mxu0  ;;  %6182 = vmatmul.mubr.bf16.gmra.mxu1 %v10063_v22  ;;  %6521 = vmatmul.mubr.bf16.gmra.mxu0 %v10063_v22  ;;  %v8524_v20 = vld [vmem:[#allocation7 + $0x2b4] ss:$24 sps:$4 sm:$0xff]  }
 0x42e   :  { %6346 = vmatpush2.bf16.msra.mxu1 %v8459_v48  ;;  %6685 = vmatpush2.bf16.msra.mxu0 %v8462_v27  ;;  %v8477_v48 = vld [vmem:[#allocation7 + $0x4e8] ss:$24 sps:$4 sm:$0xff]  }
 0x42f   :  { %v4050_v11 = vpop.f32.mrf.mxu0  ;;  %6347 = vmatprep.subr.bf16.mxu1 %v8467_v10  ;;  %6686 = vmatprep.subr.bf16.mxu0 %v8470_v19  ;;  %v8480_v27 = vld [vmem:[#allocation7 + $0x4f0] ss:$24 sps:$4 sm:$0xff]   ;;  %v8485_v10 = vld [vmem:[#allocation7 + $0x4bc] ss:$24 sps:$4 sm:$0xff]  }
 0x430   :  { %v10071_v25 = vpack.c.bf16 %v4050_v11, %v4046_v62  ;;  %v8488_v19 = vld [vmem:[#allocation7 + $0x4c4] ss:$24 sps:$4 sm:$0xff]  }
 0x431   :  { %v4052_v13 = vpop.f32.mrf.mxu0 }
 0x432   :  { %v10069_v54 = vpack.c.bf16 %v4052_v13, %v4048_v7  ;;  %6348 = vmatpush2.bf16.msra.mxu1 %v8465_v8  ;;  %6687 = vmatpush2.bf16.msra.mxu0 %v8468_v30  ;;  %10875 = vst [vmem:[#allocation20_spill] sm:$0xff] %v10071_v25  ;;  %v8483_v30 = vld [vmem:[#allocation7 + $0x4b8] ss:$24 sps:$4 sm:$0xff]   ;;  %v8494_v13 = vld [vmem:[#allocation7 + $0x494] ss:$24 sps:$4 sm:$0xff]  }
 0x433   :  { %v4056_v38 = vpop.f32.mrf.mxu0  ;;  %6349 = vmatprep.subr.bf16.mxu1 %v8473_v35  ;;  %6688 = vmatprep.subr.bf16.mxu0 %v8476_v42  ;;  %v8486_v35 = vld [vmem:[#allocation7 + $0x4c0] ss:$24 sps:$4 sm:$0xff]   ;;  %v8491_v42 = vld [vmem:[#allocation7 + $0x48c] ss:$24 sps:$4 sm:$0xff]  }
 0x434   :  { %10874 = vst [vmem:[#allocation22_spill] sm:$0xff] %v10069_v54  ;;  %6191 = vmatprep.mubr.bf16.mxu1 %v10069_v54  ;;  %6530 = vmatprep.mubr.bf16.mxu0 %v10069_v54  ;;  %v8519_v54 = vld [vmem:[#allocation7 + $0x2e0] ss:$24 sps:$4 sm:$0xff]  }
 0x435   :  { %v4058_v21 = vpop.f32.mrf.mxu0  ;;  %6192 = vmatmul.mubr.bf16.gmra.mxu1 %v10071_v25  ;;  %6531 = vmatmul.mubr.bf16.gmra.mxu0 %v10071_v25 }
 0x436   :  { %6350 = vmatpush2.bf16.msra.mxu1 %v8471_v56  ;;  %6689 = vmatpush2.bf16.msra.mxu0 %v8474_v12  ;;  %v8489_v56 = vld [vmem:[#allocation7 + $0x488] ss:$24 sps:$4 sm:$0xff]  }
 0x437   :  { %v4060_v62 = vpop.f32.mrf.mxu0  ;;  %6351 = vmatprep.subr.bf16.mxu1 %v8479_v31  ;;  %6690 = vmatprep.subr.bf16.mxu0 %v8482_v45  ;;  %v8492_v12 = vld [vmem:[#allocation7 + $0x490] ss:$24 sps:$4 sm:$0xff]   ;;  %v8495_v31 = vld [vmem:[#allocation7 + $0x160] ss:$24 sps:$4 sm:$0xff]   ;;  %v8500_v45 = vld [vmem:[#allocation7 + $0x134] ss:$24 sps:$4 sm:$0xff]  }
 0x438   :  { %v10079_v11 = vpack.c.bf16 %v4060_v62, %v4056_v38  ;;  %v8497_v38 = vld [vmem:[#allocation7 + $0x164] ss:$24 sps:$4 sm:$0xff]   ;;  %v10094_v62 = vpop.f32.mrf.mxu1 }
 0x439   :  { %v4062_v7 = vpop.f32.mrf.mxu0 }
 0x43a   :  { %v10077_v8 = vpack.c.bf16 %v4062_v7, %v4058_v21  ;;  %6352 = vmatpush2.bf16.msra.mxu1 %v8477_v48  ;;  %6691 = vmatpush2.bf16.msra.mxu0 %v8480_v27  ;;  %10877 = vst [vmem:[#allocation21_spill] sm:$0xff] %v10079_v11  ;;  %v8498_v48 = vld [vmem:[#allocation7 + $0x130] ss:$24 sps:$4 sm:$0xff]   ;;  %v8503_v27 = vld [vmem:[#allocation7 + $0x104] ss:$24 sps:$4 sm:$0xff]  }
 0x43b   :  { %6353 = vmatprep.subr.bf16.mxu1 %v8485_v10  ;;  %6692 = vmatprep.subr.bf16.mxu0 %v8488_v19  ;;  %v8501_v19 = vld [vmem:[#allocation7 + $0x100] ss:$24 sps:$4 sm:$0xff]  }
 0x43c   :  { %10876 = vst [vmem:[#allocation25_spill] sm:$0xff] %v10077_v8  ;;  %6201 = vmatprep.mubr.bf16.mxu1 %v10077_v8  ;;  %6540 = vmatprep.mubr.bf16.mxu0 %v10077_v8  ;;  %v8518_v8 = vld [vmem:[#allocation7 + $0x14] ss:$24 sps:$4 sm:$0xff]  }
 0x43d   :  { %6202 = vmatmul.mubr.bf16.gmra.mxu1 %v10079_v11  ;;  %6541 = vmatmul.mubr.bf16.gmra.mxu0 %v10079_v11 }
 0x43e   :  { %6354 = vmatpush2.bf16.msra.mxu1 %v8483_v30  ;;  %6357 = vmatprep.mubr.bf16.mxu1 %v9959_v24  ;;  %v8506_v30 = vld [vmem:[#allocation7 + $0xd4] ss:$24 sps:$4 sm:$0xff]  }
 0x43f   :  { %6693 = vmatpush2.bf16.msra.mxu0 %v8486_v35  ;;  %6696 = vmatprep.mubr.bf16.mxu0 %v9959_v24  ;;  %v10101_v35 = vpop.f32.mrf.mxu1 }
 0x440   :  { %6355 = vmatprep.subr.bf16.mxu1 %v8491_v42  ;;  %6694 = vmatprep.subr.bf16.mxu0 %v8494_v13  ;;  %v8504_v42 = vld [vmem:[#allocation7 + $0xd0] ss:$24 sps:$4 sm:$0xff]   ;;  %v8509_v13 = vld [vmem:[#allocation7 + $0xa4] ss:$24 sps:$4 sm:$0xff]  }
 0x442   :  { %6356 = vmatpush2.bf16.msra.mxu1 %v8489_v56  ;;  %v10110_v56 = vpop.f32.mrf.mxu1 }
 0x443   :  { %6695 = vmatpush2.bf16.msra.mxu0 %v8492_v12  ;;  %6551 = vmatprep.subr.bf16.mxu1 %v8497_v38  ;;  %v8507_v38 = vld [vmem:[#allocation7 + $0xa0] ss:$24 sps:$4 sm:$0xff]  }
 0x445   :  { %6358 = vmatmul.mubr.bf16.vlgmr.msra.gmra.mxu1 %v9957_v52  ;;  %v10088_v21 = vpop.f32.mrf.mxu0 }
 0x446   :  { %6367 = vmatprep.mubr.bf16.mxu1 %v9965_v36  ;;  %6552 = vmatpush1.bf16.msra.mxu1 %v8495_v31 }
 0x447   :  { %6697 = vmatmul.mubr.bf16.vlgmr.msra.gmra.mxu0 %v9957_v52  ;;  %v10092_v24 = vpop.f32.mrf.mxu0  ;;  %6553 = vmatprep.subr.bf16.mxu1 %v8500_v45  ;;  %v8512_v45 = vld [vmem:[#allocation7 + $0x74] ss:$24 sps:$4 sm:$0xff]  }
 0x448   :  { %6706 = vmatprep.mubr.bf16.mxu0 %v9965_v36 }
 0x449   :  { %v10097_v10 = vpop.f32.mrf.mxu0 }
 0x44a   :  { %6554 = vmatpush1.bf16.msra.mxu1 %v8498_v48  ;;  %v10117_v48 = vpop.f32.mrf.mxu1 }
 0x44b   :  { %v10099_v7 = vpop.f32.mrf.mxu0  ;;  %6555 = vmatprep.subr.bf16.mxu1 %v8503_v27  ;;  %v8510_v27 = vld [vmem:[#allocation7 + $0x70] ss:$24 sps:$4 sm:$0xff]  }
 0x44d   :  { %6368 = vmatmul.mubr.bf16.gmra.mxu1 %v9963_v6  ;;  %v10104_v52 = vpop.f32.mrf.mxu0 }
 0x44e   :  { %6377 = vmatprep.mubr.bf16.mxu1 %v9971_v26  ;;  %6556 = vmatpush1.bf16.msra.mxu1 %v8501_v19  ;;  %v8515_v19 = vld [vmem:[#allocation7 + $0x44] ss:$24 sps:$4 sm:$0xff]  }
 0x44f   :  { %6707 = vmatmul.mubr.bf16.gmra.mxu0 %v9963_v6  ;;  %v10108_v36 = vpop.f32.mrf.mxu0  ;;  %6557 = vmatprep.subr.bf16.mxu1 %v8506_v30  ;;  %v10126_v30 = vpop.f32.mrf.mxu1 }
 0x450   :  { %6716 = vmatprep.mubr.bf16.mxu0 %v9971_v26 }
 0x451   :  { %v10113_v12 = vpop.f32.mrf.mxu0 }
 0x452   :  { %6558 = vmatpush1.bf16.msra.mxu1 %v8504_v42 }
 0x453   :  { %v10115_v31 = vpop.f32.mrf.mxu0  ;;  %6559 = vmatprep.subr.bf16.mxu1 %v8509_v13  ;;  %v8513_v13 = vld [vmem:[#allocation7 + $0x40] ss:$24 sps:$4 sm:$0xff]  }
 0x455   :  { %6378 = vmatmul.mubr.bf16.gmra.mxu1 %v9969_v39  ;;  %v10120_v6 = vpop.f32.mrf.mxu0 }
 0x456   :  { %6387 = vmatprep.mubr.bf16.mxu1 %v9977_v29  ;;  %6560 = vmatpush1.bf16.msra.mxu1 %v8507_v38  ;;  %v10133_v38 = vpop.f32.mrf.mxu1 }
 0x457   :  { %6717 = vmatmul.mubr.bf16.gmra.mxu0 %v9969_v39  ;;  %v10124_v26 = vpop.f32.mrf.mxu0  ;;  %6561 = vmatprep.subr.bf16.mxu1 %v8512_v45  ;;  %v8516_v45 = vld [vmem:[#allocation7 + $0x10] ss:$24 sps:$4 sm:$0xff]  }
 0x458   :  { %6726 = vmatprep.mubr.bf16.mxu0 %v9977_v29  ;;  %v10142_v25 = vpop.f32.mrf.mxu1 }
 0x459   :  { %v10129_v42 = vpop.f32.mrf.mxu0 }
 0x45a   :  { %6562 = vmatpush1.bf16.msra.mxu1 %v8510_v27  ;;  %v8521_v27 = vld [vmem:[#allocation7 + $0x2e4] ss:$24 sps:$4 sm:$0xff]  }
 0x45b   :  { %v10131_v11 = vpop.f32.mrf.mxu0  ;;  %6563 = vmatprep.subr.bf16.mxu1 %v8515_v19 }
 0x45d   :  { %6388 = vmatmul.mubr.bf16.gmra.mxu1 %v9975_v50  ;;  %v10136_v39 = vpop.f32.mrf.mxu0 }
 0x45e   :  { %6397 = vmatprep.mubr.bf16.mxu1 %v9983_v17  ;;  %6564 = vmatpush1.bf16.msra.mxu1 %v8513_v13  ;;  %v10149_v13 = vpop.f32.mrf.mxu1 }
 0x45f   :  { %6727 = vmatmul.mubr.bf16.gmra.mxu0 %v9975_v50  ;;  %v10140_v29 = vpop.f32.mrf.mxu0  ;;  %6565 = vmatprep.subr.bf16.mxu1 %v8518_v8  ;;  %v8522_v8 = vld [vmem:[#allocation7 + $0x2b0] ss:$24 sps:$4 sm:$0xff]  }
 0x460   :  { %10878 = vst [vmem:[#allocation23_spill] sm:$0xff] %v10140_v29  ;;  %6736 = vmatprep.mubr.bf16.mxu0 %v9983_v17  ;;  %v10158_v33 = vpop.f32.mrf.mxu1 }
 0x461   :  { %v10145_v19 = vpop.f32.mrf.mxu0 }
 0x462   :  { %10879 = vst [vmem:[#allocation12_spill] sm:$0xff] %v10145_v19  ;;  %6566 = vmatpush1.bf16.msra.mxu1 %v8516_v45  ;;  %v8527_v45 = vld [vmem:[#allocation7 + $0x284] ss:$24 sps:$4 sm:$0xff]  }
 0x463   :  { %v10147_v22 = vpop.f32.mrf.mxu0  ;;  %6567 = vmatprep.subr.bf16.mxu1 %v8521_v27 }
 0x464   :  { %10880 = vst [vmem:[#allocation14_spill] sm:$0xff] %v10147_v22  ;;  %v8525_v22 = vld [vmem:[#allocation7 + $0x280] ss:$24 sps:$4 sm:$0xff]  }
 0x465   :  { %6398 = vmatmul.mubr.bf16.gmra.mxu1 %v9981_v5  ;;  %v10152_v50 = vpop.f32.mrf.mxu0 }
 0x466   :  { %10881 = vst [vmem:[#allocation17_spill] sm:$0xff] %v10152_v50  ;;  %6407 = vmatprep.mubr.bf16.mxu1 %v9989_v14  ;;  %6568 = vmatpush2.bf16.msra.mxu1 %v8519_v54  ;;  %v8530_v50 = vld [vmem:[#allocation7 + $0x254] ss:$24 sps:$4 sm:$0xff]   ;;  %v10165_v54 = vpop.f32.mrf.mxu1 }
 0x467   :  { %6737 = vmatmul.mubr.bf16.gmra.mxu0 %v9981_v5  ;;  %v10156_v17 = vpop.f32.mrf.mxu0  ;;  %6569 = vmatprep.subr.bf16.mxu1 %v8524_v20  ;;  %v8528_v20 = vld [vmem:[#allocation7 + $0x250] ss:$24 sps:$4 sm:$0xff]  }
 0x468   :  { %10882 = vst [vmem:[#allocation16_spill] sm:$0xff] %v10156_v17  ;;  %6746 = vmatprep.mubr.bf16.mxu0 %v9989_v14 }
 0x469   :  { %v10161_v27 = vpop.f32.mrf.mxu0 }
 0x46a   :  { %10883 = vst [vmem:[#allocation15_spill] sm:$0xff] %v10161_v27  ;;  %6570 = vmatpush2.bf16.msra.mxu1 %v8522_v8  ;;  %v8533_v8 = vld [vmem:[#allocation7 + $0x224] ss:$24 sps:$4 sm:$0xff]   ;;  %v10174_v27 = vpop.f32.mrf.mxu1 }
 0x46b   :  { %v10163_v19 = vpop.f32.mrf.mxu0  ;;  %6571 = vmatprep.subr.bf16.mxu1 %v8527_v45 }
 0x46c   :  { %10884 = vst [vmem:[#allocation19_spill] sm:$0xff] %v10163_v19  ;;  %v8531_v19 = vld [vmem:[#allocation7 + $0x220] ss:$24 sps:$4 sm:$0xff]  }
 0x46d   :  { %6408 = vmatmul.mubr.bf16.gmra.mxu1 %v9987_v46  ;;  %v10168_v5 = vpop.f32.mrf.mxu0 }
 0x46e   :  { %10885 = vst [vmem:[#allocation27_spill] sm:$0xff] %v10168_v5  ;;  %6417 = vmatprep.mubr.bf16.mxu1 %v9995_v23  ;;  %6572 = vmatpush2.bf16.msra.mxu1 %v8525_v22  ;;  %v8536_v5 = vld [vmem:[#allocation7 + $0x1f4] ss:$24 sps:$4 sm:$0xff]   ;;  %v10181_v22 = vpop.f32.mrf.mxu1 }
 0x46f   :  { %6747 = vmatmul.mubr.bf16.gmra.mxu0 %v9987_v46  ;;  %v10172_v14 = vpop.f32.mrf.mxu0  ;;  %6573 = vmatprep.subr.bf16.mxu1 %v8530_v50  ;;  %v8534_v50 = vld [vmem:[#allocation7 + $0x1f0] ss:$24 sps:$4 sm:$0xff]  }
 0x470   :  { %10886 = vst [vmem:[#allocation26_spill] sm:$0xff] %v10172_v14  ;;  %6756 = vmatprep.mubr.bf16.mxu0 %v9995_v23 }
 0x471   :  { %v10177_v45 = vpop.f32.mrf.mxu0 }
 0x472   :  { %10887 = vst [vmem:[#allocation29_spill] sm:$0xff] %v10177_v45  ;;  %6574 = vmatpush2.bf16.msra.mxu1 %v8528_v20  ;;  %v8539_v20 = vld [vmem:[#allocation7 + $0x1c4] ss:$24 sps:$4 sm:$0xff]   ;;  %v10190_v45 = vpop.f32.mrf.mxu1 }
 0x473   :  { %v10179_v17 = vpop.f32.mrf.mxu0  ;;  %6575 = vmatprep.subr.bf16.mxu1 %v8533_v8 }
 0x474   :  { %10888 = vst [vmem:[#allocation30_spill] sm:$0xff] %v10179_v17  ;;  %v8537_v17 = vld [vmem:[#allocation7 + $0x1c0] ss:$24 sps:$4 sm:$0xff]  }
 0x475   :  { %6418 = vmatmul.mubr.bf16.gmra.mxu1 %v9993_v49  ;;  %v10184_v46 = vpop.f32.mrf.mxu0 }
 0x476   :  { %10889 = vst [vmem:[#allocation31_spill] sm:$0xff] %v10184_v46  ;;  %6427 = vmatprep.mubr.bf16.mxu1 %v10001_v41  ;;  %6576 = vmatpush2.bf16.msra.mxu1 %v8531_v19  ;;  %v8542_v46 = vld [vmem:[#allocation7 + $0x194] ss:$24 sps:$4 sm:$0xff]   ;;  %v10197_v19 = vpop.f32.mrf.mxu1 }
 0x477   :  { %6757 = vmatmul.mubr.bf16.gmra.mxu0 %v9993_v49  ;;  %v10188_v23 = vpop.f32.mrf.mxu0  ;;  %6577 = vmatprep.subr.bf16.mxu1 %v8536_v5  ;;  %v8540_v5 = vld [vmem:[#allocation7 + $0x190] ss:$24 sps:$4 sm:$0xff]  }
 0x478   :  { %10890 = vst [vmem:[#allocation32_spill] sm:$0xff] %v10188_v23  ;;  %6766 = vmatprep.mubr.bf16.mxu0 %v10001_v41 }
 0x479   :  { %v10193_v8 = vpop.f32.mrf.mxu0 }
 0x47a   :  { %10891 = vst [vmem:[#allocation33_spill] sm:$0xff] %v10193_v8  ;;  %6578 = vmatpush2.bf16.msra.mxu1 %v8534_v50  ;;  %v8545_v50 = vld [vmem:[#allocation7 + $0x764] ss:$24 sps:$4 sm:$0xff]   ;;  %v10206_v8 = vpop.f32.mrf.mxu1 }
 0x47b   :  { %v10195_v14 = vpop.f32.mrf.mxu0  ;;  %6579 = vmatprep.subr.bf16.mxu1 %v8539_v20 }
 0x47c   :  { %10892 = vst [vmem:[#allocation34_spill] sm:$0xff] %v10195_v14  ;;  %v8543_v14 = vld [vmem:[#allocation7 + $0x760] ss:$24 sps:$4 sm:$0xff]  }
 0x47d   :  { %6428 = vmatmul.mubr.bf16.gmra.mxu1 %v9999_v40  ;;  %v10200_v49 = vpop.f32.mrf.mxu0 }
 0x47e   :  { %10893 = vst [vmem:[#allocation35_spill] sm:$0xff] %v10200_v49  ;;  %6580 = vmatpush2.bf16.msra.mxu1 %v8537_v17  ;;  %6583 = vmatprep.mubr.bf16.mxu1 %v9898_v1  ;;  %v8548_v49 = vld [vmem:[#allocation7 + $0x734] ss:$24 sps:$4 sm:$0xff]   ;;  %v10212_v17 = vpop.f32.mrf.mxu1 }
 0x47f   :  { %6767 = vmatmul.mubr.bf16.gmra.mxu0 %v9999_v40  ;;  %v10204_v41 = vpop.f32.mrf.mxu0  ;;  %6581 = vmatprep.subr.bf16.mxu1 %v8542_v46  ;;  %v8546_v40 = vld [vmem:[#allocation7 + $0x730] ss:$24 sps:$4 sm:$0xff]  }
 0x480   :  { %10894 = vst [vmem:[#allocation36_spill] sm:$0xff] %v10204_v41 }
 0x481   :  { %v10208_v20 = vpop.f32.mrf.mxu0 }
 0x482   :  { %10895 = vst [vmem:[#allocation37_spill] sm:$0xff] %v10208_v20  ;;  %6582 = vmatpush2.bf16.msra.mxu1 %v8540_v5  ;;  %v8551_v20 = vld [vmem:[#allocation7 + $0x704] ss:$24 sps:$4 sm:$0xff]   ;;  %v10220_v5 = vpop.f32.mrf.mxu1 }
 0x483   :  { %v10210_v23 = vpop.f32.mrf.mxu0  ;;  %6777 = vmatprep.subr.bf16.mxu1 %v8545_v50  ;;  %v8549_v50 = vld [vmem:[#allocation7 + $0x700] ss:$24 sps:$4 sm:$0xff]  }
 0x484   :  { %10896 = vst [vmem:[#allocation38_spill] sm:$0xff] %v10210_v23  ;;  %v10226_v29 = vpop.f32.mrf.mxu1 }
 0x485   :  { %6584 = vmatmul.mubr.bf16.vlgmr.msra.gmra.mxu1 %v9896_v34  ;;  %v10215_v1 = vpop.f32.mrf.mxu0  ;;  %v8554_v34 = vld [vmem:[#allocation7 + $0x6d4] ss:$24 sps:$4 sm:$0xff]  }
 0x486   :  { %10897 = vst [vmem:[#allocation39_spill] sm:$0xff] %v10215_v1  ;;  %6593 = vmatprep.mubr.bf16.mxu1 %v9906_v9  ;;  %6778 = vmatpush1.bf16.msra.mxu1 %v8543_v14  ;;  %v8552_v14 = vld [vmem:[#allocation7 + $0x6d0] ss:$24 sps:$4 sm:$0xff]  }
 0x487   :  { %v10218_v46 = vpop.f32.mrf.mxu0  ;;  %6779 = vmatprep.subr.bf16.mxu1 %v8548_v49 }
 0x488   :  { %10898 = vst [vmem:[#allocation40_spill] sm:$0xff] %v10218_v46 }
 0x489   :  { %v10222_v41 = vpop.f32.mrf.mxu0 }
 0x48a   :  { %10899 = vst [vmem:[#allocation41_spill] sm:$0xff] %v10222_v41  ;;  %6780 = vmatpush1.bf16.msra.mxu1 %v8546_v40  ;;  %v8557_v41 = vld [vmem:[#allocation7 + $0x6a4] ss:$24 sps:$4 sm:$0xff]   ;;  %v10234_v40 = vpop.f32.mrf.mxu1 }
 0x48b   :  { %v10224_v23 = vpop.f32.mrf.mxu0  ;;  %6781 = vmatprep.subr.bf16.mxu1 %v8551_v20  ;;  %v8555_v20 = vld [vmem:[#allocation7 + $0x6a0] ss:$24 sps:$4 sm:$0xff]  }
 0x48c   :  { %10900 = vst [vmem:[#allocation42_spill] sm:$0xff] %v10224_v23  ;;  %v10240_v1 = vpop.f32.mrf.mxu1 }
 0x48d   :  { %6594 = vmatmul.mubr.bf16.gmra.mxu1 %v9904_v3  ;;  %v10229_v9 = vpop.f32.mrf.mxu0  ;;  %v8560_v3 = vld [vmem:[#allocation7 + $0x674] ss:$24 sps:$4 sm:$0xff]  }
 0x48e   :  { %10901 = vst [vmem:[#allocation43_spill] sm:$0xff] %v10229_v9  ;;  %6603 = vmatprep.mubr.bf16.mxu1 %v9914_v59  ;;  %6782 = vmatpush1.bf16.msra.mxu1 %v8549_v50  ;;  %v8558_v50 = vld [vmem:[#allocation7 + $0x670] ss:$24 sps:$4 sm:$0xff]  }
 0x48f   :  { %v10232_v49 = vpop.f32.mrf.mxu0  ;;  %6783 = vmatprep.subr.bf16.mxu1 %v8554_v34 }
 0x490   :  { %10902 = vst [vmem:[#allocation44_spill] sm:$0xff] %v10232_v49 }
 0x491   :  { %v10236_v46 = vpop.f32.mrf.mxu0 }
 0x492   :  { %10903 = vst [vmem:[#allocation45_spill] sm:$0xff] %v10236_v46  ;;  %6784 = vmatpush1.bf16.msra.mxu1 %v8552_v14  ;;  %v8563_v46 = vld [vmem:[#allocation7 + $0x644] ss:$24 sps:$4 sm:$0xff]   ;;  %v10248_v14 = vpop.f32.mrf.mxu1 }
 0x493   :  { %v10238_v23 = vpop.f32.mrf.mxu0  ;;  %6785 = vmatprep.subr.bf16.mxu1 %v8557_v41  ;;  %v8561_v41 = vld [vmem:[#allocation7 + $0x640] ss:$24 sps:$4 sm:$0xff]  }
 0x494   :  { %10904 = vst [vmem:[#allocation46_spill] sm:$0xff] %v10238_v23  ;;  %v10254_v9 = vpop.f32.mrf.mxu1 }
 0x495   :  { %6604 = vmatmul.mubr.bf16.gmra.mxu1 %v9912_v60  ;;  %v10243_v59 = vpop.f32.mrf.mxu0  ;;  %v8566_v60 = vld [vmem:[#allocation7 + $0x614] ss:$24 sps:$4 sm:$0xff]  }
 0x496   :  { %10905 = vst [vmem:[#allocation47_spill] sm:$0xff] %v10243_v59  ;;  %6613 = vmatprep.mubr.bf16.mxu1 %v9922_v4  ;;  %6786 = vmatpush1.bf16.msra.mxu1 %v8555_v20  ;;  %v8564_v20 = vld [vmem:[#allocation7 + $0x610] ss:$24 sps:$4 sm:$0xff]  }
 0x497   :  { %v10246_v34 = vpop.f32.mrf.mxu0  ;;  %6787 = vmatprep.subr.bf16.mxu1 %v8560_v3 }
 0x498   :  { %10906 = vst [vmem:[#allocation48_spill] sm:$0xff] %v10246_v34 }
 0x499   :  { %v10250_v49 = vpop.f32.mrf.mxu0 }
 0x49a   :  { %10907 = vst [vmem:[#allocation49_spill] sm:$0xff] %v10250_v49  ;;  %6788 = vmatpush1.bf16.msra.mxu1 %v8558_v50  ;;  %v8569_v49 = vld [vmem:[#allocation7 + $0x8e4] ss:$24 sps:$4 sm:$0xff]   ;;  %v10262_v50 = vpop.f32.mrf.mxu1 }
 0x49b   :  { %v10252_v23 = vpop.f32.mrf.mxu0  ;;  %6789 = vmatprep.subr.bf16.mxu1 %v8563_v46  ;;  %v8567_v46 = vld [vmem:[#allocation7 + $0x8e0] ss:$24 sps:$4 sm:$0xff]  }
 0x49c   :  { %10908 = vst [vmem:[#allocation50_spill] sm:$0xff] %v10252_v23  ;;  %v10268_v59 = vpop.f32.mrf.mxu1 }
 0x49d   :  { %6614 = vmatmul.mubr.bf16.gmra.mxu1 %v9920_v51  ;;  %v10257_v4 = vpop.f32.mrf.mxu0  ;;  %v8572_v51 = vld [vmem:[#allocation7 + $0x8b4] ss:$24 sps:$4 sm:$0xff]  }
 0x49e   :  { %10909 = vst [vmem:[#allocation51_spill] sm:$0xff] %v10257_v4  ;;  %6623 = vmatprep.mubr.bf16.mxu1 %v9930_v44  ;;  %6790 = vmatpush1.bf16.msra.mxu1 %v8561_v41  ;;  %v8570_v41 = vld [vmem:[#allocation7 + $0x8b0] ss:$24 sps:$4 sm:$0xff]  }
 0x49f   :  { %v10260_v3 = vpop.f32.mrf.mxu0  ;;  %6791 = vmatprep.subr.bf16.mxu1 %v8566_v60 }
 0x4a0   :  { %10910 = vst [vmem:[#allocation52_spill] sm:$0xff] %v10260_v3 }
 0x4a1   :  { %v10264_v34 = vpop.f32.mrf.mxu0 }
 0x4a2   :  { %10911 = vst [vmem:[#allocation53_spill] sm:$0xff] %v10264_v34  ;;  %6792 = vmatpush1.bf16.msra.mxu1 %v8564_v20  ;;  %v8575_v34 = vld [vmem:[#allocation7 + $0x884] ss:$24 sps:$4 sm:$0xff]   ;;  %v10276_v20 = vpop.f32.mrf.mxu1 }
 0x4a3   :  { %v10266_v23 = vpop.f32.mrf.mxu0  ;;  %6793 = vmatprep.subr.bf16.mxu1 %v8569_v49  ;;  %v8573_v49 = vld [vmem:[#allocation7 + $0x880] ss:$24 sps:$4 sm:$0xff]  }
 0x4a4   :  { %10912 = vst [vmem:[#allocation54_spill] sm:$0xff] %v10266_v23  ;;  %v10282_v4 = vpop.f32.mrf.mxu1 }
 0x4a5   :  { %6624 = vmatmul.mubr.bf16.gmra.mxu1 %v9928_v58  ;;  %v10271_v44 = vpop.f32.mrf.mxu0  ;;  %v8578_v58 = vld [vmem:[#allocation7 + $0x854] ss:$24 sps:$4 sm:$0xff]  }
 0x4a6   :  { %10913 = vst [vmem:[#allocation55_spill] sm:$0xff] %v10271_v44  ;;  %6633 = vmatprep.mubr.bf16.mxu1 %v9938_v0  ;;  %6794 = vmatpush2.bf16.msra.mxu1 %v8567_v46  ;;  %v8576_v46 = vld [vmem:[#allocation7 + $0x850] ss:$24 sps:$4 sm:$0xff]  }
 0x4a7   :  { %v10274_v60 = vpop.f32.mrf.mxu0  ;;  %6795 = vmatprep.subr.bf16.mxu1 %v8572_v51 }
 0x4a8   :  { %10914 = vst [vmem:[#allocation56_spill] sm:$0xff] %v10274_v60 }
 0x4a9   :  { %v10278_v3 = vpop.f32.mrf.mxu0 }
 0x4aa   :  { %10915 = vst [vmem:[#allocation57_spill] sm:$0xff] %v10278_v3  ;;  %6796 = vmatpush2.bf16.msra.mxu1 %v8570_v41  ;;  %v8581_v3 = vld [vmem:[#allocation7 + $0x824] ss:$24 sps:$4 sm:$0xff]   ;;  %v10290_v41 = vpop.f32.mrf.mxu1 }
 0x4ab   :  { %v10280_v23 = vpop.f32.mrf.mxu0  ;;  %6797 = vmatprep.subr.bf16.mxu1 %v8575_v34  ;;  %v8579_v34 = vld [vmem:[#allocation7 + $0x820] ss:$24 sps:$4 sm:$0xff]  }
 0x4ac   :  { %10916 = vst [vmem:[#allocation58_spill] sm:$0xff] %v10280_v23  ;;  %v10296_v44 = vpop.f32.mrf.mxu1 }
 0x4ad   :  { %6634 = vmatmul.mubr.bf16.gmra.mxu1 %v9936_v16  ;;  %v10285_v0 = vpop.f32.mrf.mxu0  ;;  %v8584_v16 = vld [vmem:[#allocation7 + $0x7f4] ss:$24 sps:$4 sm:$0xff]  }
 0x4ae   :  { %10917 = vst [vmem:[#allocation59_spill] sm:$0xff] %v10285_v0  ;;  %6643 = vmatprep.mubr.bf16.mxu1 %v9946_v37  ;;  %6798 = vmatpush2.bf16.msra.mxu1 %v8573_v49  ;;  %v8582_v49 = vld [vmem:[#allocation7 + $0x7f0] ss:$24 sps:$4 sm:$0xff]  }
 0x4af   :  { %v10288_v51 = vpop.f32.mrf.mxu0  ;;  %6799 = vmatprep.subr.bf16.mxu1 %v8578_v58 }
 0x4b0   :  { %10918 = vst [vmem:[#allocation60_spill] sm:$0xff] %v10288_v51 }
 0x4b1   :  { %v10292_v60 = vpop.f32.mrf.mxu0 }
 0x4b2   :  { %10919 = vst [vmem:[#allocation61_spill] sm:$0xff] %v10292_v60  ;;  %6800 = vmatpush2.bf16.msra.mxu1 %v8576_v46  ;;  %v10304_v60 = vpop.f32.mrf.mxu1  ;;  %v8587_v46 = vld [vmem:[#allocation7 + $0x7c4] ss:$24 sps:$4 sm:$0xff]  }
 0x4b3   :  { %v10294_v23 = vpop.f32.mrf.mxu0  ;;  %6801 = vmatprep.subr.bf16.mxu1 %v8581_v3  ;;  %10923 = vst [vmem:[#allocation65_spill] sm:$0xff] %v10304_v60  ;;  %v10309_v3 = vld [vmem:[%s10768_s5] sm:$0x3f]  ;;  %s8694_s5 = smov [#allocation8]  }
 0x4b4   :  { %10920 = vst [vmem:[#allocation62_spill] sm:$0xff] %v10294_v23  ;;  %10924 = vst [vmem:[#allocation66_spill] sm:$0xff] %v10309_v3  ;;  %s6991_s8 = sshll.u32 %s8694_s5, 4  ;;  %s6992_s8 = int_to_ptr.vmem [resolvable:$true] %s6991_s8 }
 0x4b5   :  { %6644 = vmatmul.mubr.bf16.gmra.mxu1 %v9944_v32  ;;  %v10299_v37 = vpop.f32.mrf.mxu0  ;;  %v8585_v32 = vld [vmem:[#allocation7 + $0x7c0] ss:$24 sps:$4 sm:$0xff]   ;;  %s8660_s9 = scalar_lea.vmem %s6992_s8, 12288  ;;  %p8665_p2 = scmp.lt.s32.totalorder %s6992_s8, %s6992_s8 }
 0x4b6   :  { %10921 = vst [vmem:[#allocation63_spill] sm:$0xff] %v10299_v37  ;;  %6653 = vmatprep.mubr.bf16.mxu1 %v9953_v47  ;;  %6802 = vmatpush2.bf16.msra.mxu1 %v8579_v34  ;;  %v10315_v47 = vpop.f32.mrf.mxu1  ;;  %v8590_v34 = vld [vmem:[#allocation7 + $0x794] ss:$24 sps:$4 sm:$0xff]   ;;  %p8661_p1 = scmp.ne.s32.totalorder %s6992_s8, %s8660_s9  ;;  %p8666_p3 = scmp.lt.s32.totalorder %s8660_s9, %s8660_s9 }
 0x4b7   :  { %v10302_v58 = vpop.f32.mrf.mxu0  ;;  %6803 = vmatprep.subr.bf16.mxu1 %v8584_v16 }
 0x4b8   :  { %10922 = vst [vmem:[#allocation64_spill] sm:$0xff] %v10302_v58  ;;  %v10927_v58 = vld [vmem:[#allocation13_spill] sm:$0xff]  ;;  %p8667_p4 = por %p8666_p3, %p8665_p2 }
 0x4b9   :  { %v10311_v23 = vpop.f32.mrf.mxu0  ;;  %v10928_v16 = vsub.s32 0, %v10927_v58  ;;  %v10930_v60 = vsub.s32 1, %v10927_v58 }
 0x4ba   :  { %10925 = vst [vmem:[#allocation67_spill] sm:$0xff] %v10311_v23  ;;  %6804 = vmatpush2.bf16.msra.mxu1 %v8582_v49  ;;  %p8668_p5 = pnand %p8667_p4, %p8661_p1 }
 0x4bb   :  { %v10313_v37 = vpop.f32.mrf.mxu0  ;;  %6805 = vmatprep.subr.bf16.mxu1 %v8587_v46  ;;  %v10320_v51 = vrot.slane %v10309_v3, %v10928_v16  ;;  %v10328_v49 = vrot.slane %v10309_v3, %v10930_v60  ;;  %v8588_v46 = vld [vmem:[#allocation7 + $0x790] ss:$24 sps:$4 sm:$0xff]  }
 0x4bc   :  { %10926 = vst [vmem:[#allocation68_spill] sm:$0xff] %v10313_v37  ;;  %v10331_v37 = vpop.f32.mrf.mxu1 }
 0x4bd   :  { %6654 = vmatmul.mubr.bf16.gmra.mxu1 %v9951_v28  ;;  %v10323_v0 = vpop.f32.mrf.mxu0  ;;  %v5908_v16 = vadd.f32 %v10094_v62, %v10320_v51  ;;  %v5914_v62 = vadd.f32 %v10117_v48, %v10328_v49 }
 0x4be   :  { %10929 = vst [vmem:[#allocation13_spill] sm:$0xff] %v10323_v0  ;;  %6806 = vmatpush2.bf16.msra.mxu1 %v8585_v32  ;;  %6809 = vmatprep.mubr.bf16.mxu1 %v10021_v61  ;;  %v5910_v0 = vadd.f32 %v10101_v35, %v10328_v49  ;;  %v10341_v60 = vpop.f32.mrf.mxu1  ;;  %v5912_v61 = vadd.f32 %v10110_v56, %v10320_v51 }
 0x4bf   :  { %v10333_v23 = vpop.f32.mrf.mxu0  ;;  %6807 = vmatprep.subr.bf16.mxu1 %v8590_v34  ;;  %v6021_v3 = vadd.f32 %v10088_v21, %v5908_v16 }
 0x4c0   :  { %10931 = vst [vmem:[#allocation69_spill] sm:$0xff] %v10333_v23  ;;  %v6023_v35 = vadd.f32 %v10092_v24, %v5910_v0  ;;  %v6025_v21 = vadd.f32 %v10097_v10, %v5912_v61  ;;  %v5922_v24 = vadd.f32 %v10142_v25, %v10320_v51  ;;  %v5928_v25 = vadd.f32 %v10158_v33, %v10320_v51 }
 0x4c1   :  { %v10337_v28 = vpop.f32.mrf.mxu0 }
 0x4c2   :  { %10932 = vst [vmem:[#allocation70_spill] sm:$0xff] %v10337_v28  ;;  %6808 = vmatpush2.bf16.msra.mxu1 %v8588_v46 }
 0x4c3   :  { %v10343_v32 = vpop.f32.mrf.mxu0 }
 0x4c4   :  { %10933 = vst [vmem:[#allocation71_spill] sm:$0xff] %v10343_v32  ;;  %v5918_v32 = vadd.f32 %v10126_v30, %v10320_v51 }
 0x4c5   :  { %v6133_v23 = vpop.f32.mrf.mxu1  ;;  %6810 = vmatmul.mubr.bf16.vlgmr.msra.gmra.mxu1 %v10023_v43  ;;  %v10349_v34 = vpop.f32.mrf.mxu0 }
 0x4c6   :  { %10934 = vst [vmem:[#allocation72_spill] sm:$0xff] %v10349_v34  ;;  %v6134_v28 = vadd.f32 %v6133_v23, %v6021_v3  ;;  %6819 = vmatprep.mubr.bf16.mxu1 %v10029_v18  ;;  %v5920_v34 = vadd.f32 %v10133_v38, %v10328_v49  ;;  %v6027_v18 = vadd.f32 %v10099_v7, %v5914_v62 }
 0x4c7   :  { %v6135_v46 = vpop.f32.mrf.mxu1  ;;  %v10358_v43 = vpop.f32.mrf.mxu0  ;;  %v6031_v0 = vadd.f32 %v10104_v52, %v5918_v32  ;;  %v5924_v38 = vadd.f32 %v10149_v13, %v10328_v49  ;;  %v6035_v32 = vadd.f32 %v10113_v12, %v5922_v24  ;;  %v5930_v13 = vadd.f32 %v10165_v54, %v10328_v49 }
 0x4c8   :  { %6890 = vst [vmem:[#allocation8] sm:$0xff] %v6134_v28  ;;  %v6136_v56 = vadd.f32 %v6135_v46, %v6023_v35  ;;  %v6033_v7 = vadd.f32 %v10108_v36, %v5920_v34  ;;  %v5932_v36 = vadd.f32 %v10174_v27, %v10320_v51  ;;  %v6041_v34 = vadd.f32 %v10120_v6, %v5928_v25 }
 0x4c9   :  { %v6137_v16 = vpop.f32.mrf.mxu1  ;;  %v10366_v3 = vpop.f32.mrf.mxu0  ;;  %v5934_v54 = vadd.f32 %v10181_v22, %v10328_v49  ;;  %v5938_v27 = vadd.f32 %v10190_v45, %v10320_v51  ;;  %v5940_v22 = vadd.f32 %v10197_v19, %v10328_v49  ;;  %v5944_v19 = vadd.f32 %v10212_v17, %v10328_v49 }
 0x4ca   :  { %6891 = vst [vmem:[#allocation8 + $0x8] sm:$0xff] %v6136_v56  ;;  %v6138_v48 = vadd.f32 %v6137_v16, %v6025_v21  ;;  %v5950_v17 = vadd.f32 %v10226_v29, %v10328_v49  ;;  %v5954_v29 = vadd.f32 %v10240_v1, %v10328_v49  ;;  %v5960_v1 = vadd.f32 %v10254_v9, %v10328_v49 }
 0x4cb   :  { %v6139_v23 = vpop.f32.mrf.mxu1  ;;  %v10376_v62 = vpop.f32.mrf.mxu0  ;;  %v5964_v9 = vadd.f32 %v10268_v59, %v10328_v49  ;;  %v5970_v59 = vadd.f32 %v10282_v4, %v10328_v49  ;;  %v5974_v4 = vadd.f32 %v10296_v44, %v10328_v49  ;;  %v5980_v44 = vadd.f32 %v10315_v47, %v10328_v49 }
 0x4cc   :  { %6896 = vst [vmem:[#allocation8 + $0x30] sm:$0xff] %v6138_v48  ;;  %v6140_v30 = vadd.f32 %v6139_v23, %v6027_v18  ;;  %v6045_v48 = vadd.f32 %v10129_v42, %v5932_v36  ;;  %v5984_v47 = vadd.f32 %v10341_v60, %v10328_v49 }
 0x4cd   :  { %v6143_v10 = vpop.f32.mrf.mxu1  ;;  %6820 = vmatmul.mubr.bf16.gmra.mxu1 %v10031_v63  ;;  %v10384_v56 = vpop.f32.mrf.mxu0 }
 0x4ce   :  { %6897 = vst [vmem:[#allocation8 + $0x38] sm:$0xff] %v6140_v30  ;;  %v6144_v28 = vadd.f32 %v6143_v10, %v6031_v0  ;;  %6829 = vmatprep.mubr.bf16.mxu1 %v10037_v15  ;;  %v6037_v15 = vadd.f32 %v10115_v31, %v5924_v38  ;;  %v6043_v31 = vadd.f32 %v10124_v26, %v5930_v13 }
 0x4cf   :  { %v6145_v61 = vpop.f32.mrf.mxu1  ;;  %v10394_v18 = vpop.f32.mrf.mxu0  ;;  %v5942_v26 = vadd.f32 %v10206_v8, %v10320_v51  ;;  %v6051_v30 = vadd.f32 %v10136_v39, %v5938_v27  ;;  %v5948_v8 = vadd.f32 %v10220_v5, %v10320_v51  ;;  %v5952_v13 = vadd.f32 %v10234_v40, %v10320_v51  ;;  %v10942_v27 = vld [vmem:[#allocation15_spill] sm:$0xff] }
 0x4d0   :  { %6902 = vst [vmem:[#allocation8 + $0x60] sm:$0xff] %v6144_v28  ;;  %v6146_v52 = vadd.f32 %v6145_v61, %v6033_v7  ;;  %v10936_v7 = vld [vmem:[#allocation12_spill] sm:$0xff]  ;;  %v5958_v40 = vadd.f32 %v10248_v14, %v10320_v51 }
 0x4d1   :  { %v6147_v63 = vpop.f32.mrf.mxu1  ;;  %v10402_v0 = vpop.f32.mrf.mxu0  ;;  %v6055_v61 = vadd.f32 %v10936_v7, %v5942_v26  ;;  %v5962_v26 = vadd.f32 %v10262_v50, %v10320_v51  ;;  %v5968_v50 = vadd.f32 %v10276_v20, %v10320_v51 }
 0x4d2   :  { %6903 = vst [vmem:[#allocation8 + $0x68] sm:$0xff] %v6146_v52  ;;  %v6148_v35 = vadd.f32 %v6147_v63, %v6035_v32  ;;  %v10937_v32 = vld [vmem:[#allocation14_spill] sm:$0xff] }
 0x4d3   :  { %v6149_v46 = vpop.f32.mrf.mxu1  ;;  %v10412_v25 = vpop.f32.mrf.mxu0 }
 0x4d4   :  { %6908 = vst [vmem:[#allocation8 + $0x90] sm:$0xff] %v6148_v35  ;;  %v6150_v33 = vadd.f32 %v6149_v46, %v6037_v15  ;;  %v10938_v35 = vld [vmem:[#allocation17_spill] sm:$0xff] }
 0x4d5   :  { %v6153_v12 = vpop.f32.mrf.mxu1  ;;  %6830 = vmatmul.mubr.bf16.gmra.mxu1 %v10039_v55  ;;  %v6061_v15 = vadd.f32 %v10938_v35, %v5948_v8  ;;  %v10420_v46 = vpop.f32.mrf.mxu0  ;;  %v10950_v35 = vld [vmem:[#allocation31_spill] sm:$0xff] }
 0x4d6   :  { %6909 = vst [vmem:[#allocation8 + $0x98] sm:$0xff] %v6150_v33  ;;  %v6154_v21 = vadd.f32 %v6153_v12, %v6041_v34  ;;  %6839 = vmatprep.mubr.bf16.mxu1 %v10045_v2  ;;  %v6047_v2 = vadd.f32 %v10131_v11, %v5934_v54  ;;  %v10935_v11 = vld [vmem:[#allocation23_spill] sm:$0xff]  ;;  %v10939_v33 = vld [vmem:[#allocation18_spill] sm:$0xff]  ;;  %v10940_v12 = vld [vmem:[#allocation24_spill] sm:$0xff] }
 0x4d7   :  { %v6155_v16 = vpop.f32.mrf.mxu1  ;;  %v6053_v38 = vadd.f32 %v10935_v11, %v5940_v22  ;;  %v10941_v54 = vld [vmem:[#allocation16_spill] sm:$0xff] }
 0x4d8   :  { %6914 = vst [vmem:[#allocation8 + $0xc0] sm:$0xff] %v6154_v21  ;;  %v6156_v6 = vadd.f32 %v6155_v16, %v6043_v31  ;;  %v6063_v21 = vadd.f32 %v10941_v54, %v5950_v17  ;;  %v10953_v54 = vld [vmem:[#allocation32_spill] sm:$0xff] }
 0x4d9   :  { %v6157_v55 = vpop.f32.mrf.mxu1 }
 0x4da   :  { %6915 = vst [vmem:[#allocation8 + $0xc8] sm:$0xff] %v6156_v6  ;;  %v6158_v23 = vadd.f32 %v6157_v55, %v6045_v48  ;;  %v6065_v6 = vadd.f32 %v10942_v27, %v5952_v13  ;;  %v10430_v48 = vpop.f32.mrf.mxu0  ;;  %v10955_v27 = vld [vmem:[#allocation33_spill] sm:$0xff] }
 0x4db   :  { %v6159_v24 = vpop.f32.mrf.mxu1 }
 0x4dc   :  { %6920 = vst [vmem:[#allocation8 + $0xf0] sm:$0xff] %v6158_v23  ;;  %v6160_v45 = vadd.f32 %v6159_v24, %v6047_v2  ;;  %v10943_v23 = vld [vmem:[#allocation19_spill] sm:$0xff] }
 0x4dd   :  { %v6163_v42 = vpop.f32.mrf.mxu1  ;;  %6840 = vmatmul.mubr.bf16.gmra.mxu1 %v10047_v57  ;;  %v6067_v2 = vadd.f32 %v10943_v23, %v5954_v29  ;;  %v10951_v29 = vld [vmem:[#allocation20_spill] sm:$0xff]  ;;  %v10956_v23 = vld [vmem:[#allocation34_spill] sm:$0xff] }
 0x4de   :  { %6921 = vst [vmem:[#allocation8 + $0xf8] sm:$0xff] %v6160_v45  ;;  %v6164_v10 = vadd.f32 %v6163_v42, %v6051_v30  ;;  %6849 = vmatprep.mubr.bf16.mxu1 %v10053_v53  ;;  %v6057_v53 = vadd.f32 %v10937_v32, %v5944_v19  ;;  %v10944_v45 = vld [vmem:[#allocation27_spill] sm:$0xff]  ;;  %v10438_v42 = vpop.f32.mrf.mxu0 }
 0x4df   :  { %v6165_v28 = vpop.f32.mrf.mxu1  ;;  %v6071_v30 = vadd.f32 %v10944_v45, %v5958_v40  ;;  %v10957_v45 = vld [vmem:[#allocation35_spill] sm:$0xff] }
 0x4e0   :  { %6926 = vst [vmem:[#allocation8 + $0x120] sm:$0xff] %v6164_v10  ;;  %v6166_v39 = vadd.f32 %v6165_v28, %v6053_v38  ;;  %v10945_v10 = vld [vmem:[#allocation28_spill] sm:$0xff]  ;;  %v10946_v38 = vld [vmem:[#allocation22_spill] sm:$0xff]  ;;  %v10448_v17 = vpop.f32.mrf.mxu0 }
 0x4e1   :  { %v6167_v57 = vpop.f32.mrf.mxu1  ;;  %v10947_v28 = vld [vmem:[#allocation26_spill] sm:$0xff] }
 0x4e2   :  { %6927 = vst [vmem:[#allocation8 + $0x128] sm:$0xff] %v6166_v39  ;;  %v6168_v52 = vadd.f32 %v6167_v57, %v6055_v61  ;;  %v6073_v8 = vadd.f32 %v10947_v28, %v5960_v1  ;;  %v10948_v61 = vld [vmem:[#allocation29_spill] sm:$0xff] }
 0x4e3   :  { %v6169_v63 = vpop.f32.mrf.mxu1  ;;  %v6075_v57 = vadd.f32 %v10948_v61, %v5962_v26  ;;  %v5982_v26 = vadd.f32 %v10331_v37, %v10320_v51 }
 0x4e4   :  { %6932 = vst [vmem:[#allocation8 + $0x150] sm:$0xff] %v6168_v52  ;;  %v6170_v5 = vadd.f32 %v6169_v63, %v6057_v53  ;;  %v10949_v53 = vld [vmem:[#allocation30_spill] sm:$0xff] }
 0x4e5   :  { %v6173_v36 = vpop.f32.mrf.mxu1  ;;  %6850 = vmatmul.mubr.bf16.gmra.mxu1 %v10939_v33  ;;  %v6077_v63 = vadd.f32 %v10949_v53, %v5964_v9  ;;  %v10958_v9 = vld [vmem:[#allocation21_spill] sm:$0xff] }
 0x4e6   :  { %6933 = vst [vmem:[#allocation8 + $0x158] sm:$0xff] %v6170_v5  ;;  %v6174_v34 = vadd.f32 %v6173_v36, %v6061_v15  ;;  %6859 = vmatprep.mubr.bf16.mxu1 %v10940_v12  ;;  %v5972_v5 = vadd.f32 %v10290_v41, %v10320_v51  ;;  %v6081_v15 = vadd.f32 %v10950_v35, %v5968_v50  ;;  %v10456_v36 = vpop.f32.mrf.mxu0  ;;  %v10952_v12 = vld [vmem:[#allocation25_spill] sm:$0xff] }
 0x4e7   :  { %v6175_v31 = vpop.f32.mrf.mxu1  ;;  %v10954_v41 = vld [vmem:[#allocation65_spill] sm:$0xff] }
 0x4e8   :  { %6938 = vst [vmem:[#allocation8 + $0x180] sm:$0xff] %v6174_v34  ;;  %v6176_v16 = vadd.f32 %v6175_v31, %v6063_v21  ;;  %v6083_v21 = vadd.f32 %v10953_v54, %v5970_v59  ;;  %v5978_v40 = vadd.f32 %v10954_v41, %v10320_v51  ;;  %v10961_v51 = vld [vmem:[#allocation66_spill] sm:$0xff]  ;;  %v10963_v59 = vsub.s32 3, %v10927_v58 }
 0x4e9   :  { %v6177_v55 = vpop.f32.mrf.mxu1 }
 0x4ea   :  { %6939 = vst [vmem:[#allocation8 + $0x188] sm:$0xff] %v6176_v16  ;;  %v6178_v22 = vadd.f32 %v6177_v55, %v6065_v6  ;;  %v6085_v6 = vadd.f32 %v10955_v27, %v5972_v5  ;;  %v10466_v55 = vpop.f32.mrf.mxu0  ;;  %v10491_v49 = vrot.slane %v10961_v51, %v10963_v59  ;;  %v10969_v27 = vld [vmem:[#allocation42_spill] sm:$0xff]  ;;  %v10974_v59 = vld [vmem:[#allocation47_spill] sm:$0xff] }
 0x4eb   :  { %v6179_v24 = vpop.f32.mrf.mxu1 }
 0x4ec   :  { %6944 = vst [vmem:[#allocation8 + $0x1b0] sm:$0xff] %v6178_v22  ;;  %v6180_v14 = vadd.f32 %v6179_v24, %v6067_v2  ;;  %v6087_v2 = vadd.f32 %v10956_v23, %v5974_v4  ;;  %v10970_v23 = vld [vmem:[#allocation43_spill] sm:$0xff] }
 0x4ed   :  { %v6183_v19 = vpop.f32.mrf.mxu1  ;;  %6860 = vmatmul.mubr.bf16.gmra.mxu1 %v10945_v10 }
 0x4ee   :  { %6945 = vst [vmem:[#allocation8 + $0x1b8] sm:$0xff] %v6180_v14  ;;  %v6184_v11 = vadd.f32 %v6183_v19, %v6071_v30  ;;  %6869 = vmatprep.mubr.bf16.mxu1 %v10946_v38  ;;  %v6091_v30 = vadd.f32 %v10957_v45, %v5978_v40  ;;  %v10474_v19 = vpop.f32.mrf.mxu0  ;;  %v10959_v38 = vld [vmem:[#allocation36_spill] sm:$0xff] }
 0x4ef   :  { %v6185_v39 = vpop.f32.mrf.mxu1  ;;  %v6093_v28 = vadd.f32 %v10959_v38, %v5980_v44 }
 0x4f0   :  { %6950 = vst [vmem:[#allocation8 + $0x1e0] sm:$0xff] %v6184_v11  ;;  %v6186_v7 = vadd.f32 %v6185_v39, %v6073_v8  ;;  %v10960_v39 = vsub.s32 2, %v10927_v58 }
 0x4f1   :  { %v6187_v52 = vpop.f32.mrf.mxu1 }
 0x4f2   :  { %6951 = vst [vmem:[#allocation8 + $0x1e8] sm:$0xff] %v6186_v7  ;;  %v6188_v32 = vadd.f32 %v6187_v52, %v6075_v57  ;;  %v10483_v37 = vrot.slane %v10961_v51, %v10960_v39  ;;  %v10962_v7 = vld [vmem:[#allocation37_spill] sm:$0xff]  ;;  %v10486_v57 = vpop.f32.mrf.mxu0 }
 0x4f3   :  { %v6189_v13 = vpop.f32.mrf.mxu1  ;;  %v6095_v61 = vadd.f32 %v10962_v7, %v5982_v26 }
 0x4f4   :  { %6956 = vst [vmem:[#allocation8 + $0x210] sm:$0xff] %v6188_v32  ;;  %v6190_v20 = vadd.f32 %v6189_v13, %v6077_v63  ;;  %v10964_v32 = vld [vmem:[#allocation38_spill] sm:$0xff]  ;;  %v10965_v13 = vld [vmem:[#allocation39_spill] sm:$0xff]  ;;  %v10496_v35 = vpop.f32.mrf.mxu0 }
 0x4f5   :  { %v6193_v33 = vpop.f32.mrf.mxu1  ;;  %6870 = vmatmul.mubr.bf16.gmra.mxu1 %v10951_v29  ;;  %v6097_v53 = vadd.f32 %v10964_v32, %v5984_v47  ;;  %v6247_v5 = vadd.f32 %v10965_v13, %v10483_v37  ;;  %v10975_v13 = vld [vmem:[#allocation48_spill] sm:$0xff] }
 0x4f6   :  { %6957 = vst [vmem:[#allocation8 + $0x218] sm:$0xff] %v6190_v20  ;;  %v6194_v34 = vadd.f32 %v6193_v33, %v6081_v15  ;;  %6879 = vmatprep.mubr.bf16.mxu1 %v10952_v12  ;;  %v10966_v33 = vld [vmem:[#allocation40_spill] sm:$0xff]  ;;  %v10967_v12 = vld [vmem:[#allocation41_spill] sm:$0xff]  ;;  %v10503_v40 = vpop.f32.mrf.mxu0 }
 0x4f7   :  { %v6195_v31 = vpop.f32.mrf.mxu1  ;;  %v6249_v29 = vadd.f32 %v10966_v33, %v10491_v49  ;;  %v6251_v54 = vadd.f32 %v10967_v12, %v10483_v37  ;;  %v10976_v33 = vld [vmem:[#allocation49_spill] sm:$0xff] }
 0x4f8   :  { %6962 = vst [vmem:[#allocation8 + $0x240] sm:$0xff] %v6194_v34  ;;  %v6196_v16 = vadd.f32 %v6195_v31, %v6083_v21  ;;  %v10968_v21 = vld [vmem:[#allocation72_spill] sm:$0xff] }
 0x4f9   :  { %v6197_v1 = vpop.f32.mrf.mxu1 }
 0x4fa   :  { %6963 = vst [vmem:[#allocation8 + $0x248] sm:$0xff] %v6196_v16  ;;  %v6198_v22 = vadd.f32 %v6197_v1, %v6085_v6  ;;  %v6253_v6 = vadd.f32 %v10969_v27, %v10491_v49 }
 0x4fb   :  { %v6199_v24 = vpop.f32.mrf.mxu1 }
 0x4fc   :  { %6968 = vst [vmem:[#allocation8 + $0x270] sm:$0xff] %v6198_v22  ;;  %v6200_v14 = vadd.f32 %v6199_v24, %v6087_v2  ;;  %v6257_v2 = vadd.f32 %v10970_v23, %v10483_v37 }
 0x4fd   :  { %v6203_v10 = vpop.f32.mrf.mxu1  ;;  %6880 = vmatmul.mubr.bf16.gmra.mxu1 %v10958_v9 }
 0x4fe   :  { %6969 = vst [vmem:[#allocation8 + $0x278] sm:$0xff] %v6200_v14  ;;  %v6204_v11 = vadd.f32 %v6203_v10, %v6091_v30  ;;  %v10511_v14 = vpop.f32.mrf.mxu0  ;;  %v10971_v30 = vld [vmem:[#allocation44_spill] sm:$0xff] }
 0x4ff   :  { %v6205_v8 = vpop.f32.mrf.mxu1  ;;  %v6259_v10 = vadd.f32 %v10971_v30, %v10491_v49 }
 0x500   :  { %6974 = vst [vmem:[#allocation8 + $0x2a0] sm:$0xff] %v6204_v11  ;;  %v6206_v50 = vadd.f32 %v6205_v8, %v6093_v28  ;;  %v10972_v11 = vld [vmem:[#allocation45_spill] sm:$0xff] }
 0x501   :  { %v6207_v52 = vpop.f32.mrf.mxu1  ;;  %v6261_v38 = vadd.f32 %v10972_v11, %v10483_v37 }
 0x502   :  { %6975 = vst [vmem:[#allocation8 + $0x2a8] sm:$0xff] %v6206_v50  ;;  %v6208_v60 = vadd.f32 %v6207_v52, %v6095_v61  ;;  %v10973_v50 = vld [vmem:[#allocation46_spill] sm:$0xff] }
 0x503   :  { %v6209_v63 = vpop.f32.mrf.mxu1  ;;  %v6263_v7 = vadd.f32 %v10973_v50, %v10491_v49 }
 0x504   :  { %6980 = vst [vmem:[#allocation8 + $0x2d0] sm:$0xff] %v6208_v60  ;;  %v6210_v20 = vadd.f32 %v6209_v63, %v6097_v53  ;;  %v6267_v60 = vadd.f32 %v10974_v59, %v10483_v37 }
 0x505   :  { %v6359_v15 = vpop.f32.mrf.mxu1 }
 0x506   :  { %6981 = vst [vmem:[#allocation8 + $0x2d8] sm:$0xff] %v6210_v20  ;;  %v6360_v4 = vadd.f32 %v6359_v15, %v6247_v5  ;;  %v6269_v5 = vadd.f32 %v10975_v13, %v10491_v49 }
 0x507   :  { %v6361_v34 = vpop.f32.mrf.mxu1 }
 0x508   :  { %v6473_v31 = vadd.f32 %v10968_v21, %v6360_v4  ;;  %v6362_v41 = vadd.f32 %v6361_v34, %v6249_v29  ;;  %v6271_v29 = vadd.f32 %v10976_v33, %v10483_v37 }
 0x509   :  { %v6363_v16 = vpop.f32.mrf.mxu1 }
 0x50a   :  { %6892 = vst [vmem:[#allocation8 + $0x10] sm:$0xff] %v6473_v31  ;;  %v6475_v1 = vadd.f32 %v10358_v43, %v6362_v41  ;;  %v6364_v44 = vadd.f32 %v6363_v16, %v6251_v54  ;;  %v10977_v54 = vld [vmem:[#allocation50_spill] sm:$0xff]  ;;  %v10978_v16 = vld [vmem:[#allocation51_spill] sm:$0xff] }
 0x50b   :  { %v6365_v22 = vpop.f32.mrf.mxu1  ;;  %v6273_v21 = vadd.f32 %v10977_v54, %v10491_v49  ;;  %v6277_v27 = vadd.f32 %v10978_v16, %v10483_v37  ;;  %v10987_v54 = vld [vmem:[#allocation60_spill] sm:$0xff] }
 0x50c   :  { %6893 = vst [vmem:[#allocation8 + $0x18] sm:$0xff] %v6475_v1  ;;  %v6477_v24 = vadd.f32 %v10366_v3, %v6364_v44  ;;  %v6366_v26 = vadd.f32 %v6365_v22, %v6253_v6  ;;  %v10519_v3 = vpop.f32.mrf.mxu0  ;;  %v10979_v22 = vld [vmem:[#allocation52_spill] sm:$0xff] }
 0x50d   :  { %v6369_v45 = vpop.f32.mrf.mxu1  ;;  %v6279_v23 = vadd.f32 %v10979_v22, %v10491_v49 }
 0x50e   :  { %6898 = vst [vmem:[#allocation8 + $0x40] sm:$0xff] %v6477_v24  ;;  %v6479_v9 = vadd.f32 %v10376_v62, %v6366_v26  ;;  %v6370_v47 = vadd.f32 %v6369_v45, %v6257_v2  ;;  %v10980_v26 = vld [vmem:[#allocation53_spill] sm:$0xff] }
 0x50f   :  { %v6371_v43 = vpop.f32.mrf.mxu1  ;;  %v6281_v45 = vadd.f32 %v10980_v26, %v10483_v37 }
 0x510   :  { %6899 = vst [vmem:[#allocation8 + $0x48] sm:$0xff] %v6479_v9  ;;  %v6483_v28 = vadd.f32 %v10384_v56, %v6370_v47  ;;  %v6372_v8 = vadd.f32 %v6371_v43, %v6259_v10  ;;  %v10527_v56 = vpop.f32.mrf.mxu0  ;;  %v10981_v47 = vld [vmem:[#allocation54_spill] sm:$0xff] }
 0x511   :  { %v6373_v39 = vpop.f32.mrf.mxu1  ;;  %v6283_v43 = vadd.f32 %v10981_v47, %v10491_v49 }
 0x512   :  { %6904 = vst [vmem:[#allocation8 + $0x70] sm:$0xff] %v6483_v28  ;;  %v6485_v61 = vadd.f32 %v10394_v18, %v6372_v8  ;;  %v6374_v52 = vadd.f32 %v6373_v39, %v6261_v38 }
 0x513   :  { %v6375_v62 = vpop.f32.mrf.mxu1 }
 0x514   :  { %6905 = vst [vmem:[#allocation8 + $0x78] sm:$0xff] %v6485_v61  ;;  %v6487_v32 = vadd.f32 %v10402_v0, %v6374_v52  ;;  %v6376_v53 = vadd.f32 %v6375_v62, %v6263_v7  ;;  %v10535_v0 = vpop.f32.mrf.mxu0  ;;  %v10983_v61 = vld [vmem:[#allocation56_spill] sm:$0xff] }
 0x515   :  { %v6379_v63 = vpop.f32.mrf.mxu1  ;;  %v6289_v52 = vadd.f32 %v10983_v61, %v10491_v49 }
 0x516   :  { %6910 = vst [vmem:[#allocation8 + $0xa0] sm:$0xff] %v6487_v32  ;;  %v6489_v20 = vadd.f32 %v10412_v25, %v6376_v53  ;;  %v6380_v15 = vadd.f32 %v6379_v63, %v6267_v60 }
 0x517   :  { %v6381_v18 = vpop.f32.mrf.mxu1 }
 0x518   :  { %6911 = vst [vmem:[#allocation8 + $0xa8] sm:$0xff] %v6489_v20  ;;  %v6493_v4 = vadd.f32 %v10420_v46, %v6380_v15  ;;  %v6382_v34 = vadd.f32 %v6381_v18, %v6269_v5  ;;  %v10543_v46 = vpop.f32.mrf.mxu0  ;;  %v10985_v5 = vld [vmem:[#allocation58_spill] sm:$0xff] }
 0x519   :  { %v6383_v12 = vpop.f32.mrf.mxu1  ;;  %v6293_v20 = vadd.f32 %v10985_v5, %v10491_v49 }
 0x51a   :  { %6916 = vst [vmem:[#allocation8 + $0xd0] sm:$0xff] %v6493_v4  ;;  %v6495_v31 = vadd.f32 %v10430_v48, %v6382_v34  ;;  %v6384_v41 = vadd.f32 %v6383_v12, %v6271_v29 }
 0x51b   :  { %v6385_v25 = vpop.f32.mrf.mxu1 }
 0x51c   :  { %6917 = vst [vmem:[#allocation8 + $0xd8] sm:$0xff] %v6495_v31  ;;  %v6497_v6 = vadd.f32 %v10438_v42, %v6384_v41  ;;  %v6386_v1 = vadd.f32 %v6385_v25, %v6273_v21  ;;  %v6528_v42 = vpop.f32.mrf.mxu0  ;;  %v6299_v21 = vadd.f32 %v10987_v54, %v10491_v49 }
 0x51d   :  { %v6389_v44 = vpop.f32.mrf.mxu1 }
 0x51e   :  { %6922 = vst [vmem:[#allocation8 + $0x100] sm:$0xff] %v6497_v6  ;;  %v6499_v2 = vadd.f32 %v10448_v17, %v6386_v1  ;;  %v6390_v24 = vadd.f32 %v6389_v44, %v6277_v27  ;;  %v10982_v17 = vld [vmem:[#allocation55_spill] sm:$0xff]  ;;  %v6532_v7 = vpop.f32.mrf.mxu0  ;;  %v10989_v44 = vld [vmem:[#allocation62_spill] sm:$0xff] }
 0x51f   :  { %v6391_v48 = vpop.f32.mrf.mxu1  ;;  %v6287_v8 = vadd.f32 %v10982_v17, %v10483_v37  ;;  %v6303_v22 = vadd.f32 %v10989_v44, %v10491_v49 }
 0x520   :  { %6923 = vst [vmem:[#allocation8 + $0x108] sm:$0xff] %v6499_v2  ;;  %v6503_v30 = vadd.f32 %v10456_v36, %v6390_v24  ;;  %v6392_v10 = vadd.f32 %v6391_v48, %v6279_v23  ;;  %v6534_v13 = vpop.f32.mrf.mxu0 }
 0x521   :  { %v6393_v9 = vpop.f32.mrf.mxu1 }
 0x522   :  { %6928 = vst [vmem:[#allocation8 + $0x130] sm:$0xff] %v6503_v30  ;;  %v6505_v11 = vadd.f32 %v10466_v55, %v6392_v10  ;;  %v6394_v38 = vadd.f32 %v6393_v9, %v6281_v45  ;;  %v10984_v55 = vld [vmem:[#allocation57_spill] sm:$0xff]  ;;  %v6536_v12 = vpop.f32.mrf.mxu0  ;;  %v10991_v10 = vld [vmem:[#allocation64_spill] sm:$0xff] }
 0x523   :  { %v6395_v28 = vpop.f32.mrf.mxu1  ;;  %v6291_v32 = vadd.f32 %v10984_v55, %v10483_v37  ;;  %v6309_v9 = vadd.f32 %v10991_v10, %v10491_v49 }
 0x524   :  { %6929 = vst [vmem:[#allocation8 + $0x138] sm:$0xff] %v6505_v11  ;;  %v6507_v39 = vadd.f32 %v10474_v19, %v6394_v38  ;;  %v6396_v50 = vadd.f32 %v6395_v28, %v6283_v43  ;;  %v6538_v1 = vpop.f32.mrf.mxu0 }
 0x525   :  { %v6399_v36 = vpop.f32.mrf.mxu1 }
 0x526   :  { %6934 = vst [vmem:[#allocation8 + $0x160] sm:$0xff] %v6507_v39  ;;  %v6509_v62 = vadd.f32 %v10486_v57, %v6396_v50  ;;  %v6400_v59 = vadd.f32 %v6399_v36, %v6287_v8  ;;  %v10986_v57 = vld [vmem:[#allocation59_spill] sm:$0xff]  ;;  %v6542_v30 = vpop.f32.mrf.mxu0 }
 0x527   :  { %v6401_v60 = vpop.f32.mrf.mxu1  ;;  %v6297_v29 = vadd.f32 %v10986_v57, %v10483_v37 }
 0x528   :  { %6935 = vst [vmem:[#allocation8 + $0x168] sm:$0xff] %v6509_v62  ;;  %v6513_v53 = vadd.f32 %v10496_v35, %v6400_v59  ;;  %v6402_v63 = vadd.f32 %v6401_v60, %v6289_v52  ;;  %v6544_v8 = vpop.f32.mrf.mxu0  ;;  %v10994_v62 = vld [vmem:[#allocation13_spill] sm:$0xff] }
 0x529   :  { %v6403_v19 = vpop.f32.mrf.mxu1 }
 0x52a   :  { %6940 = vst [vmem:[#allocation8 + $0x190] sm:$0xff] %v6513_v53  ;;  %v6515_v15 = vadd.f32 %v10503_v40, %v6402_v63  ;;  %v6404_v18 = vadd.f32 %v6403_v19, %v6291_v32  ;;  %v10988_v40 = vld [vmem:[#allocation61_spill] sm:$0xff]  ;;  %v6546_v55 = vpop.f32.mrf.mxu0 }
 0x52b   :  { %v6405_v33 = vpop.f32.mrf.mxu1  ;;  %v6301_v16 = vadd.f32 %v10988_v40, %v10483_v37 }
 0x52c   :  { %6941 = vst [vmem:[#allocation8 + $0x198] sm:$0xff] %v6515_v15  ;;  %v6517_v4 = vadd.f32 %v10511_v14, %v6404_v18  ;;  %v6406_v34 = vadd.f32 %v6405_v33, %v6293_v20  ;;  %v10996_v20 = vld [vmem:[#allocation70_spill] sm:$0xff]  ;;  %v6548_v33 = vpop.f32.mrf.mxu0 }
 0x52d   :  { %v6409_v35 = vpop.f32.mrf.mxu1 }
 0x52e   :  { %6946 = vst [vmem:[#allocation8 + $0x1c0] sm:$0xff] %v6517_v4  ;;  %v6519_v31 = vadd.f32 %v10519_v3, %v6406_v34  ;;  %v6410_v41 = vadd.f32 %v6409_v35, %v6297_v29  ;;  %v10990_v3 = vld [vmem:[#allocation63_spill] sm:$0xff] }
 0x52f   :  { %v6411_v25 = vpop.f32.mrf.mxu1  ;;  %v6307_v48 = vadd.f32 %v10990_v3, %v10483_v37  ;;  %v10997_v29 = vld [vmem:[#allocation71_spill] sm:$0xff] }
 0x530   :  { %6947 = vst [vmem:[#allocation8 + $0x1c8] sm:$0xff] %v6519_v31  ;;  %v6523_v27 = vadd.f32 %v10527_v56, %v6410_v41  ;;  %v6412_v6 = vadd.f32 %v6411_v25, %v6299_v21  ;;  %v6323_v4 = vadd.f32 %v10997_v29, %v10491_v49  ;;  %v6698_v31 = vpop.f32.mrf.mxu0 }
 0x531   :  { %v6413_v14 = vpop.f32.mrf.mxu1 }
 0x532   :  { %6952 = vst [vmem:[#allocation8 + $0x1f0] sm:$0xff] %v6523_v27  ;;  %v6525_v23 = vadd.f32 %v10535_v0, %v6412_v6  ;;  %v6414_v2 = vadd.f32 %v6413_v14, %v6301_v16  ;;  %v10992_v0 = vld [vmem:[#allocation67_spill] sm:$0xff]  ;;  %v6700_v40 = vpop.f32.mrf.mxu0 }
 0x533   :  { %v6415_v24 = vpop.f32.mrf.mxu1  ;;  %v6311_v38 = vadd.f32 %v10992_v0, %v10483_v37 }
 0x534   :  { %6953 = vst [vmem:[#allocation8 + $0x1f8] sm:$0xff] %v6525_v23  ;;  %v6527_v26 = vadd.f32 %v10543_v46, %v6414_v2  ;;  %v6416_v45 = vadd.f32 %v6415_v24, %v6303_v22  ;;  %v10993_v46 = vld [vmem:[#allocation68_spill] sm:$0xff]  ;;  %v6702_v6 = vpop.f32.mrf.mxu0 }
 0x535   :  { %v6419_v56 = vpop.f32.mrf.mxu1  ;;  %v6313_v50 = vadd.f32 %v10993_v46, %v10491_v49 }
 0x536   :  { %6958 = vst [vmem:[#allocation8 + $0x220] sm:$0xff] %v6527_v26  ;;  %v6529_v47 = vadd.f32 %v6528_v42, %v6416_v45  ;;  %v6420_v43 = vadd.f32 %v6419_v56, %v6307_v48  ;;  %v6317_v42 = vadd.f32 %v10994_v62, %v10483_v37 }
 0x537   :  { %v6421_v11 = vpop.f32.mrf.mxu1 }
 0x538   :  { %6959 = vst [vmem:[#allocation8 + $0x228] sm:$0xff] %v6529_v47  ;;  %v6533_v28 = vadd.f32 %v6532_v7, %v6420_v43  ;;  %v6422_v17 = vadd.f32 %v6421_v11, %v6309_v9  ;;  %v10995_v7 = vld [vmem:[#allocation69_spill] sm:$0xff] }
 0x539   :  { %v6423_v39 = vpop.f32.mrf.mxu1  ;;  %v6319_v53 = vadd.f32 %v10995_v7, %v10491_v49  ;;  %v6704_v49 = vpop.f32.mrf.mxu0 }
 0x53a   :  { %6964 = vst [vmem:[#allocation8 + $0x250] sm:$0xff] %v6533_v28  ;;  %v6535_v36 = vadd.f32 %v6534_v13, %v6422_v17  ;;  %v6424_v61 = vadd.f32 %v6423_v39, %v6311_v38  ;;  %v6321_v13 = vadd.f32 %v10996_v20, %v10483_v37 }
 0x53b   :  { %v6425_v52 = vpop.f32.mrf.mxu1  ;;  %v6708_v23 = vpop.f32.mrf.mxu0 }
 0x53c   :  { %6965 = vst [vmem:[#allocation8 + $0x258] sm:$0xff] %v6535_v36  ;;  %v6537_v59 = vadd.f32 %v6536_v12, %v6424_v61  ;;  %v6426_v60 = vadd.f32 %v6425_v52, %v6313_v50 }
 0x53d   :  { %v6429_v32 = vpop.f32.mrf.mxu1  ;;  %v10601_v3 = vpop.f32.mrf.mxu0 }
 0x53e   :  { %6970 = vst [vmem:[#allocation8 + $0x280] sm:$0xff] %v6537_v59  ;;  %v6539_v63 = vadd.f32 %v6538_v1, %v6426_v60  ;;  %v6430_v19 = vadd.f32 %v6429_v32, %v6317_v42  ;;  %v10998_v32 = vsub.s32 4, %v10927_v58 }
 0x53f   :  { %v6431_v5 = vpop.f32.mrf.mxu1  ;;  %v10607_v45 = vpop.f32.mrf.mxu0 }
 0x540   :  { %6971 = vst [vmem:[#allocation8 + $0x288] sm:$0xff] %v6539_v63  ;;  %v6543_v15 = vadd.f32 %v6542_v30, %v6430_v19  ;;  %v6432_v18 = vadd.f32 %v6431_v5, %v6319_v53  ;;  %v10658_v7 = vrot.slane %v10961_v51, %v10998_v32  ;;  %v10999_v19 = vsub.s32 5, %v10927_v58 }
 0x541   :  { %v6433_v57 = vpop.f32.mrf.mxu1  ;;  %v10613_v10 = vpop.f32.mrf.mxu0 }
 0x542   :  { %6976 = vst [vmem:[#allocation8 + $0x2b0] sm:$0xff] %v6543_v15  ;;  %v6545_v34 = vadd.f32 %v6544_v8, %v6432_v18  ;;  %v6434_v12 = vadd.f32 %v6433_v57, %v6321_v13  ;;  %v10667_v5 = vrot.slane %v10961_v51, %v10999_v19 }
 0x543   :  { %v6435_v35 = vpop.f32.mrf.mxu1  ;;  %v10619_v43 = vpop.f32.mrf.mxu0 }
 0x544   :  { %6977 = vst [vmem:[#allocation8 + $0x2b8] sm:$0xff] %v6545_v34  ;;  %v6547_v54 = vadd.f32 %v6546_v55, %v6434_v12  ;;  %v6436_v21 = vadd.f32 %v6435_v35, %v6323_v4 }
 0x545   :  { %v6585_v41 = vpop.f32.mrf.mxu1  ;;  %v10625_v38 = vpop.f32.mrf.mxu0 }
 0x546   :  { %6982 = vst [vmem:[#allocation8 + $0x2e0] sm:$0xff] %v6547_v54  ;;  %v6549_v25 = vadd.f32 %v6548_v33, %v6436_v21  ;;  %v6586_v13 = vadd.f32 %v6585_v41, %v10658_v7 }
 0x547   :  { %v6587_v37 = vpop.f32.mrf.mxu1  ;;  %v10631_v8 = vpop.f32.mrf.mxu0 }
 0x548   :  { %6983 = vst [vmem:[#allocation8 + $0x2e8] sm:$0xff] %v6549_v25  ;;  %v6588_v33 = vadd.f32 %v6587_v37, %v10667_v5  ;;  %v6699_v4 = vadd.f32 %v6698_v31, %v6586_v13 }
 0x549   :  { %v6589_v16 = vpop.f32.mrf.mxu1  ;;  %v10637_v50 = vpop.f32.mrf.mxu0 }
 0x54a   :  { %v6590_v29 = vadd.f32 %v6589_v16, %v10658_v7  ;;  %v6701_v35 = vadd.f32 %v6700_v40, %v6588_v33 }
 0x54b   :  { %v6591_v27 = vpop.f32.mrf.mxu1  ;;  %v10643_v52 = vpop.f32.mrf.mxu0 }
 0x54c   :  { %v6592_v51 = vadd.f32 %v6591_v27, %v10667_v5  ;;  %v6703_v25 = vadd.f32 %v6702_v6, %v6590_v29 }
 0x54d   :  { %v6595_v1 = vpop.f32.mrf.mxu1  ;;  %v10649_v59 = vpop.f32.mrf.mxu0 }
 0x54e   :  { %v6596_v21 = vadd.f32 %v6595_v1, %v10658_v7  ;;  %v6705_v16 = vadd.f32 %v6704_v49, %v6592_v51 }
 0x54f   :  { %v6597_v14 = vpop.f32.mrf.mxu1  ;;  %v10660_v53 = vpop.f32.mrf.mxu0 }
 0x550   :  { %v6598_v19 = vadd.f32 %v6597_v14, %v10667_v5  ;;  %v6709_v40 = vadd.f32 %v6708_v23, %v6596_v21 }
 0x551   :  { %v6599_v44 = vpop.f32.mrf.mxu1  ;;  %v10672_v15 = vpop.f32.mrf.mxu0 }
 0x553   :  { %v10595_v22 = vpop.f32.mrf.mxu1  ;;  %v10680_v34 = vpop.f32.mrf.mxu0 }
 0x554   :  { %v6602_v6 = vadd.f32 %v10595_v22, %v10667_v5 }
 0x555   :  { %v10597_v2 = vpop.f32.mrf.mxu1  ;;  %v10684_v32 = vpop.f32.mrf.mxu0 }
 0x556   :  { %v6606_v49 = vadd.f32 %v10597_v2, %v10658_v7 }
 0x557   :  { %v10599_v24 = vpop.f32.mrf.mxu1  ;;  %v10688_v33 = vpop.f32.mrf.mxu0 }
 0x558   :  { %v6719_v21 = vadd.f32 %v10619_v43, %v6606_v49 }
 0x559   :  { %v10603_v48 = vpop.f32.mrf.mxu1  ;;  %v10696_v51 = vpop.f32.mrf.mxu0 }
 0x55b   :  { %v10605_v26 = vpop.f32.mrf.mxu1 }
 0x55d   :  { %v10609_v30 = vpop.f32.mrf.mxu1 }
 0x55f   :  { %v10611_v56 = vpop.f32.mrf.mxu1 }
 0x561   :  { %v10615_v9 = vpop.f32.mrf.mxu1 }
 0x563   :  { %v10617_v47 = vpop.f32.mrf.mxu1 }
 0x565   :  { %v10621_v11 = vpop.f32.mrf.mxu1 }
 0x567   :  { %v10623_v0 = vpop.f32.mrf.mxu1 }
 0x569   :  { %v10627_v28 = vpop.f32.mrf.mxu1 }
 0x56b   :  { %v10629_v17 = vpop.f32.mrf.mxu1 }
 0x56d   :  { %v10633_v39 = vpop.f32.mrf.mxu1 }
 0x56f   :  { %v10635_v46 = vpop.f32.mrf.mxu1 }
 0x571   :  { %v10639_v36 = vpop.f32.mrf.mxu1 }
 0x573   :  { %v10641_v61 = vpop.f32.mrf.mxu1 }
 0x575   :  { %v10645_v62 = vpop.f32.mrf.mxu1 }
 0x577   :  { %v10647_v42 = vpop.f32.mrf.mxu1 }
 0x579   :  { %v10651_v60 = vpop.f32.mrf.mxu1 }
 0x57b   :  { %v10653_v55 = vpop.f32.mrf.mxu1 }
 0x57d   :  { %v10662_v63 = vpop.f32.mrf.mxu1 }
 0x57f   :  { %v10669_v20 = vpop.f32.mrf.mxu1 }
 0x581   :  { %v10674_v18 = vpop.f32.mrf.mxu1 }
 0x583   :  { %v10677_v57 = vpop.f32.mrf.mxu1 }
 0x584   :  { %11000 = vst [vmem:[#allocation23_spill] sm:$0xff] %v10677_v57  ;;  %v6600_v57 = vadd.f32 %v6599_v44, %v10658_v7 }
 0x585   :  { %v6811_v58 = vpop.f32.mrf.mxu1 }
 0x586   :  { %v6812_v12 = vadd.f32 %v6811_v58, %v6699_v4  ;;  %v6711_v4 = vadd.f32 %v10601_v3, %v6598_v19  ;;  %v6713_v44 = vadd.f32 %v10607_v45, %v6600_v57  ;;  %v6610_v3 = vadd.f32 %v10603_v48, %v10658_v7 }
 0x587   :  { %v6813_v54 = vpop.f32.mrf.mxu1  ;;  %v6612_v57 = vadd.f32 %v10605_v26, %v10667_v5 }
 0x588   :  { %6894 = vst [vmem:[#allocation8 + $0x20] sm:$0xff] %v6812_v12  ;;  %v6814_v41 = vadd.f32 %v6813_v54, %v6701_v35  ;;  %v6608_v12 = vadd.f32 %v10599_v24, %v10667_v5  ;;  %v6715_v35 = vadd.f32 %v10613_v10, %v6602_v6  ;;  %v6616_v10 = vadd.f32 %v10609_v30, %v10658_v7 }
 0x589   :  { %v6815_v37 = vpop.f32.mrf.mxu1  ;;  %v6723_v19 = vadd.f32 %v10631_v8, %v6610_v3  ;;  %v6725_v26 = vadd.f32 %v10637_v50, %v6612_v57  ;;  %v6622_v8 = vadd.f32 %v10617_v47, %v10667_v5  ;;  %v6626_v50 = vadd.f32 %v10621_v11, %v10658_v7 }
 0x58a   :  { %6895 = vst [vmem:[#allocation8 + $0x28] sm:$0xff] %v6814_v41  ;;  %v6816_v31 = vadd.f32 %v6815_v37, %v6703_v25  ;;  %v10704_v41 = vpop.f32.mrf.mxu0  ;;  %v6721_v25 = vadd.f32 %v10625_v38, %v6608_v12  ;;  %v6620_v38 = vadd.f32 %v10615_v9, %v10658_v7  ;;  %v6729_v30 = vadd.f32 %v10643_v52, %v6616_v10 }
 0x58b   :  { %v6817_v13 = vpop.f32.mrf.mxu1  ;;  %v6628_v52 = vadd.f32 %v10623_v0, %v10667_v5  ;;  %v6735_v47 = vadd.f32 %v10672_v15, %v6622_v8  ;;  %v6739_v11 = vadd.f32 %v10680_v34, %v6626_v50  ;;  %v6636_v15 = vadd.f32 %v10633_v39, %v10658_v7 }
 0x58c   :  { %6900 = vst [vmem:[#allocation8 + $0x50] sm:$0xff] %v6816_v31  ;;  %v6818_v27 = vadd.f32 %v6817_v13, %v6705_v16  ;;  %v6750_v31 = vpop.f32.mrf.mxu0  ;;  %v6618_v16 = vadd.f32 %v10611_v56, %v10667_v5  ;;  %v6733_v9 = vadd.f32 %v10660_v53, %v6620_v38  ;;  %v6632_v53 = vadd.f32 %v10629_v17, %v10667_v5 }
 0x58d   :  { %v6821_v1 = vpop.f32.mrf.mxu1  ;;  %v6741_v0 = vadd.f32 %v10684_v32, %v6628_v52  ;;  %v6638_v34 = vadd.f32 %v10635_v46, %v10667_v5  ;;  %v6640_v32 = vadd.f32 %v10639_v36, %v10658_v7  ;;  %v6749_v39 = vadd.f32 %v10704_v41, %v6636_v15 }
 0x58e   :  { %6901 = vst [vmem:[#allocation8 + $0x58] sm:$0xff] %v6818_v27  ;;  %v6822_v29 = vadd.f32 %v6821_v1, %v6709_v40  ;;  %v6752_v1 = vpop.f32.mrf.mxu0  ;;  %v6731_v56 = vadd.f32 %v10649_v59, %v6618_v16  ;;  %v6630_v59 = vadd.f32 %v10627_v28, %v10658_v7  ;;  %v6745_v17 = vadd.f32 %v10696_v51, %v6632_v53 }
 0x58f   :  { %v6823_v14 = vpop.f32.mrf.mxu1  ;;  %v6751_v46 = vadd.f32 %v6750_v31, %v6638_v34  ;;  %v6646_v51 = vadd.f32 %v10645_v62, %v10658_v7  ;;  %v6753_v16 = vadd.f32 %v6752_v1, %v6640_v32  ;;  %v6648_v41 = vadd.f32 %v10647_v42, %v10667_v5 }
 0x590   :  { %6906 = vst [vmem:[#allocation8 + $0x80] sm:$0xff] %v6822_v29  ;;  %v6824_v58 = vadd.f32 %v6823_v14, %v6711_v4  ;;  %v6754_v49 = vpop.f32.mrf.mxu0  ;;  %v6743_v28 = vadd.f32 %v10688_v33, %v6630_v59  ;;  %v6642_v33 = vadd.f32 %v10641_v61, %v10667_v5  ;;  %v6650_v61 = vadd.f32 %v10651_v60, %v10658_v7 }
 0x591   :  { %v6825_v23 = vpop.f32.mrf.mxu1  ;;  %v6652_v1 = vadd.f32 %v10653_v55, %v10667_v5  ;;  %v6656_v42 = vadd.f32 %v10662_v63, %v10658_v7  ;;  %v6660_v55 = vadd.f32 %v10674_v18, %v10658_v7 }
 0x592   :  { %6907 = vst [vmem:[#allocation8 + $0x88] sm:$0xff] %v6824_v58  ;;  %v6826_v22 = vadd.f32 %v6825_v23, %v6713_v44 }
 0x593   :  { %v6827_v54 = vpop.f32.mrf.mxu1 }
 0x594   :  { %6912 = vst [vmem:[#allocation8 + $0xb0] sm:$0xff] %v6826_v22  ;;  %v6828_v2 = vadd.f32 %v6827_v54, %v6715_v35  ;;  %v6758_v22 = vpop.f32.mrf.mxu0 }
 0x595   :  { %v6831_v45 = vpop.f32.mrf.mxu1 }
 0x596   :  { %6913 = vst [vmem:[#allocation8 + $0xb8] sm:$0xff] %v6828_v2  ;;  %v6832_v24 = vadd.f32 %v6831_v45, %v6719_v21  ;;  %v6760_v21 = vpop.f32.mrf.mxu0 }
 0x597   :  { %v6833_v37 = vpop.f32.mrf.mxu1  ;;  %v6761_v8 = vadd.f32 %v6760_v21, %v6648_v41 }
 0x598   :  { %6918 = vst [vmem:[#allocation8 + $0xe0] sm:$0xff] %v6832_v24  ;;  %v6834_v48 = vadd.f32 %v6833_v37, %v6721_v25  ;;  %v6762_v37 = vpop.f32.mrf.mxu0 }
 0x599   :  { %v6835_v43 = vpop.f32.mrf.mxu1 }
 0x59a   :  { %6919 = vst [vmem:[#allocation8 + $0xe8] sm:$0xff] %v6834_v48  ;;  %v6836_v13 = vadd.f32 %v6835_v43, %v6723_v19  ;;  %v6764_v36 = vpop.f32.mrf.mxu0 }
 0x59b   :  { %v6837_v27 = vpop.f32.mrf.mxu1 }
 0x59c   :  { %6924 = vst [vmem:[#allocation8 + $0x110] sm:$0xff] %v6836_v13  ;;  %v6838_v40 = vadd.f32 %v6837_v27, %v6725_v26  ;;  %v6755_v27 = vadd.f32 %v6754_v49, %v6642_v33  ;;  %v6765_v49 = vadd.f32 %v6764_v36, %v6652_v1 }
 0x59d   :  { %v6841_v6 = vpop.f32.mrf.mxu1 }
 0x59e   :  { %6925 = vst [vmem:[#allocation8 + $0x118] sm:$0xff] %v6838_v40  ;;  %v6842_v29 = vadd.f32 %v6841_v6, %v6729_v30  ;;  %v6759_v40 = vadd.f32 %v6758_v22, %v6646_v51  ;;  %v6768_v30 = vpop.f32.mrf.mxu0 }
 0x59f   :  { %v6843_v4 = vpop.f32.mrf.mxu1 }
 0x5a0   :  { %6930 = vst [vmem:[#allocation8 + $0x140] sm:$0xff] %v6842_v29  ;;  %v6844_v14 = vadd.f32 %v6843_v4, %v6731_v56  ;;  %v6763_v4 = vadd.f32 %v6762_v37, %v6650_v61  ;;  %v6770_v50 = vpop.f32.mrf.mxu0 }
 0x5a1   :  { %v6845_v58 = vpop.f32.mrf.mxu1 }
 0x5a2   :  { %6931 = vst [vmem:[#allocation8 + $0x148] sm:$0xff] %v6844_v14  ;;  %v6846_v44 = vadd.f32 %v6845_v58, %v6733_v9  ;;  %v6658_v14 = vadd.f32 %v10669_v20, %v10667_v5 }
 0x5a3   :  { %v6847_v23 = vpop.f32.mrf.mxu1 }
 0x5a4   :  { %6936 = vst [vmem:[#allocation8 + $0x170] sm:$0xff] %v6846_v44  ;;  %v6848_v12 = vadd.f32 %v6847_v23, %v6735_v47  ;;  %v6769_v44 = vadd.f32 %v6768_v30, %v6656_v42  ;;  %v6772_v47 = vpop.f32.mrf.mxu0  ;;  %v11001_v23 = vld [vmem:[#allocation23_spill] sm:$0xff] }
 0x5a5   :  { %v6851_v35 = vpop.f32.mrf.mxu1  ;;  %v6662_v59 = vadd.f32 %v11001_v23, %v10667_v5 }
 0x5a6   :  { %6937 = vst [vmem:[#allocation8 + $0x178] sm:$0xff] %v6848_v12  ;;  %v6852_v54 = vadd.f32 %v6851_v35, %v6739_v11  ;;  %v6771_v11 = vadd.f32 %v6770_v50, %v6658_v14  ;;  %v6773_v35 = vadd.f32 %v6772_v47, %v6660_v55  ;;  %v6774_v53 = vpop.f32.mrf.mxu0 }
 0x5a7   :  { %v6853_v3 = vpop.f32.mrf.mxu1  ;;  %v6775_v18 = vadd.f32 %v6774_v53, %v6662_v59 }
 0x5a8   :  { %6942 = vst [vmem:[#allocation8 + $0x1a0] sm:$0xff] %v6852_v54  ;;  %v6854_v2 = vadd.f32 %v6853_v3, %v6741_v0 }
 0x5a9   :  { %v6855_v45 = vpop.f32.mrf.mxu1 }
 0x5aa   :  { %6943 = vst [vmem:[#allocation8 + $0x1a8] sm:$0xff] %v6854_v2  ;;  %v6856_v57 = vadd.f32 %v6855_v45, %v6743_v28 }
 0x5ab   :  { %v6857_v24 = vpop.f32.mrf.mxu1 }
 0x5ac   :  { %6948 = vst [vmem:[#allocation8 + $0x1d0] sm:$0xff] %v6856_v57  ;;  %v6858_v25 = vadd.f32 %v6857_v24, %v6745_v17 }
 0x5ad   :  { %v6861_v10 = vpop.f32.mrf.mxu1 }
 0x5ae   :  { %6949 = vst [vmem:[#allocation8 + $0x1d8] sm:$0xff] %v6858_v25  ;;  %v6862_v48 = vadd.f32 %v6861_v10, %v6749_v39 }
 0x5af   :  { %v6863_v19 = vpop.f32.mrf.mxu1 }
 0x5b0   :  { %6954 = vst [vmem:[#allocation8 + $0x200] sm:$0xff] %v6862_v48  ;;  %v6864_v43 = vadd.f32 %v6863_v19, %v6751_v46 }
 0x5b1   :  { %v6865_v13 = vpop.f32.mrf.mxu1 }
 0x5b2   :  { %6955 = vst [vmem:[#allocation8 + $0x208] sm:$0xff] %v6864_v43  ;;  %v6866_v26 = vadd.f32 %v6865_v13, %v6753_v16 }
 0x5b3   :  { %v6867_v38 = vpop.f32.mrf.mxu1 }
 0x5b4   :  { %6960 = vst [vmem:[#allocation8 + $0x230] sm:$0xff] %v6866_v26  ;;  %v6868_v31 = vadd.f32 %v6867_v38, %v6755_v27 }
 0x5b5   :  { %v6871_v62 = vpop.f32.mrf.mxu1 }
 0x5b6   :  { %6961 = vst [vmem:[#allocation8 + $0x238] sm:$0xff] %v6868_v31  ;;  %v6872_v6 = vadd.f32 %v6871_v62, %v6759_v40 }
 0x5b7   :  { %v6873_v29 = vpop.f32.mrf.mxu1 }
 0x5b8   :  { %6966 = vst [vmem:[#allocation8 + $0x260] sm:$0xff] %v6872_v6  ;;  %v6874_v56 = vadd.f32 %v6873_v29, %v6761_v8 }
 0x5b9   :  { %v6875_v60 = vpop.f32.mrf.mxu1 }
 0x5ba   :  { %6967 = vst [vmem:[#allocation8 + $0x268] sm:$0xff] %v6874_v56  ;;  %v6876_v9 = vadd.f32 %v6875_v60, %v6763_v4 }
 0x5bb   :  { %v6877_v58 = vpop.f32.mrf.mxu1 }
 0x5bc   :  { %6972 = vst [vmem:[#allocation8 + $0x290] sm:$0xff] %v6876_v9  ;;  %v6878_v52 = vadd.f32 %v6877_v58, %v6765_v49 }
 0x5bd   :  { %v6881_v63 = vpop.f32.mrf.mxu1 }
 0x5be   :  { %6973 = vst [vmem:[#allocation8 + $0x298] sm:$0xff] %v6878_v52  ;;  %v6882_v12 = vadd.f32 %v6881_v63, %v6769_v44 }
 0x5bf   :  { %v6883_v22 = vpop.f32.mrf.mxu1 }
 0x5c0   :  { %6978 = vst [vmem:[#allocation8 + $0x2c0] sm:$0xff] %v6882_v12  ;;  %v6884_v20 = vadd.f32 %v6883_v22, %v6771_v11 }
 0x5c1   :  { %v6885_v54 = vpop.f32.mrf.mxu1 }
 0x5c2   :  { %6979 = vst [vmem:[#allocation8 + $0x2c8] sm:$0xff] %v6884_v20  ;;  %v6886_v7 = vadd.f32 %v6885_v54, %v6773_v35 }
 0x5c3   :  { %v6887_v0 = vpop.f32.mrf.mxu1 }
 0x5c4   :  { %6984 = vst [vmem:[#allocation8 + $0x2f0] sm:$0xff] %v6886_v7  ;;  %v6888_v3 = vadd.f32 %v6887_v0, %v6775_v18 }
 0x5c6   :  { %6985 = vst [vmem:[#allocation8 + $0x2f8] sm:$0xff] %v6888_v3 }
 0x5c7   :  { %8671 = shalt.err (!%p8668_p5)
}
 0x5c8   :  { %s8695_s10 = smov 768   ;;  %s8696_s11 = smov 48  }
 0x5c9   :  { %6997 = dma.vmem_to_hbm [thread:$0]  %s6992_s8, 12288, %s10769_s6, [#allocation4], %s8695_s10, %s8695_s10, %s8696_s11  }
 0x5ca   :  { %8684 = dma.done.wait [#allocation4], 12288  }
 0x5cb   :  { %8685 = vsyncadd [#allocation4], 4294955008 }
 0x5cc   :  { %7001 = vsyncpa [#allocation3], 1 }
 0x5cd   :  { %7002 = vsyncpa [#allocation6], 1 }
 0x5ce   :  { %7003 = vsyncpa [#allocation4], 1 }

</bundles_post_ra>
